<compile_context>
chip_gen: v6e
topology: v6e:2x2x1
jax: 0.10.0
libtpu: 0.0.40
codegen_flags: <defaults>
</compile_context>

<pallas_src>
import jax
import jax.numpy as jnp
from jax import lax
from jax.experimental import pallas as pl
from jax.experimental.pallas import tpu as pltpu


# ----------------------------------------------------------------------------
# Pallas kernel: 3x3 conv (pad=1, stride=1) + folded-BN bias + HSwish
# ----------------------------------------------------------------------------
def _conv3x3_bn_hswish_kernel(main_ref, h1_ref, h2_ref, w_ref, b_ref, o_ref):
    # main_ref: (1, TH, W+2, Cin)  padded-input rows [i*TH, i*TH+TH)
    # h1_ref:   (1, 1,  W+2, Cin)  padded-input row   i*TH+TH      (halo)
    # h2_ref:   (1, 1,  W+2, Cin)  padded-input row   i*TH+TH+1    (halo)
    # w_ref:    (9, Cin, Cout)     bf16, BN scale folded in
    # b_ref:    (1, Cout)          f32 folded BN bias
    # o_ref:    (1, TH, W, Cout)
    _, TH, Wp, Cin = main_ref.shape
    W = Wp - 2
    Cout = o_ref.shape[-1]

    # (TH+2, W+2, Cin) halo block (concat along the outer dim only).
    x = jnp.concatenate([main_ref[0], h1_ref[0], h2_ref[0]], axis=0)

    # 9 shifted taps, each a static slice of the VMEM halo block; accumulate
    # the 9 MXU matmuls in f32.
    acc = jnp.zeros((TH * W, Cout), jnp.float32)
    for t in range(9):
        ky, kx = divmod(t, 3)
        tap = x[ky:ky + TH, kx:kx + W, :].reshape(TH * W, Cin)
        acc = acc + jnp.dot(tap, w_ref[t], preferred_element_type=jnp.float32)

    y = acc + b_ref[...]                                 # folded BatchNorm bias
    y = y * jnp.clip(y + 3.0, 0.0, 6.0) * (1.0 / 6.0)    # HSwish (f32 epilogue)
    o_ref[...] = y.reshape(1, TH, W, Cout).astype(o_ref.dtype)


def _pick_tile_h(H, W):
    """Largest row tile TH that divides H, keeps M = TH*W <= ~1024 rows and
    leaves at least two row tiles (so the BlockSpec pipeline has work)."""
    cap = max(1, 1024 // max(W, 1))
    if H >= 4:
        cap = min(cap, H // 2)
    for th in range(max(1, min(H, cap)), 0, -1):
        if H % th == 0:
            return th
    return 1


def conv_bn_hswish(x_nhwc, w, bias, *, out_dtype=None):
    """One CBNModule: conv3x3(pad=1) + folded BN + HSwish, NHWC in/out."""
    N, H, W, Cin = x_nhwc.shape
    assert w.shape[0] == 9 and w.shape[1] == Cin, w.shape
    Cout = w.shape[2]
    out_dtype = out_dtype or x_nhwc.dtype

    # 1-pixel zero pad (cheap; replaces the old 9x HBM im2col entirely).
    xp = jnp.pad(x_nhwc, ((0, 0), (1, 1), (1, 1), (0, 0)))
    Wp = W + 2
    TH = _pick_tile_h(H, W)
    grid = (N, H // TH)

    in_specs = [
        # main block of TH padded rows
        pl.BlockSpec((1, TH, Wp, Cin), lambda n, i: (n, i, 0, 0)),
        # two single-row bottom halos (block size 1 => element-row index)
        pl.BlockSpec((1, 1, Wp, Cin), lambda n, i: (n, (i + 1) * TH, 0, 0)),
        pl.BlockSpec((1, 1, Wp, Cin), lambda n, i: (n, (i + 1) * TH + 1, 0, 0)),
        # weights / bias stay resident in VMEM across the whole grid
        pl.BlockSpec((9, Cin, Cout), lambda n, i: (0, 0, 0)),
        pl.BlockSpec((1, Cout), lambda n, i: (0, 0)),
    ]
    out_specs = pl.BlockSpec((1, TH, W, Cout), lambda n, i: (n, i, 0, 0))

    cost = pl.CostEstimate(
        flops=2 * 9 * N * H * W * Cin * Cout,
        transcendentals=0,
        bytes_accessed=int(
            xp.size * xp.dtype.itemsize
            + w.size * w.dtype.itemsize
            + N * H * W * Cout * jnp.dtype(out_dtype).itemsize
        ),
    )

    return pl.pallas_call(
        _conv3x3_bn_hswish_kernel,
        out_shape=jax.ShapeDtypeStruct((N, H, W, Cout), out_dtype),
        grid=grid,
        in_specs=in_specs,
        out_specs=out_specs,
        compiler_params=pltpu.CompilerParams(
            dimension_semantics=("parallel", "parallel"),
            vmem_limit_bytes=48 * 1024 * 1024,
        ),
        cost_estimate=cost,
    )(xp, xp, xp, w, bias)


# ----------------------------------------------------------------------------
# Parameter construction (deterministic, synthetic) with BN scale folded in
# ----------------------------------------------------------------------------
def _make_cbn_params(key, cin, cout):
    k1, k2, k3, k4, k5 = jax.random.split(key, 5)
    w = 0.1 * jax.random.normal(k1, (3, 3, cin, cout), jnp.float32)  # HWIO
    gamma = 1.0 + 0.1 * jax.random.normal(k2, (cout,), jnp.float32)
    beta = 0.1 * jax.random.normal(k3, (cout,), jnp.float32)
    running_mean = 0.1 * jax.random.normal(k4, (cout,), jnp.float32)
    running_var = jnp.abs(jax.random.normal(k5, (cout,), jnp.float32)) + 0.5
    eps = 1e-5
    scale = gamma / jnp.sqrt(running_var + eps)
    bias = beta - running_mean * scale
    # Fold the BN scale into the conv weights; keep bias in f32.
    w_folded = (w * scale).reshape(9, cin, cout).astype(jnp.bfloat16)
    return {"w": w_folded, "b": bias.reshape(1, cout).astype(jnp.float32)}


def make_context_module_params(key, inchannel):
    half = inchannel // 2
    C = inchannel
    k1, k2, k3, k4 = jax.random.split(key, 4)
    p = {
        "inconv": _make_cbn_params(k1, C, C),
        "upconv": _make_cbn_params(k2, half, half),
        "downconv": _make_cbn_params(k3, half, half),
        "downconv2": _make_cbn_params(k4, half, half),
    }
    f32 = jnp.float32
    # (a) upconv & downconv fused into ONE block-diagonal conv over all C
    #     channels (one pallas_call, 2x wider lane-dense output stores).
    w2 = jnp.zeros((9, C, C), f32)
    w2 = w2.at[:, :half, :half].set(p["upconv"]["w"].astype(f32))
    w2 = w2.at[:, half:, half:].set(p["downconv"]["w"].astype(f32))
    b2 = jnp.concatenate([p["upconv"]["b"], p["downconv"]["b"]], axis=-1)
    p["updown"] = {"w": w2.astype(jnp.bfloat16), "b": b2}
    # (b) downconv2 lifted to consume all C channels with zero weights on the
    #     `up` half: avoids an XLA channel-slice copy of the activation.
    w3 = jnp.zeros((9, C, half), f32)
    w3 = w3.at[:, half:, :].set(p["downconv2"]["w"].astype(f32))
    p["downconv2_full"] = {"w": w3.astype(jnp.bfloat16), "b": p["downconv2"]["b"]}
    return p


# ----------------------------------------------------------------------------
# ContextModule forward
# ----------------------------------------------------------------------------
def context_module(x_nchw, params):
    # NCHW at the boundary (PyTorch semantics); NHWC bf16 between layers.
    x = jnp.transpose(x_nchw, (0, 2, 3, 1)).astype(jnp.bfloat16)
    half = x.shape[-1] // 2
    # inconv
    x = conv_bn_hswish(x, params["inconv"]["w"], params["inconv"]["b"])
    # torch.chunk + upconv + downconv fused via block-diagonal weights
    x = conv_bn_hswish(x, params["updown"]["w"], params["updown"]["b"])
    # downconv2 (reads all channels; up-half weights are zero)
    down = conv_bn_hswish(
        x, params["downconv2_full"]["w"], params["downconv2_full"]["b"],
        out_dtype=jnp.float32)
    up = x[..., :half].astype(jnp.float32)
    # torch.cat([up, down], dim=1): fuses with the mandatory NHWC->NCHW
    # transpose inside XLA (no extra standalone copy pass).
    out = jnp.concatenate([up, down], axis=-1)
    return jnp.transpose(out, (0, 3, 1, 2))


# ----------------------------------------------------------------------------
# Pure-JAX reference (correctness check only) -- uses the same folded bf16
# weights as the kernels, but f32 activations end-to-end.
# ----------------------------------------------------------------------------
def _ref_cbn(x, w, bias):
    cin, cout = w.shape[1], w.shape[2]
    w_hwio = w.astype(jnp.float32).reshape(3, 3, cin, cout)
    y = lax.conv_general_dilated(
        x, w_hwio, (1, 1), ((1, 1), (1, 1)),
        dimension_numbers=("NHWC", "HWIO", "NHWC"))
    y = y + bias
    return y * jnp.clip(y + 3.0, 0.0, 6.0) / 6.0


def _ref_context_module(x_nchw, p):
    x = jnp.transpose(x_nchw, (0, 2, 3, 1))
    x = x.astype(jnp.bfloat16).astype(jnp.float32)  # kernel ingests bf16 input
    x = _ref_cbn(x, p["inconv"]["w"], p["inconv"]["b"])
    half = x.shape[-1] // 2
    up, down = x[..., :half], x[..., half:]
    up = _ref_cbn(up, p["upconv"]["w"], p["upconv"]["b"])
    down = _ref_cbn(down, p["downconv"]["w"], p["downconv"]["b"])
    down = _ref_cbn(down, p["downconv2"]["w"], p["downconv2"]["b"])
    out = jnp.concatenate([up, down], axis=-1)
    return jnp.transpose(out, (0, 3, 1, 2))


if __name__ == "__main__":
    key = jax.random.PRNGKey(0)
    kx, kp = jax.random.split(key)

    N, C, H, W = 2, 4, 16, 16   # inchannel = 4 (even, so chunk gives 2 + 2)
    x = jax.random.normal(kx, (N, C, H, W), jnp.float32)
    params = make_context_module_params(kp, C)

    out = jax.block_until_ready(jax.jit(context_module)(x, params))
    ref = jax.block_until_ready(_ref_context_module(x, params))

    assert out.shape == (N, C, H, W), out.shape
    # bf16 activations between layers -> small rounding vs the f32 reference.
    max_err = float(jnp.max(jnp.abs(out - ref)))
    assert max_err < 5e-2, f"max abs error too large: {max_err}"
    print("KERNEL_OK")
</pallas_src>

<mosaic_0001>
module attributes {stable_mosaic.version = 11 : i64} {
  func.func @_conv3x3_bn_hswish_kernel(%arg0: i32, %arg1: i32, %arg2: memref<1x8x18x4xbf16, #tpu.memory_space<vmem>>, %arg3: memref<1x1x18x4xbf16, #tpu.memory_space<vmem>>, %arg4: memref<1x1x18x4xbf16, #tpu.memory_space<vmem>>, %arg5: memref<9x4x4xbf16, #tpu.memory_space<vmem>>, %arg6: memref<1x4xf32, #tpu.memory_space<vmem>>, %arg7: memref<1x8x16x4xbf16, #tpu.memory_space<vmem>>) attributes {dimension_semantics = [#tpu.dimension_semantics<parallel>, #tpu.dimension_semantics<parallel>], iteration_bounds = array<i64: 2, 2>, scalar_prefetch = 0 : i64, scratch_operands = 0 : i64, tpu.core_type = #tpu.core_type<tc>, window_params = [{transform_indices = @transform_0, window_bounds = array<i64: 1, 8, 18, 4>}, {transform_indices = @transform_1, window_bounds = array<i64: 1, 1, 18, 4>}, {transform_indices = @transform_2, window_bounds = array<i64: 1, 1, 18, 4>}, {pipeline_mode = #tpu.pipeline_mode<synchronous>, transform_indices = @transform_3, window_bounds = array<i64: 9, 4, 4>}, {pipeline_mode = #tpu.pipeline_mode<synchronous>, transform_indices = @transform_4, window_bounds = array<i64: 1, 4>}, {transform_indices = @transform_5, window_bounds = array<i64: 1, 8, 16, 4>}]} {
    %c0 = arith.constant 0 : index
    %c0_0 = arith.constant 0 : index
    %c0_1 = arith.constant 0 : index
    %c0_2 = arith.constant 0 : index
    %0 = vector.load %arg2[%c0, %c0_0, %c0_1, %c0_2] : memref<1x8x18x4xbf16, #tpu.memory_space<vmem>>, vector<1x8x18x4xbf16>
    %1 = vector.shape_cast %0 : vector<1x8x18x4xbf16> to vector<8x18x4xbf16>
    %c0_3 = arith.constant 0 : index
    %c0_4 = arith.constant 0 : index
    %c0_5 = arith.constant 0 : index
    %c0_6 = arith.constant 0 : index
    %2 = vector.load %arg3[%c0_3, %c0_4, %c0_5, %c0_6] : memref<1x1x18x4xbf16, #tpu.memory_space<vmem>>, vector<1x1x18x4xbf16>
    %3 = vector.shape_cast %2 : vector<1x1x18x4xbf16> to vector<1x18x4xbf16>
    %c0_7 = arith.constant 0 : index
    %c0_8 = arith.constant 0 : index
    %c0_9 = arith.constant 0 : index
    %c0_10 = arith.constant 0 : index
    %4 = vector.load %arg4[%c0_7, %c0_8, %c0_9, %c0_10] : memref<1x1x18x4xbf16, #tpu.memory_space<vmem>>, vector<1x1x18x4xbf16>
    %5 = vector.shape_cast %4 : vector<1x1x18x4xbf16> to vector<1x18x4xbf16>
    %6 = tpu.concatenate %1, %3, %5 in 0 : vector<8x18x4xbf16>, vector<1x18x4xbf16>, vector<1x18x4xbf16> -> vector<10x18x4xbf16>
    %cst = arith.constant 0.000000e+00 : f32
    %7 = vector.broadcast %cst : f32 to vector<128x4xf32>
    %8 = vector.extract_strided_slice %6 {offsets = [0, 0, 0], sizes = [8, 16, 4], strides = [1, 1, 1]} : vector<10x18x4xbf16> to vector<8x16x4xbf16>
    %9 = vector.shape_cast %8 : vector<8x16x4xbf16> to vector<128x4xbf16>
    %c0_11 = arith.constant 0 : index
    %c0_12 = arith.constant 0 : index
    %c0_13 = arith.constant 0 : index
    %10 = vector.load %arg5[%c0_11, %c0_12, %c0_13] : memref<9x4x4xbf16, #tpu.memory_space<vmem>>, vector<1x4x4xbf16>
    %11 = vector.shape_cast %10 : vector<1x4x4xbf16> to vector<4x4xbf16>
    %cst_14 = arith.constant dense<0.000000e+00> : vector<128x4xf32>
    %12 = tpu.matmul %9, %11, %cst_14 {dimension_numbers = #tpu.dot_dimension_numbers<[1], [0], [0], [1], [0, 0, 1, 1], [], []>} : vector<128x4xbf16>, vector<4x4xbf16>, vector<128x4xf32> -> vector<128x4xf32>
    %13 = arith.addf %7, %12 : vector<128x4xf32>
    %14 = vector.extract_strided_slice %6 {offsets = [0, 1, 0], sizes = [8, 16, 4], strides = [1, 1, 1]} : vector<10x18x4xbf16> to vector<8x16x4xbf16>
    %15 = vector.shape_cast %14 : vector<8x16x4xbf16> to vector<128x4xbf16>
    %c1 = arith.constant 1 : index
    %c0_15 = arith.constant 0 : index
    %c0_16 = arith.constant 0 : index
    %16 = vector.load %arg5[%c1, %c0_15, %c0_16] : memref<9x4x4xbf16, #tpu.memory_space<vmem>>, vector<1x4x4xbf16>
    %17 = vector.shape_cast %16 : vector<1x4x4xbf16> to vector<4x4xbf16>
    %cst_17 = arith.constant dense<0.000000e+00> : vector<128x4xf32>
    %18 = tpu.matmul %15, %17, %cst_17 {dimension_numbers = #tpu.dot_dimension_numbers<[1], [0], [0], [1], [0, 0, 1, 1], [], []>} : vector<128x4xbf16>, vector<4x4xbf16>, vector<128x4xf32> -> vector<128x4xf32>
    %19 = arith.addf %13, %18 : vector<128x4xf32>
    %20 = vector.extract_strided_slice %6 {offsets = [0, 2, 0], sizes = [8, 16, 4], strides = [1, 1, 1]} : vector<10x18x4xbf16> to vector<8x16x4xbf16>
    %21 = vector.shape_cast %20 : vector<8x16x4xbf16> to vector<128x4xbf16>
    %c2 = arith.constant 2 : index
    %c0_18 = arith.constant 0 : index
    %c0_19 = arith.constant 0 : index
    %22 = vector.load %arg5[%c2, %c0_18, %c0_19] : memref<9x4x4xbf16, #tpu.memory_space<vmem>>, vector<1x4x4xbf16>
    %23 = vector.shape_cast %22 : vector<1x4x4xbf16> to vector<4x4xbf16>
    %cst_20 = arith.constant dense<0.000000e+00> : vector<128x4xf32>
    %24 = tpu.matmul %21, %23, %cst_20 {dimension_numbers = #tpu.dot_dimension_numbers<[1], [0], [0], [1], [0, 0, 1, 1], [], []>} : vector<128x4xbf16>, vector<4x4xbf16>, vector<128x4xf32> -> vector<128x4xf32>
    %25 = arith.addf %19, %24 : vector<128x4xf32>
    %26 = vector.extract_strided_slice %6 {offsets = [1, 0, 0], sizes = [8, 16, 4], strides = [1, 1, 1]} : vector<10x18x4xbf16> to vector<8x16x4xbf16>
    %27 = vector.shape_cast %26 : vector<8x16x4xbf16> to vector<128x4xbf16>
    %c3 = arith.constant 3 : index
    %c0_21 = arith.constant 0 : index
    %c0_22 = arith.constant 0 : index
    %28 = vector.load %arg5[%c3, %c0_21, %c0_22] : memref<9x4x4xbf16, #tpu.memory_space<vmem>>, vector<1x4x4xbf16>
    %29 = vector.shape_cast %28 : vector<1x4x4xbf16> to vector<4x4xbf16>
    %cst_23 = arith.constant dense<0.000000e+00> : vector<128x4xf32>
    %30 = tpu.matmul %27, %29, %cst_23 {dimension_numbers = #tpu.dot_dimension_numbers<[1], [0], [0], [1], [0, 0, 1, 1], [], []>} : vector<128x4xbf16>, vector<4x4xbf16>, vector<128x4xf32> -> vector<128x4xf32>
    %31 = arith.addf %25, %30 : vector<128x4xf32>
    %32 = vector.extract_strided_slice %6 {offsets = [1, 1, 0], sizes = [8, 16, 4], strides = [1, 1, 1]} : vector<10x18x4xbf16> to vector<8x16x4xbf16>
    %33 = vector.shape_cast %32 : vector<8x16x4xbf16> to vector<128x4xbf16>
    %c4 = arith.constant 4 : index
    %c0_24 = arith.constant 0 : index
    %c0_25 = arith.constant 0 : index
    %34 = vector.load %arg5[%c4, %c0_24, %c0_25] : memref<9x4x4xbf16, #tpu.memory_space<vmem>>, vector<1x4x4xbf16>
    %35 = vector.shape_cast %34 : vector<1x4x4xbf16> to vector<4x4xbf16>
    %cst_26 = arith.constant dense<0.000000e+00> : vector<128x4xf32>
    %36 = tpu.matmul %33, %35, %cst_26 {dimension_numbers = #tpu.dot_dimension_numbers<[1], [0], [0], [1], [0, 0, 1, 1], [], []>} : vector<128x4xbf16>, vector<4x4xbf16>, vector<128x4xf32> -> vector<128x4xf32>
    %37 = arith.addf %31, %36 : vector<128x4xf32>
    %38 = vector.extract_strided_slice %6 {offsets = [1, 2, 0], sizes = [8, 16, 4], strides = [1, 1, 1]} : vector<10x18x4xbf16> to vector<8x16x4xbf16>
    %39 = vector.shape_cast %38 : vector<8x16x4xbf16> to vector<128x4xbf16>
    %c5 = arith.constant 5 : index
    %c0_27 = arith.constant 0 : index
    %c0_28 = arith.constant 0 : index
    %40 = vector.load %arg5[%c5, %c0_27, %c0_28] : memref<9x4x4xbf16, #tpu.memory_space<vmem>>, vector<1x4x4xbf16>
    %41 = vector.shape_cast %40 : vector<1x4x4xbf16> to vector<4x4xbf16>
    %cst_29 = arith.constant dense<0.000000e+00> : vector<128x4xf32>
    %42 = tpu.matmul %39, %41, %cst_29 {dimension_numbers = #tpu.dot_dimension_numbers<[1], [0], [0], [1], [0, 0, 1, 1], [], []>} : vector<128x4xbf16>, vector<4x4xbf16>, vector<128x4xf32> -> vector<128x4xf32>
    %43 = arith.addf %37, %42 : vector<128x4xf32>
    %44 = vector.extract_strided_slice %6 {offsets = [2, 0, 0], sizes = [8, 16, 4], strides = [1, 1, 1]} : vector<10x18x4xbf16> to vector<8x16x4xbf16>
    %45 = vector.shape_cast %44 : vector<8x16x4xbf16> to vector<128x4xbf16>
    %c6 = arith.constant 6 : index
    %c0_30 = arith.constant 0 : index
    %c0_31 = arith.constant 0 : index
    %46 = vector.load %arg5[%c6, %c0_30, %c0_31] : memref<9x4x4xbf16, #tpu.memory_space<vmem>>, vector<1x4x4xbf16>
    %47 = vector.shape_cast %46 : vector<1x4x4xbf16> to vector<4x4xbf16>
    %cst_32 = arith.constant dense<0.000000e+00> : vector<128x4xf32>
    %48 = tpu.matmul %45, %47, %cst_32 {dimension_numbers = #tpu.dot_dimension_numbers<[1], [0], [0], [1], [0, 0, 1, 1], [], []>} : vector<128x4xbf16>, vector<4x4xbf16>, vector<128x4xf32> -> vector<128x4xf32>
    %49 = arith.addf %43, %48 : vector<128x4xf32>
    %50 = vector.extract_strided_slice %6 {offsets = [2, 1, 0], sizes = [8, 16, 4], strides = [1, 1, 1]} : vector<10x18x4xbf16> to vector<8x16x4xbf16>
    %51 = vector.shape_cast %50 : vector<8x16x4xbf16> to vector<128x4xbf16>
    %c7 = arith.constant 7 : index
    %c0_33 = arith.constant 0 : index
    %c0_34 = arith.constant 0 : index
    %52 = vector.load %arg5[%c7, %c0_33, %c0_34] : memref<9x4x4xbf16, #tpu.memory_space<vmem>>, vector<1x4x4xbf16>
    %53 = vector.shape_cast %52 : vector<1x4x4xbf16> to vector<4x4xbf16>
    %cst_35 = arith.constant dense<0.000000e+00> : vector<128x4xf32>
    %54 = tpu.matmul %51, %53, %cst_35 {dimension_numbers = #tpu.dot_dimension_numbers<[1], [0], [0], [1], [0, 0, 1, 1], [], []>} : vector<128x4xbf16>, vector<4x4xbf16>, vector<128x4xf32> -> vector<128x4xf32>
    %55 = arith.addf %49, %54 : vector<128x4xf32>
    %56 = vector.extract_strided_slice %6 {offsets = [2, 2, 0], sizes = [8, 16, 4], strides = [1, 1, 1]} : vector<10x18x4xbf16> to vector<8x16x4xbf16>
    %57 = vector.shape_cast %56 : vector<8x16x4xbf16> to vector<128x4xbf16>
    %c8 = arith.constant 8 : index
    %c0_36 = arith.constant 0 : index
    %c0_37 = arith.constant 0 : index
    %58 = vector.load %arg5[%c8, %c0_36, %c0_37] : memref<9x4x4xbf16, #tpu.memory_space<vmem>>, vector<1x4x4xbf16>
    %59 = vector.shape_cast %58 : vector<1x4x4xbf16> to vector<4x4xbf16>
    %cst_38 = arith.constant dense<0.000000e+00> : vector<128x4xf32>
    %60 = tpu.matmul %57, %59, %cst_38 {dimension_numbers = #tpu.dot_dimension_numbers<[1], [0], [0], [1], [0, 0, 1, 1], [], []>} : vector<128x4xbf16>, vector<4x4xbf16>, vector<128x4xf32> -> vector<128x4xf32>
    %61 = arith.addf %55, %60 : vector<128x4xf32>
    %c0_39 = arith.constant 0 : index
    %c0_40 = arith.constant 0 : index
    %62 = vector.load %arg6[%c0_39, %c0_40] : memref<1x4xf32, #tpu.memory_space<vmem>>, vector<1x4xf32>
    %63 = vector.broadcast %62 : vector<1x4xf32> to vector<128x4xf32>
    %64 = arith.addf %61, %63 : vector<128x4xf32>
    %cst_41 = arith.constant 3.000000e+00 : f32
    %65 = vector.broadcast %cst_41 : f32 to vector<128x4xf32>
    %66 = arith.addf %64, %65 : vector<128x4xf32>
    %cst_42 = arith.constant 0.000000e+00 : f32
    %cst_43 = arith.constant 6.000000e+00 : f32
    %67 = vector.broadcast %cst_42 : f32 to vector<128x4xf32>
    %68 = arith.maximumf %67, %66 : vector<128x4xf32>
    %69 = vector.broadcast %cst_43 : f32 to vector<128x4xf32>
    %70 = arith.minimumf %69, %68 : vector<128x4xf32>
    %71 = arith.mulf %64, %70 : vector<128x4xf32>
    %cst_44 = arith.constant 0.166666672 : f32
    %72 = vector.broadcast %cst_44 : f32 to vector<128x4xf32>
    %73 = arith.mulf %71, %72 : vector<128x4xf32>
    %74 = vector.shape_cast %73 : vector<128x4xf32> to vector<1x8x16x4xf32>
    %75 = arith.truncf %74 : vector<1x8x16x4xf32> to vector<1x8x16x4xbf16>
    %c0_45 = arith.constant 0 : index
    %c0_46 = arith.constant 0 : index
    %c0_47 = arith.constant 0 : index
    %c0_48 = arith.constant 0 : index
    %76 = vector.load %arg7[%c0_45, %c0_46, %c0_47, %c0_48] : memref<1x8x16x4xbf16, #tpu.memory_space<vmem>>, vector<1x8x16x4xbf16>
    tpu.vector_store %arg7[%c0_45, %c0_46, %c0_47, %c0_48], %75 {strides = array<i32>} : memref<1x8x16x4xbf16, #tpu.memory_space<vmem>>, vector<1x8x16x4xbf16>,
    return
  }
  func.func @transform_0(%arg0: i32, %arg1: i32) -> (i32, i32, i32, i32) {
    %c0_i32 = arith.constant 0 : i32
    %c0_i32_0 = arith.constant 0 : i32
    %c0_i32_1 = arith.constant 0 : i32
    return %arg0, %arg1, %c0_i32, %c0_i32_0 : i32, i32, i32, i32
  }
  func.func @transform_1(%arg0: i32, %arg1: i32) -> (i32, i32, i32, i32) {
    %c1_i32 = arith.constant 1 : i32
    %0 = arith.addi %arg1, %c1_i32 : i32
    %c8_i32 = arith.constant 8 : i32
    %1 = arith.muli %0, %c8_i32 : i32
    %c0_i32 = arith.constant 0 : i32
    %c0_i32_0 = arith.constant 0 : i32
    %c0_i32_1 = arith.constant 0 : i32
    return %arg0, %1, %c0_i32, %c0_i32_0 : i32, i32, i32, i32
  }
  func.func @transform_2(%arg0: i32, %arg1: i32) -> (i32, i32, i32, i32) {
    %c1_i32 = arith.constant 1 : i32
    %0 = arith.addi %arg1, %c1_i32 : i32
    %c8_i32 = arith.constant 8 : i32
    %1 = arith.muli %0, %c8_i32 : i32
    %c1_i32_0 = arith.constant 1 : i32
    %2 = arith.addi %1, %c1_i32_0 : i32
    %c0_i32 = arith.constant 0 : i32
    %c0_i32_1 = arith.constant 0 : i32
    %c0_i32_2 = arith.constant 0 : i32
    return %arg0, %2, %c0_i32, %c0_i32_1 : i32, i32, i32, i32
  }
  func.func @transform_3(%arg0: i32, %arg1: i32) -> (i32, i32, i32) {
    %c0_i32 = arith.constant 0 : i32
    %c0_i32_0 = arith.constant 0 : i32
    %c0_i32_1 = arith.constant 0 : i32
    %c0_i32_2 = arith.constant 0 : i32
    return %c0_i32, %c0_i32_0, %c0_i32_1 : i32, i32, i32
  }
  func.func @transform_4(%arg0: i32, %arg1: i32) -> (i32, i32) {
    %c0_i32 = arith.constant 0 : i32
    %c0_i32_0 = arith.constant 0 : i32
    %c0_i32_1 = arith.constant 0 : i32
    return %c0_i32, %c0_i32_0 : i32, i32
  }
  func.func @transform_5(%arg0: i32, %arg1: i32) -> (i32, i32, i32, i32) {
    %c0_i32 = arith.constant 0 : i32
    %c0_i32_0 = arith.constant 0 : i32
    %c0_i32_1 = arith.constant 0 : i32
    return %arg0, %arg1, %c0_i32, %c0_i32_0 : i32, i32, i32, i32
  }
}

module attributes {stable_mosaic.version = 11 : i64} {
  func.func @_conv3x3_bn_hswish_kernel(%arg0: i32, %arg1: i32, %arg2: memref<1x8x18x4xbf16, #tpu.memory_space<vmem>>, %arg3: memref<1x1x18x4xbf16, #tpu.memory_space<vmem>>, %arg4: memref<1x1x18x4xbf16, #tpu.memory_space<vmem>>, %arg5: memref<9x4x2xbf16, #tpu.memory_space<vmem>>, %arg6: memref<1x2xf32, #tpu.memory_space<vmem>>, %arg7: memref<1x8x16x2xf32, #tpu.memory_space<vmem>>) attributes {dimension_semantics = [#tpu.dimension_semantics<parallel>, #tpu.dimension_semantics<parallel>], iteration_bounds = array<i64: 2, 2>, scalar_prefetch = 0 : i64, scratch_operands = 0 : i64, tpu.core_type = #tpu.core_type<tc>, window_params = [{transform_indices = @transform_0, window_bounds = array<i64: 1, 8, 18, 4>}, {transform_indices = @transform_1, window_bounds = array<i64: 1, 1, 18, 4>}, {transform_indices = @transform_2, window_bounds = array<i64: 1, 1, 18, 4>}, {pipeline_mode = #tpu.pipeline_mode<synchronous>, transform_indices = @transform_3, window_bounds = array<i64: 9, 4, 2>}, {pipeline_mode = #tpu.pipeline_mode<synchronous>, transform_indices = @transform_4, window_bounds = array<i64: 1, 2>}, {transform_indices = @transform_5, window_bounds = array<i64: 1, 8, 16, 2>}]} {
    %c0 = arith.constant 0 : index
    %c0_0 = arith.constant 0 : index
    %c0_1 = arith.constant 0 : index
    %c0_2 = arith.constant 0 : index
    %0 = vector.load %arg2[%c0, %c0_0, %c0_1, %c0_2] : memref<1x8x18x4xbf16, #tpu.memory_space<vmem>>, vector<1x8x18x4xbf16>
    %1 = vector.shape_cast %0 : vector<1x8x18x4xbf16> to vector<8x18x4xbf16>
    %c0_3 = arith.constant 0 : index
    %c0_4 = arith.constant 0 : index
    %c0_5 = arith.constant 0 : index
    %c0_6 = arith.constant 0 : index
    %2 = vector.load %arg3[%c0_3, %c0_4, %c0_5, %c0_6] : memref<1x1x18x4xbf16, #tpu.memory_space<vmem>>, vector<1x1x18x4xbf16>
    %3 = vector.shape_cast %2 : vector<1x1x18x4xbf16> to vector<1x18x4xbf16>
    %c0_7 = arith.constant 0 : index
    %c0_8 = arith.constant 0 : index
    %c0_9 = arith.constant 0 : index
    %c0_10 = arith.constant 0 : index
    %4 = vector.load %arg4[%c0_7, %c0_8, %c0_9, %c0_10] : memref<1x1x18x4xbf16, #tpu.memory_space<vmem>>, vector<1x1x18x4xbf16>
    %5 = vector.shape_cast %4 : vector<1x1x18x4xbf16> to vector<1x18x4xbf16>
    %6 = tpu.concatenate %1, %3, %5 in 0 : vector<8x18x4xbf16>, vector<1x18x4xbf16>, vector<1x18x4xbf16> -> vector<10x18x4xbf16>
    %cst = arith.constant 0.000000e+00 : f32
    %7 = vector.broadcast %cst : f32 to vector<128x2xf32>
    %8 = vector.extract_strided_slice %6 {offsets = [0, 0, 0], sizes = [8, 16, 4], strides = [1, 1, 1]} : vector<10x18x4xbf16> to vector<8x16x4xbf16>
    %9 = vector.shape_cast %8 : vector<8x16x4xbf16> to vector<128x4xbf16>
    %c0_11 = arith.constant 0 : index
    %c0_12 = arith.constant 0 : index
    %c0_13 = arith.constant 0 : index
    %10 = vector.load %arg5[%c0_11, %c0_12, %c0_13] : memref<9x4x2xbf16, #tpu.memory_space<vmem>>, vector<1x4x2xbf16>
    %11 = vector.shape_cast %10 : vector<1x4x2xbf16> to vector<4x2xbf16>
    %cst_14 = arith.constant dense<0.000000e+00> : vector<128x2xf32>
    %12 = tpu.matmul %9, %11, %cst_14 {dimension_numbers = #tpu.dot_dimension_numbers<[1], [0], [0], [1], [0, 0, 1, 1], [], []>} : vector<128x4xbf16>, vector<4x2xbf16>, vector<128x2xf32> -> vector<128x2xf32>
    %13 = arith.addf %7, %12 : vector<128x2xf32>
    %14 = vector.extract_strided_slice %6 {offsets = [0, 1, 0], sizes = [8, 16, 4], strides = [1, 1, 1]} : vector<10x18x4xbf16> to vector<8x16x4xbf16>
    %15 = vector.shape_cast %14 : vector<8x16x4xbf16> to vector<128x4xbf16>
    %c1 = arith.constant 1 : index
    %c0_15 = arith.constant 0 : index
    %c0_16 = arith.constant 0 : index
    %16 = vector.load %arg5[%c1, %c0_15, %c0_16] : memref<9x4x2xbf16, #tpu.memory_space<vmem>>, vector<1x4x2xbf16>
    %17 = vector.shape_cast %16 : vector<1x4x2xbf16> to vector<4x2xbf16>
    %cst_17 = arith.constant dense<0.000000e+00> : vector<128x2xf32>
    %18 = tpu.matmul %15, %17, %cst_17 {dimension_numbers = #tpu.dot_dimension_numbers<[1], [0], [0], [1], [0, 0, 1, 1], [], []>} : vector<128x4xbf16>, vector<4x2xbf16>, vector<128x2xf32> -> vector<128x2xf32>
    %19 = arith.addf %13, %18 : vector<128x2xf32>
    %20 = vector.extract_strided_slice %6 {offsets = [0, 2, 0], sizes = [8, 16, 4], strides = [1, 1, 1]} : vector<10x18x4xbf16> to vector<8x16x4xbf16>
    %21 = vector.shape_cast %20 : vector<8x16x4xbf16> to vector<128x4xbf16>
    %c2 = arith.constant 2 : index
    %c0_18 = arith.constant 0 : index
    %c0_19 = arith.constant 0 : index
    %22 = vector.load %arg5[%c2, %c0_18, %c0_19] : memref<9x4x2xbf16, #tpu.memory_space<vmem>>, vector<1x4x2xbf16>
    %23 = vector.shape_cast %22 : vector<1x4x2xbf16> to vector<4x2xbf16>
    %cst_20 = arith.constant dense<0.000000e+00> : vector<128x2xf32>
    %24 = tpu.matmul %21, %23, %cst_20 {dimension_numbers = #tpu.dot_dimension_numbers<[1], [0], [0], [1], [0, 0, 1, 1], [], []>} : vector<128x4xbf16>, vector<4x2xbf16>, vector<128x2xf32> -> vector<128x2xf32>
    %25 = arith.addf %19, %24 : vector<128x2xf32>
    %26 = vector.extract_strided_slice %6 {offsets = [1, 0, 0], sizes = [8, 16, 4], strides = [1, 1, 1]} : vector<10x18x4xbf16> to vector<8x16x4xbf16>
    %27 = vector.shape_cast %26 : vector<8x16x4xbf16> to vector<128x4xbf16>
    %c3 = arith.constant 3 : index
    %c0_21 = arith.constant 0 : index
    %c0_22 = arith.constant 0 : index
    %28 = vector.load %arg5[%c3, %c0_21, %c0_22] : memref<9x4x2xbf16, #tpu.memory_space<vmem>>, vector<1x4x2xbf16>
    %29 = vector.shape_cast %28 : vector<1x4x2xbf16> to vector<4x2xbf16>
    %cst_23 = arith.constant dense<0.000000e+00> : vector<128x2xf32>
    %30 = tpu.matmul %27, %29, %cst_23 {dimension_numbers = #tpu.dot_dimension_numbers<[1], [0], [0], [1], [0, 0, 1, 1], [], []>} : vector<128x4xbf16>, vector<4x2xbf16>, vector<128x2xf32> -> vector<128x2xf32>
    %31 = arith.addf %25, %30 : vector<128x2xf32>
    %32 = vector.extract_strided_slice %6 {offsets = [1, 1, 0], sizes = [8, 16, 4], strides = [1, 1, 1]} : vector<10x18x4xbf16> to vector<8x16x4xbf16>
    %33 = vector.shape_cast %32 : vector<8x16x4xbf16> to vector<128x4xbf16>
    %c4 = arith.constant 4 : index
    %c0_24 = arith.constant 0 : index
    %c0_25 = arith.constant 0 : index
    %34 = vector.load %arg5[%c4, %c0_24, %c0_25] : memref<9x4x2xbf16, #tpu.memory_space<vmem>>, vector<1x4x2xbf16>
    %35 = vector.shape_cast %34 : vector<1x4x2xbf16> to vector<4x2xbf16>
    %cst_26 = arith.constant dense<0.000000e+00> : vector<128x2xf32>
    %36 = tpu.matmul %33, %35, %cst_26 {dimension_numbers = #tpu.dot_dimension_numbers<[1], [0], [0], [1], [0, 0, 1, 1], [], []>} : vector<128x4xbf16>, vector<4x2xbf16>, vector<128x2xf32> -> vector<128x2xf32>
    %37 = arith.addf %31, %36 : vector<128x2xf32>
    %38 = vector.extract_strided_slice %6 {offsets = [1, 2, 0], sizes = [8, 16, 4], strides = [1, 1, 1]} : vector<10x18x4xbf16> to vector<8x16x4xbf16>
    %39 = vector.shape_cast %38 : vector<8x16x4xbf16> to vector<128x4xbf16>
    %c5 = arith.constant 5 : index
    %c0_27 = arith.constant 0 : index
    %c0_28 = arith.constant 0 : index
    %40 = vector.load %arg5[%c5, %c0_27, %c0_28] : memref<9x4x2xbf16, #tpu.memory_space<vmem>>, vector<1x4x2xbf16>
    %41 = vector.shape_cast %40 : vector<1x4x2xbf16> to vector<4x2xbf16>
    %cst_29 = arith.constant dense<0.000000e+00> : vector<128x2xf32>
    %42 = tpu.matmul %39, %41, %cst_29 {dimension_numbers = #tpu.dot_dimension_numbers<[1], [0], [0], [1], [0, 0, 1, 1], [], []>} : vector<128x4xbf16>, vector<4x2xbf16>, vector<128x2xf32> -> vector<128x2xf32>
    %43 = arith.addf %37, %42 : vector<128x2xf32>
    %44 = vector.extract_strided_slice %6 {offsets = [2, 0, 0], sizes = [8, 16, 4], strides = [1, 1, 1]} : vector<10x18x4xbf16> to vector<8x16x4xbf16>
    %45 = vector.shape_cast %44 : vector<8x16x4xbf16> to vector<128x4xbf16>
    %c6 = arith.constant 6 : index
    %c0_30 = arith.constant 0 : index
    %c0_31 = arith.constant 0 : index
    %46 = vector.load %arg5[%c6, %c0_30, %c0_31] : memref<9x4x2xbf16, #tpu.memory_space<vmem>>, vector<1x4x2xbf16>
    %47 = vector.shape_cast %46 : vector<1x4x2xbf16> to vector<4x2xbf16>
    %cst_32 = arith.constant dense<0.000000e+00> : vector<128x2xf32>
    %48 = tpu.matmul %45, %47, %cst_32 {dimension_numbers = #tpu.dot_dimension_numbers<[1], [0], [0], [1], [0, 0, 1, 1], [], []>} : vector<128x4xbf16>, vector<4x2xbf16>, vector<128x2xf32> -> vector<128x2xf32>
    %49 = arith.addf %43, %48 : vector<128x2xf32>
    %50 = vector.extract_strided_slice %6 {offsets = [2, 1, 0], sizes = [8, 16, 4], strides = [1, 1, 1]} : vector<10x18x4xbf16> to vector<8x16x4xbf16>
    %51 = vector.shape_cast %50 : vector<8x16x4xbf16> to vector<128x4xbf16>
    %c7 = arith.constant 7 : index
    %c0_33 = arith.constant 0 : index
    %c0_34 = arith.constant 0 : index
    %52 = vector.load %arg5[%c7, %c0_33, %c0_34] : memref<9x4x2xbf16, #tpu.memory_space<vmem>>, vector<1x4x2xbf16>
    %53 = vector.shape_cast %52 : vector<1x4x2xbf16> to vector<4x2xbf16>
    %cst_35 = arith.constant dense<0.000000e+00> : vector<128x2xf32>
    %54 = tpu.matmul %51, %53, %cst_35 {dimension_numbers = #tpu.dot_dimension_numbers<[1], [0], [0], [1], [0, 0, 1, 1], [], []>} : vector<128x4xbf16>, vector<4x2xbf16>, vector<128x2xf32> -> vector<128x2xf32>
    %55 = arith.addf %49, %54 : vector<128x2xf32>
    %56 = vector.extract_strided_slice %6 {offsets = [2, 2, 0], sizes = [8, 16, 4], strides = [1, 1, 1]} : vector<10x18x4xbf16> to vector<8x16x4xbf16>
    %57 = vector.shape_cast %56 : vector<8x16x4xbf16> to vector<128x4xbf16>
    %c8 = arith.constant 8 : index
    %c0_36 = arith.constant 0 : index
    %c0_37 = arith.constant 0 : index
    %58 = vector.load %arg5[%c8, %c0_36, %c0_37] : memref<9x4x2xbf16, #tpu.memory_space<vmem>>, vector<1x4x2xbf16>
    %59 = vector.shape_cast %58 : vector<1x4x2xbf16> to vector<4x2xbf16>
    %cst_38 = arith.constant dense<0.000000e+00> : vector<128x2xf32>
    %60 = tpu.matmul %57, %59, %cst_38 {dimension_numbers = #tpu.dot_dimension_numbers<[1], [0], [0], [1], [0, 0, 1, 1], [], []>} : vector<128x4xbf16>, vector<4x2xbf16>, vector<128x2xf32> -> vector<128x2xf32>
    %61 = arith.addf %55, %60 : vector<128x2xf32>
    %c0_39 = arith.constant 0 : index
    %c0_40 = arith.constant 0 : index
    %62 = vector.load %arg6[%c0_39, %c0_40] : memref<1x2xf32, #tpu.memory_space<vmem>>, vector<1x2xf32>
    %63 = vector.broadcast %62 : vector<1x2xf32> to vector<128x2xf32>
    %64 = arith.addf %61, %63 : vector<128x2xf32>
    %cst_41 = arith.constant 3.000000e+00 : f32
    %65 = vector.broadcast %cst_41 : f32 to vector<128x2xf32>
    %66 = arith.addf %64, %65 : vector<128x2xf32>
    %cst_42 = arith.constant 0.000000e+00 : f32
    %cst_43 = arith.constant 6.000000e+00 : f32
    %67 = vector.broadcast %cst_42 : f32 to vector<128x2xf32>
    %68 = arith.maximumf %67, %66 : vector<128x2xf32>
    %69 = vector.broadcast %cst_43 : f32 to vector<128x2xf32>
    %70 = arith.minimumf %69, %68 : vector<128x2xf32>
    %71 = arith.mulf %64, %70 : vector<128x2xf32>
    %cst_44 = arith.constant 0.166666672 : f32
    %72 = vector.broadcast %cst_44 : f32 to vector<128x2xf32>
    %73 = arith.mulf %71, %72 : vector<128x2xf32>
    %74 = vector.shape_cast %73 : vector<128x2xf32> to vector<1x8x16x2xf32>
    %c0_45 = arith.constant 0 : index
    %c0_46 = arith.constant 0 : index
    %c0_47 = arith.constant 0 : index
    %c0_48 = arith.constant 0 : index
    %75 = vector.load %arg7[%c0_45, %c0_46, %c0_47, %c0_48] : memref<1x8x16x2xf32, #tpu.memory_space<vmem>>, vector<1x8x16x2xf32>
    tpu.vector_store %arg7[%c0_45, %c0_46, %c0_47, %c0_48], %74 {strides = array<i32>} : memref<1x8x16x2xf32, #tpu.memory_space<vmem>>, vector<1x8x16x2xf32>,
    return
  }
  func.func @transform_0(%arg0: i32, %arg1: i32) -> (i32, i32, i32, i32) {
    %c0_i32 = arith.constant 0 : i32
    %c0_i32_0 = arith.constant 0 : i32
    %c0_i32_1 = arith.constant 0 : i32
    return %arg0, %arg1, %c0_i32, %c0_i32_0 : i32, i32, i32, i32
  }
  func.func @transform_1(%arg0: i32, %arg1: i32) -> (i32, i32, i32, i32) {
    %c1_i32 = arith.constant 1 : i32
    %0 = arith.addi %arg1, %c1_i32 : i32
    %c8_i32 = arith.constant 8 : i32
    %1 = arith.muli %0, %c8_i32 : i32
    %c0_i32 = arith.constant 0 : i32
    %c0_i32_0 = arith.constant 0 : i32
    %c0_i32_1 = arith.constant 0 : i32
    return %arg0, %1, %c0_i32, %c0_i32_0 : i32, i32, i32, i32
  }
  func.func @transform_2(%arg0: i32, %arg1: i32) -> (i32, i32, i32, i32) {
    %c1_i32 = arith.constant 1 : i32
    %0 = arith.addi %arg1, %c1_i32 : i32
    %c8_i32 = arith.constant 8 : i32
    %1 = arith.muli %0, %c8_i32 : i32
    %c1_i32_0 = arith.constant 1 : i32
    %2 = arith.addi %1, %c1_i32_0 : i32
    %c0_i32 = arith.constant 0 : i32
    %c0_i32_1 = arith.constant 0 : i32
    %c0_i32_2 = arith.constant 0 : i32
    return %arg0, %2, %c0_i32, %c0_i32_1 : i32, i32, i32, i32
  }
  func.func @transform_3(%arg0: i32, %arg1: i32) -> (i32, i32, i32) {
    %c0_i32 = arith.constant 0 : i32
    %c0_i32_0 = arith.constant 0 : i32
    %c0_i32_1 = arith.constant 0 : i32
    %c0_i32_2 = arith.constant 0 : i32
    return %c0_i32, %c0_i32_0, %c0_i32_1 : i32, i32, i32
  }
  func.func @transform_4(%arg0: i32, %arg1: i32) -> (i32, i32) {
    %c0_i32 = arith.constant 0 : i32
    %c0_i32_0 = arith.constant 0 : i32
    %c0_i32_1 = arith.constant 0 : i32
    return %c0_i32, %c0_i32_0 : i32, i32
  }
  func.func @transform_5(%arg0: i32, %arg1: i32) -> (i32, i32, i32, i32) {
    %c0_i32 = arith.constant 0 : i32
    %c0_i32_0 = arith.constant 0 : i32
    %c0_i32_1 = arith.constant 0 : i32
    return %arg0, %arg1, %c0_i32, %c0_i32_0 : i32, i32, i32, i32
  }
}

</mosaic_0001>

<bundles_post_ra>
// kernel: context_module.3
= control target key start
LH: loop header
LB: loop body
LE: loop exit
PB: predicated region body
PF: predicated region fallthrough
CT: control target
= control target key end

     0   :  { %s2875_s18 = smov 0   ;;  %s2877_s19 = smov 0   ;;  %s3756_s0 = inlined_call_operand.vmem [shape: bf16[2,18,18,4], index: 0, kind: input, shape index: {}, may-alias: {0,1,2}]   ;;  %s3757_s1 = inlined_call_operand.vmem [shape: bf16[2,18,18,4], index: 1, kind: input, shape index: {}, may-alias: {0,1,2}]   ;;  %s3758_s2 = inlined_call_operand.vmem [shape: bf16[2,18,18,4], index: 2, kind: input, shape index: {}, may-alias: {0,1,2}]   ;;  %s3759_s3 = inlined_call_operand.vmem [shape: bf16[9,4,4], index: 3, kind: input, shape index: {}]   ;;  %s3760_s4 = inlined_call_operand.vmem [shape: f32[1,4], index: 4, kind: input, shape index: {}]   ;;  %s3761_s5 = inlined_call_operand.vmem [shape: bf16[2,16,16,4], index: 5, kind: output, shape index: {}]  }
   0x1   :  { %s2879_s20 = smov 0   ;;  %s2881_s21 = smov 0  }
   0x2   :  { %s2883_s22 = smov 0  }
   0x3 LB: > { %s24_s23 = sadd.s32 1, %s2835_s20  ;;  %s27_s24 = sadd.s32 1, %s2839_s21  ;;  %s2843_s22 = sphi %s2883_s22, %s15_s22   ;;  %s2839_s21 = sphi %s2881_s21, %s3806_s21   ;;  %s2835_s20 = sphi %s2879_s20, %s3805_s20   ;;  %s2831_s19 = sphi %s2877_s19, %s3804_s19   ;;  %s2827_s18 = sphi %s2875_s18, %s3803_s18  }
   0x4   : > { %p25_p0 = scmp.ge.s32.totalorder %s24_s23, 2  ;;  %p2318_p1 = scmp.ge.s32.totalorder %s2843_s22, 1 }
   0x5   : > { %p271_p2 = scmp.lt.s32.totalorder %s2843_s22, 5 }
   0x6   : > { %s3808_s23 = smov (%p25_p0, %s24_s23), 0  ;;  %s3810_s24 = smov (!%p25_p0, %s27_s24), %s2839_s21 }
   0x7   : > { %p272_p3 = pnand %p2318_p1, %p271_p2  ;;  %p29_p4 = scmp.ge.s32.totalorder %s3810_s24, 2 }
   0x9   : > { %s3812_s24 = smov (%p29_p4, %s3810_s24), 0  ;;  %275 = sbr.rel (%p272_p3) target bundleno = 414 (0x19e), region = 40 }
   0xe   : > { %v2329_v0 = vld [vmem:[%s3759_s3 + $0x2] sm:$0x3]  ;;  %vm675_vm0 = vcmask 1041408   ;;  %s2908_s27 = sshll.u32 %s2827_s18, 3  ;;  %p343_p5 = scmp.lt.s32.totalorder %s2831_s19, 1  ;;  %vm650_vm3 = vcmask 31744  }
   0xf   : > { %2742 = vmatprep.subr.msk.bf16.mxu1 %vm675_vm0, %v2329_v0  ;;  %2741 = vmatprep.subr.msk.bf16.mxu0 %vm675_vm0, %v2329_v0  ;;  %v677_v1 = vsel %vm675_vm0, %v2329_v0, 0  ;;  %p345_p6 = scmp.lt.s32.totalorder %s2908_s27, 17  ;;  %v428_v2 = vld [vmem:[%s3759_s3] sm:$0x3]  ;;  %v2370_v3 = vld [vmem:[%s3759_s3 + $0x4] sm:$0x3] }
  0x10   : > { %2740 = vmatpush3.bf16.msra.mxu1 %v677_v1  ;;  %2578 = vmatpush3.bf16.msra.mxu0 %v677_v1  ;;  %s3814_s19 = smov (!%p343_p5, %s2831_s19), 1  ;;  %vm429_vm1 = vsmask.f32 3328  ;;  %vm430_vm2 = vsmask.f32 7440  ;;  %v2958_v15 = vsel %vm675_vm0, %v428_v2, 0 }
  0x11   : > { %s346_s7 = scalar_select %p345_p6, %s2908_s27, 17  ;;  %2743 = vmatprep.subr.msk.bf16.mxu1 %vm675_vm0, %v428_v2  ;;  %2744 = vmatprep.subr.msk.bf16.mxu0 %vm675_vm0, %v2370_v3  ;;  %vm2973_vm4 = vmor %vm429_vm1, %vm430_vm2  ;;  %v2978_v34 = vsel %vm675_vm0, %v2370_v3, 0  ;;  %vm948_vm5 = vcmask 1042432   ;;  %vm949_vm6 = vcmask 1046532   ;;  %vm2152_vm8 = vcmask 27648  }
  0x12   : > { %s2926_s8 = smul.u32 54, %s3814_s19  ;;  %s3065_s17 = sadd.s32 8, %s2908_s27  ;;  %vm3137_vm7 = vmor %vm948_vm5, %vm949_vm6 }
  0x13   : > { %s2751_s9 = smul.u32 3, %s346_s7  ;;  %p362_p7 = scmp.lt.s32.totalorder %s3065_s17, 17 }
  0x14   : > { %s373_s26 = sadd.s32 1, %s3065_s17  ;;  %p389_p9 = scmp.lt.s32.totalorder %s2908_s27, 15 }
  0x15   : > { %s349_s10 = sadd.s32 %s2926_s8, %s2751_s9  ;;  %p3130_p8 = scmp.lt.s32.totalorder %s373_s26, 17 }
  0x16   : > { %s2320_s11 = sshll.u32 %s349_s10, 2  ;;  %s3818_s27 = smov (!%p389_p9, %s2908_s27), 15 }
  0x17   : > { %s2932_s14 = scalar_lea.vmem %s3756_s0, %s2320_s11  ;;  %s3816_s26 = smov (!%p3130_p8, %s373_s26), 17 }
  0x18   : > { %v2935_v4 = vld [vmem:[%s2932_s14] sm:$0xf]  ;;  %v2938_v5 = vld [vmem:[%s2932_s14 + $0x4] sm:$0xf]  ;;  %v2941_v6 = vld [vmem:[%s2932_s14 + $0x8] sm:$0x1] }
  0x19   : > { %v433_v7 = vshrl.u32 %v2935_v4, 16  ;;  %v436_v8 = vshll.u32 %v2935_v4, 16  ;;  %v442_v9 = vshll.u32 %v2938_v5, 16  ;;  %v446_v10 = vshrl.u32 %v2938_v5, 16  ;;  %v2948_v11 = vld [vmem:[%s2932_s14 + $0x30] sm:$0xf] }
  0x1a   : > { %v452_v12 = vshll.u32 %v2941_v6, 16  ;;  %v2952_v13 = vld [vmem:[%s2932_s14 + $0x34] sm:$0xf]  ;;  %v2955_v14 = vld [vmem:[%s2932_s14 + $0x38] sm:$0x1]  ;;  %v529_v21 = vshrl.u32 %v2948_v11, 16 }
  0x1b   : > { %v435_v16 = vrot.slane %v433_v7, 4  ;;  %v438_v17 = vrot.slane %v436_v8, 5  ;;  %v444_v18 = vrot.slane %v442_v9, 5  ;;  %v448_v19 = vrot.slane %v446_v10, 4  ;;  %v2966_v28 = vld [vmem:[%s2932_s14 + $0xc] sm:$0xf] }
  0x1c   : > { %v454_v20 = vrot.slane %v452_v12, 5  ;;  %v532_v22 = vshll.u32 %v2948_v11, 16  ;;  %v538_v23 = vshll.u32 %v2952_v13, 16  ;;  %v542_v26 = vshrl.u32 %v2952_v13, 16  ;;  %v2969_v29 = vld [vmem:[%s2932_s14 + $0x10] sm:$0xf] }
  0x1d   : > { %v439_v24 = vor.u32 %v438_v17, %v435_v16  ;;  %v449_v25 = vor.u32 %v448_v19, %v444_v18  ;;  %v548_v27 = vshll.u32 %v2955_v14, 16  ;;  %v531_v31 = vrot.slane %v529_v21, 4  ;;  %v2981_v40 = vld [vmem:[%s2932_s14 + $0x14] sm:$0x1]  ;;  %v2992_v52 = vld [vmem:[%s2932_s14 + $0x3c] sm:$0xf] }
  0x1e   : > { %v534_v32 = vrot.slane %v532_v22, 5  ;;  %v540_v33 = vrot.slane %v538_v23, 5  ;;  %v544_v37 = vrot.slane %v542_v26, 4  ;;  %v457_v41 = vshrl.u32 %v2966_v28, 16  ;;  %v2996_v57 = vld [vmem:[%s2932_s14 + $0x40] sm:$0xf] }
  0x1f   : > { %v440_v35 = vrot.slane %v439_v24, 4  ;;  %v450_v36 = vrot.slane %v449_v25, 4  ;;  %v550_v38 = vrot.slane %v548_v27, 5  ;;  %v460_v42 = vshll.u32 %v2966_v28, 16  ;;  %v3004_v62 = vld [vmem:[%s2932_s14 + $0x44] sm:$0x1] }
  0x20   : > { %v535_v39 = vor.u32 %v534_v32, %v531_v31  ;;  %v466_v43 = vshll.u32 %v2969_v29, 16  ;;  %v545_v46 = vor.u32 %v544_v37, %v540_v33  ;;  %v470_v47 = vshrl.u32 %v2969_v29, 16  ;;  %v3010_v3 = vld [vmem:[%s2932_s14 + $0x18] sm:$0xf]  ;;  %v3019_v19 = vld [vmem:[%s2932_s14 + $0x1c] sm:$0xf] }
  0x21   : > { %v445_v44 = vsel %vm2973_vm4, %v440_v35, %v444_v18  ;;  %v455_v45 = vsel %vm2973_vm4, %v450_v36, %v454_v20  ;;  %v459_v50 = vrot.slane %v457_v41, 4  ;;  %v462_v51 = vrot.slane %v460_v42, 5  ;;  %v3026_v23 = vld [vmem:[%s2932_s14 + $0x20] sm:$0x1]  ;;  %v3033_v32 = vld [vmem:[%s2932_s14 + $0x48] sm:$0xf] }
  0x22   : > { %v2330_v48 = vcombine.low %v445_v44, %v455_v45  ;;  %v536_v49 = vrot.slane %v535_v39, 4  ;;  %v546_v53 = vrot.slane %v545_v46, 4  ;;  %v468_v54 = vrot.slane %v466_v43, 5  ;;  %v3046_v44 = vld [vmem:[%s2932_s14 + $0x4c] sm:$0xf]  ;;  %s3122_s28 = scalar_select %p362_p7, %s3065_s17, 17 }
  0x23   : > { %v472_v55 = vrot.slane %v470_v47, 4  ;;  %v476_v56 = vshll.u32 %v2981_v40, 16  ;;  %v956_v58 = vrot.slane %v2941_v6, 5  ;;  %v463_v60 = vor.u32 %v462_v51, %v459_v50  ;;  %s2754_s7 = smul.u32 3, %s3816_s26  ;;  %s2326_s10 = sshll.u32 %s3818_s27, 1 }
  0x24   : > { %2579 = vmatprep.mubr.msk.bf16.mxu0 %vm650_vm3, %v2330_v48  ;;  %v541_v59 = vsel %vm2973_vm4, %v536_v49, %v540_v33  ;;  %v960_v61 = vrot.slane %v2969_v29, 5  ;;  %v551_v63 = vsel %vm2973_vm4, %v546_v53, %v550_v38  ;;  %v553_v2 = vshrl.u32 %v2992_v52, 16  ;;  %v3041_v38 = vld [vmem:[%s3759_s3 + $0x8] sm:$0x3]  ;;  %s2753_s30 = smul.u32 3, %s3122_s28  ;;  %s2327_s11 = sshll.u32 %s3814_s19, 5 }
  0x25   : > { %v473_v0 = vor.u32 %v472_v55, %v468_v54  ;;  %v478_v1 = vrot.slane %v476_v56, 5  ;;  %v3012_v7 = vcombine.low %v541_v59, %v551_v63  ;;  %v464_v8 = vrot.slane %v463_v60, 4  ;;  %v3060_v63 = vld [vmem:[%s2932_s14 + $0x24] sm:$0xf]  ;;  %s3215_s13 = sadd.s32 %s2754_s7, %s2926_s8  ;;  %s3671_s19 = sadd.s32 %s2327_s11, %s2326_s10 }
  0x26   : > { %v556_v9 = vshll.u32 %v2992_v52, 16  ;;  %v562_v10 = vshll.u32 %v2996_v57, 16  ;;  %v555_v16 = vrot.slane %v553_v2, 4  ;;  %v566_v17 = vshrl.u32 %v2996_v57, 16  ;;  %s366_s6 = sadd.s32 %s2753_s30, %s2926_s8  ;;  %s2324_s8 = sshll.u32 %s3215_s13, 2 }
  0x27   : > { %v474_v12 = vrot.slane %v473_v0, 4  ;;  %v572_v18 = vshll.u32 %v3004_v62, 16  ;;  %2587 = vmatprep.mubr.msk.bf16.mxu1 %vm650_vm3, %v3012_v7  ;;  %v469_v20 = vsel %vm2973_vm4, %v464_v8, %v468_v54  ;;  %v481_v24 = vshrl.u32 %v3010_v3, 16  ;;  %v3054_v54 = vld [vmem:[%s2932_s14 + $0x50] sm:$0x1]  ;;  %s2322_s9 = sshll.u32 %s366_s6, 2  ;;  %s382_s26 = scalar_lea.vmem %s3758_s2, %s2324_s8 }
  0x28   : > { %v558_v21 = vrot.slane %v556_v9, 5  ;;  %v564_v22 = vrot.slane %v562_v10, 5  ;;  %v568_v26 = vrot.slane %v566_v17, 4  ;;  %v484_v31 = vshll.u32 %v3010_v3, 16  ;;  %v3071_v8 = vld [vmem:[%s2932_s14 + $0x28] sm:$0xf]  ;;  %s368_s12 = scalar_lea.vmem %s3757_s1, %s2322_s9 }
  0x29   : > { %v479_v25 = vsel %vm2973_vm4, %v474_v12, %v478_v1  ;;  %v574_v27 = vrot.slane %v572_v18, 5  ;;  %v483_v36 = vrot.slane %v481_v24, 4  ;;  %v490_v37 = vshll.u32 %v3019_v19, 16  ;;  %v3079_v17 = vld [vmem:[%s3759_s3 + $0x6] sm:$0x3]  ;;  %s2328_s27 = sshll.u32 %s3671_s19, 2 }
  0x2a   : > { %v3035_v33 = vcombine.low %v469_v20, %v479_v25  ;;  %v559_v35 = vor.u32 %v558_v21, %v555_v16  ;;  %v569_v39 = vor.u32 %v568_v26, %v564_v22  ;;  %v486_v41 = vrot.slane %v484_v31, 5 }
  0x2b   : > { %v494_v42 = vshrl.u32 %v3019_v19, 16  ;;  %v500_v43 = vshll.u32 %v3026_v23, 16  ;;  %v492_v46 = vrot.slane %v490_v37, 5  ;;  %v577_v47 = vshrl.u32 %v3033_v32, 16 }
  0x2c   : > { %2580 = vmatmul.mubr.msk.bf16.vlgmr.msra.gmra.mxu0 %vm650_vm3, %v3035_v33  ;;  %v560_v45 = vrot.slane %v559_v35, 4  ;;  %v580_v48 = vshll.u32 %v3033_v32, 16  ;;  %v570_v49 = vrot.slane %v569_v39, 4  ;;  %v487_v50 = vor.u32 %v486_v41, %v483_v36  ;;  %v3093_v35 = vld [vmem:[%s2932_s14 + $0x54] sm:$0xf] }
  0x2d   : > { %2614 = vmatpush3.bf16.msra.mxu0 %v2978_v34  ;;  %v496_v51 = vrot.slane %v494_v42, 4  ;;  %v502_v53 = vrot.slane %v500_v43, 5  ;;  %v579_v56 = vrot.slane %v577_v47, 4  ;;  %v586_v60 = vshll.u32 %v3046_v44, 16  ;;  %v3100_v42 = vld [vmem:[%s2932_s14 + $0x58] sm:$0xf] }
  0x2e   : > { %v565_v55 = vsel %vm2973_vm4, %v560_v45, %v564_v22  ;;  %v582_v59 = vrot.slane %v580_v48, 5  ;;  %2746 = vmatprep.subr.msk.bf16.mxu0 %vm675_vm0, %v3041_v38  ;;  %v575_v34 = vsel %vm2973_vm4, %v570_v49, %v574_v27  ;;  %v488_v0 = vrot.slane %v487_v50, 4  ;;  %v3084_v22 = vld [vmem:[%s2932_s14 + $0x2c] sm:$0x1] }
  0x2f   : > { %v497_v1 = vor.u32 %v496_v51, %v492_v46  ;;  %v590_v2 = vshrl.u32 %v3046_v44, 16  ;;  %v3073_v9 = vcombine.low %v565_v55, %v575_v34  ;;  %v588_v12 = vrot.slane %v586_v60, 5 }
  0x30   : > { %v583_v10 = vor.u32 %v582_v59, %v579_v56  ;;  %v596_v16 = vshll.u32 %v3054_v54, 16  ;;  %v493_v18 = vsel %vm2973_vm4, %v488_v0, %v492_v46  ;;  %v505_v24 = vshrl.u32 %v3060_v63, 16 }
  0x31   : > { %v498_v20 = vrot.slane %v497_v1, 4  ;;  %v592_v21 = vrot.slane %v590_v2, 4  ;;  %2588 = vmatmul.mubr.msk.bf16.vlgmr.msra.gmra.mxu1 %vm650_vm3, %v3073_v9  ;;  %v508_v27 = vshll.u32 %v3060_v63, 16  ;;  %v514_v31 = vshll.u32 %v3071_v8, 16 }
  0x32   : > { %v584_v25 = vrot.slane %v583_v10, 4  ;;  %v598_v26 = vrot.slane %v596_v16, 5  ;;  %2596 = vmatpush3.bf16.msra.mxu1 %v2958_v15  ;;  %v507_v39 = vrot.slane %v505_v24, 4  ;;  %v518_v41 = vshrl.u32 %v3071_v8, 16  ;;  %v2439_v24 = vld [vmem:[%s3759_s3 + $0x10] sm:$0x3] }
  0x33   : > { %v503_v36 = vsel %vm2973_vm4, %v498_v20, %v502_v53  ;;  %v593_v37 = vor.u32 %v592_v21, %v588_v12  ;;  %v510_v46 = vrot.slane %v508_v27, 5  ;;  %v516_v47 = vrot.slane %v514_v31, 5  ;;  %2745 = vmatprep.subr.msk.bf16.mxu1 %vm675_vm0, %v3079_v17  ;;  %v3114_v53 = vld [vmem:[%s2932_s14 + $0x5c] sm:$0x1]  ;;  %s3688_s14 = scalar_lea.vmem %s3761_s5, %s2328_s27 }
  0x34   : > { %v3102_v43 = vcombine.low %v493_v18, %v503_v36  ;;  %v589_v45 = vsel %vm2973_vm4, %v584_v25, %v588_v12  ;;  %v520_v48 = vrot.slane %v518_v41, 4  ;;  %v524_v49 = vshll.u32 %v3084_v22, 16 }
  0x35   : > { %v594_v15 = vrot.slane %v593_v37, 4  ;;  %v601_v50 = vshrl.u32 %v3093_v35, 16  ;;  %v511_v51 = vor.u32 %v510_v46, %v507_v39  ;;  %v604_v55 = vshll.u32 %v3093_v35, 16 }
  0x36   : > { %2583 = vmatprep.mubr.msk.bf16.mxu0 %vm650_vm3, %v3102_v43  ;;  %v610_v56 = vshll.u32 %v3100_v42, 16  ;;  %v614_v59 = vshrl.u32 %v3100_v42, 16  ;;  %v521_v34 = vor.u32 %v520_v48, %v516_v47  ;;  %v526_v0 = vrot.slane %v524_v49, 5 }
  0x37   : > { %v599_v60 = vsel %vm2973_vm4, %v594_v15, %v598_v26  ;;  %v603_v1 = vrot.slane %v601_v50, 4  ;;  %v512_v10 = vrot.slane %v511_v51, 4  ;;  %v606_v12 = vrot.slane %v604_v55, 5 }
  0x38   : > { %v3126_v2 = vcombine.low %v589_v45, %v599_v60  ;;  %v612_v16 = vrot.slane %v610_v56, 5  ;;  %v522_v18 = vrot.slane %v521_v34, 4  ;;  %v616_v20 = vrot.slane %v614_v59, 4 }
  0x39   : > { %v620_v21 = vshll.u32 %v3114_v53, 16  ;;  %v2362_v25 = vrot.slane %v2935_v4, 9  ;;  %v963_v26 = vrot.slane %v2981_v40, 5  ;;  %v517_v27 = vsel %vm2973_vm4, %v512_v10, %v516_v47 }
  0x3a   : > { %2591 = vmatprep.mubr.msk.bf16.mxu1 %vm650_vm3, %v3126_v2  ;;  %v607_v31 = vor.u32 %v606_v12, %v603_v1  ;;  %v953_v36 = vrot.slane %v2938_v5, 5  ;;  %v527_v37 = vsel %vm2973_vm4, %v522_v18, %v526_v0  ;;  %v617_v39 = vor.u32 %v616_v20, %v612_v16 }
  0x3b   : > { %v622_v41 = vrot.slane %v620_v21, 5  ;;  %v2363_v45 = vrot.slane %v2966_v28, 9  ;;  %v3152_v46 = vcombine.low %v517_v27, %v527_v37  ;;  %v2346_v49 = vcombine.low %v2935_v4, %v2938_v5 }
  0x3c   : > { %v608_v40 = vrot.slane %v607_v31, 4  ;;  %v954_v15 = vsel %vm3137_vm7, %v2362_v25, %v953_v36  ;;  %v955_v48 = vrot.slane %v953_v36, 4  ;;  %v618_v47 = vrot.slane %v617_v39, 4 }
  0x3d   : > { %v961_v50 = vsel %vm3137_vm7, %v2363_v45, %v960_v61  ;;  %v962_v51 = vrot.slane %v960_v61, 4  ;;  %2584 = vmatmul.mubr.msk.bf16.gmra.mxu0 %vm650_vm3, %v3152_v46  ;;  %v2364_v5 = vrot.slane %v3010_v3, 9  ;;  %v967_v56 = vrot.slane %v3019_v19, 5 }
  0x3e   : > { %v613_v55 = vsel %vm2973_vm4, %v608_v40, %v612_v16  ;;  %v957_v4 = vsel %vm3137_vm7, %v955_v48, %v956_v58  ;;  %v623_v59 = vsel %vm2973_vm4, %v618_v47, %v622_v41  ;;  %v970_v34 = vrot.slane %v3026_v23, 5  ;;  %v3229_v41 = vld [vmem:[%s3759_s3 + $0xc] sm:$0x3] }
  0x3f   : > { %v2371_v61 = vcombine.low %v954_v15, %v957_v4  ;;  %v964_v60 = vsel %vm3137_vm7, %v962_v51, %v963_v26  ;;  %v3186_v0 = vcombine.low %v613_v55, %v623_v59  ;;  %v968_v6 = vsel %vm3137_vm7, %v2364_v5, %v967_v56  ;;  %v424_v51 = vld [vmem:[%s368_s12 + $0x8] sm:$0x1] }
  0x40   : > { %v969_v58 = vrot.slane %v967_v56, 4  ;;  %v984_v1 = vrot.slane %v2955_v14, 5  ;;  %v2365_v10 = vrot.slane %v3060_v63, 9  ;;  %v974_v12 = vrot.slane %v3071_v8, 5 }
  0x41   : > { %2615 = vmatprep.mubr.msk.bf16.mxu0 %vm650_vm3, %v2371_v61  ;;  %v977_v16 = vrot.slane %v3084_v22, 5  ;;  %2592 = vmatmul.mubr.msk.bf16.gmra.mxu1 %vm650_vm3, %v3186_v0  ;;  %v3198_v23 = vcombine.low %v961_v50, %v964_v60  ;;  %v2366_v14 = vrot.slane %v2948_v11, 9  ;;  %v981_v20 = vrot.slane %v2952_v13, 5 }
  0x42   : > { %v971_v18 = vsel %vm3137_vm7, %v969_v58, %v970_v34  ;;  %2597 = vmatprep.mubr.msk.bf16.mxu1 %vm650_vm3, %v2346_v49  ;;  %v976_v25 = vrot.slane %v974_v12, 4  ;;  %v1332_v22 = vsel %vm675_vm0, %v3041_v38, 0  ;;  %v2367_v27 = vrot.slane %v2992_v52, 9  ;;  %v3248_v49 = vld [vmem:[%s368_s12] sm:$0xf] }
  0x43   : > { %v3205_v21 = vcombine.low %v968_v6, %v971_v18  ;;  %v983_v26 = vrot.slane %v981_v20, 4  ;;  %v988_v31 = vrot.slane %v2996_v57, 5  ;;  %v3219_v36 = vcombine.low %v2966_v28, %v2969_v29 }
  0x44   : > { %v975_v37 = vsel %vm3137_vm7, %v2365_v10, %v974_v12  ;;  %v978_v38 = vsel %vm3137_vm7, %v976_v25, %v977_v16  ;;  %v991_v39 = vrot.slane %v3004_v62, 5  ;;  %v982_v28 = vsel %vm3137_vm7, %v2366_v14, %v981_v20  ;;  %v3302_v25 = vld [vmem:[%s382_s26] sm:$0xf] }
  0x45   : > { %2616 = vmatmul.mubr.msk.bf16.vlgmr.msra.gmra.mxu0 %vm650_vm3, %v3198_v23  ;;  %v985_v29 = vsel %vm3137_vm7, %v983_v26, %v984_v1  ;;  %v990_v45 = vrot.slane %v988_v31, 4  ;;  %v2368_v40 = vrot.slane %v3033_v32, 9  ;;  %v1184_v62 = vsel %vm675_vm0, %v3079_v17, 0 }
  0x46   : > { %2650 = vmatpush3.bf16.msra.mxu0 %v1332_v22  ;;  %v3242_v15 = vcombine.low %v3010_v3, %v3019_v19  ;;  %2619 = vmatprep.mubr.msk.bf16.mxu0 %vm650_vm3, %v3205_v21  ;;  %v995_v48 = vrot.slane %v3046_v44, 5  ;;  %v998_v47 = vrot.slane %v3054_v54, 5  ;;  %v3253_v50 = vcombine.low %v3060_v63, %v3071_v8  ;;  %v3265_v54 = vld [vmem:[%s368_s12 + $0x4] sm:$0xf] }
  0x47   : > { %v3255_v17 = vcombine.low %v975_v37, %v978_v38  ;;  %v3259_v3 = vcombine.low %v2948_v11, %v2952_v13  ;;  %v989_v19 = vsel %vm3137_vm7, %v2367_v27, %v988_v31  ;;  %2748 = vmatprep.subr.msk.bf16.mxu0 %vm675_vm0, %v3229_v41  ;;  %v3267_v55 = vcombine.low %v982_v28, %v985_v29  ;;  %v3275_v11 = vld [vmem:[%s3759_s3 + $0xa] sm:$0x3]  ;;  %v3308_v31 = vld [vmem:[%s382_s26 + $0x4] sm:$0xf]  ;;  %v427_v29 = vld [vmem:[%s382_s26 + $0x8] sm:$0x1] }
  0x48   : > { %v992_v63 = vsel %vm3137_vm7, %v990_v45, %v991_v39  ;;  %v997_v8 = vrot.slane %v995_v48, 4  ;;  %v1002_v4 = vrot.slane %v3100_v42, 5  ;;  %v996_v13 = vsel %vm3137_vm7, %v2368_v40, %v995_v48 }
  0x49   : > { %2598 = vmatmul.mubr.msk.bf16.vlgmr.msra.gmra.mxu1 %vm650_vm3, %v3219_v36  ;;  %v2369_v5 = vrot.slane %v3093_v35, 9  ;;  %v1300_v56 = vshrl.u32 %v3248_v49, 16  ;;  %v1303_v59 = vshll.u32 %v3248_v49, 16  ;;  %v1313_v60 = vshrl.u32 %v3265_v54, 16 }
  0x4a   : > { %2632 = vmatpush3.bf16.msra.mxu1 %v1184_v62  ;;  %2601 = vmatprep.mubr.msk.bf16.mxu1 %vm650_vm3, %v3242_v15  ;;  %v999_v61 = vsel %vm3137_vm7, %v997_v8, %v998_v47  ;;  %v1309_v34 = vshll.u32 %v3265_v54, 16  ;;  %v1319_v6 = vshll.u32 %v424_v51, 16  ;;  %v3293_v58 = vcombine.low %v989_v19, %v992_v63 }
  0x4b   : > { %v1005_v1 = vrot.slane %v3114_v53, 5  ;;  %2747 = vmatprep.subr.msk.bf16.mxu1 %vm675_vm0, %v3275_v11  ;;  %v1302_v10 = vrot.slane %v1300_v56, 4  ;;  %v1305_v12 = vrot.slane %v1303_v59, 5  ;;  %v3298_v16 = vcombine.low %v996_v13, %v999_v61 }
  0x4c   : > { %v1004_v18 = vrot.slane %v1002_v4, 4  ;;  %v1311_v14 = vrot.slane %v1309_v34, 5  ;;  %v1315_v20 = vrot.slane %v1313_v60, 4  ;;  %v2407_v53 = vrot.slane %v3248_v49, 9 }
  0x4d   : > { %2620 = vmatmul.mubr.msk.bf16.gmra.mxu0 %vm650_vm3, %v3255_v17  ;;  %v1306_v22 = vor.u32 %v1305_v12, %v1302_v10  ;;  %v1450_v26 = vrot.slane %v3265_v54, 5  ;;  %v1453_v27 = vrot.slane %v424_v51, 5  ;;  %v1321_v38 = vrot.slane %v1319_v6, 5 }
  0x4e   : > { %2623 = vmatprep.mubr.msk.bf16.mxu0 %vm650_vm3, %v3267_v55  ;;  %v1316_v37 = vor.u32 %v1315_v20, %v1311_v14  ;;  %v1706_v39 = vshrl.u32 %v3302_v25, 16  ;;  %v1709_v28 = vshll.u32 %v3302_v25, 16  ;;  %v1719_v48 = vshrl.u32 %v3308_v31, 16 }
  0x4f   : > { %v1307_v45 = vrot.slane %v1306_v22, 4  ;;  %v1451_v40 = vsel %vm3137_vm7, %v2407_v53, %v1450_v26  ;;  %v1452_v62 = vrot.slane %v1450_v26, 4  ;;  %v1715_v63 = vshll.u32 %v3308_v31, 16 }
  0x50   : > { %v1317_v47 = vrot.slane %v1316_v37, 4  ;;  %v1708_v19 = vrot.slane %v1706_v39, 4  ;;  %v1711_v51 = vrot.slane %v1709_v28, 5  ;;  %v1721_v56 = vrot.slane %v1719_v48, 4 }
  0x51   : > { %2602 = vmatmul.mubr.msk.bf16.gmra.mxu1 %vm650_vm3, %v3253_v50  ;;  %v1312_v8 = vsel %vm2973_vm4, %v1307_v45, %v1311_v14  ;;  %v1454_v13 = vsel %vm3137_vm7, %v1452_v62, %v1453_v27  ;;  %v1725_v59 = vshll.u32 %v427_v29, 16  ;;  %v1717_v6 = vrot.slane %v1715_v63, 5 }
  0x52   : > { %2605 = vmatprep.mubr.msk.bf16.mxu1 %vm650_vm3, %v3259_v3  ;;  %v1322_v61 = vsel %vm2973_vm4, %v1317_v47, %v1321_v38  ;;  %v3328_v60 = vcombine.low %v1451_v40, %v1454_v13  ;;  %v1712_v34 = vor.u32 %v1711_v51, %v1708_v19  ;;  %v2438_v12 = vrot.slane %v3302_v25, 9 }
  0x53   : > { %v3330_v10 = vcombine.low %v1312_v8, %v1322_v61  ;;  %v1856_v14 = vrot.slane %v3308_v31, 5  ;;  %v1722_v22 = vor.u32 %v1721_v56, %v1717_v6  ;;  %v1727_v53 = vrot.slane %v1725_v59, 5 }
  0x54   : > { %v1713_v20 = vrot.slane %v1712_v34, 4  ;;  %v1859_v26 = vrot.slane %v427_v29, 5  ;;  %v2351_v27 = vcombine.low %v2992_v52, %v2996_v57  ;;  %v2352_v37 = vcombine.low %v3033_v32, %v3046_v44 }
  0x55   : > { %2624 = vmatmul.mubr.msk.bf16.gmra.mxu0 %vm650_vm3, %v3293_v58  ;;  %v3342_v38 = vsel %vm3137_vm7, %v2438_v12, %v1856_v14  ;;  %v1858_v39 = vrot.slane %v1856_v14, 4  ;;  %v1003_v52 = vsel %vm3137_vm7, %v2369_v5, %v1002_v4  ;;  %v1006_v57 = vsel %vm3137_vm7, %v1004_v18, %v1005_v1 }
  0x56   : > { %2627 = vmatprep.mubr.msk.bf16.mxu0 %vm650_vm3, %v3298_v16  ;;  %v1718_v32 = vsel %vm2973_vm4, %v1713_v20, %v1717_v6  ;;  %v1723_v44 = vrot.slane %v1722_v22, 4  ;;  %v2378_v4 = vcombine.low %v1003_v52, %v1006_v57  ;;  %v2353_v1 = vcombine.low %v3093_v35, %v3100_v42  ;;  %v2428_v35 = vld [vmem:[%s3759_s3 + $0xe] sm:$0x3] }
  0x57   : > { %v3358_v28 = vsel %vm3137_vm7, %v1858_v39, %v1859_v26  ;;  %v1590_v30 = vsel %vm675_vm0, %v3229_v41, 0  ;;  %v2388_v42 = vcombine.low %v3248_v49, %v3265_v54  ;;  %v1738_v41 = vsel %vm675_vm0, %v2428_v35, 0 }
  0x58   : > { %v1728_v29 = vsel %vm2973_vm4, %v1723_v44, %v1727_v53  ;;  %v2440_v45 = vcombine.low %v3342_v38, %v3358_v28 }
  0x59   : > { %2606 = vmatmul.mubr.msk.bf16.gmra.mxu1 %vm650_vm3, %v2351_v27  ;;  %v3365_v5 = vcombine.low %v1718_v32, %v1728_v29 }
  0x5a   : > { %2609 = vmatprep.mubr.msk.bf16.mxu1 %vm650_vm3, %v2352_v37 }
  0x5d   : > { %2628 = vmatmul.mubr.msk.bf16.gmra.mxu0 %vm650_vm3, %v2378_v4 }
  0x5e   : > { %2651 = vmatprep.mubr.msk.bf16.mxu0 %vm650_vm3, %v3035_v33  ;;  %v1464_v33 = vsel %vm675_vm0, %v3275_v11, 0 }
  0x61   : > { %2610 = vmatmul.mubr.msk.bf16.gmra.mxu1 %vm650_vm3, %v2353_v1 }
  0x62   : > { %2633 = vmatprep.mubr.msk.bf16.mxu1 %vm650_vm3, %v3219_v36  ;;  %v1870_v36 = vsel %vm675_vm0, %v2439_v24, 0 }
  0x65   : > { %2652 = vmatmul.mubr.msk.bf16.vlgmr.msra.gmra.mxu0 %vm650_vm3, %v3102_v43 }
  0x66   : > { %2686 = vmatpush3.bf16.msra.mxu0 %v1590_v30  ;;  %2655 = vmatprep.mubr.msk.bf16.mxu0 %vm650_vm3, %v3152_v46 }
  0x67   : > { %2750 = vmatprep.subr.msk.bf16.mxu0 %vm675_vm0, %v2439_v24 }
  0x69   : > { %2634 = vmatmul.mubr.msk.bf16.vlgmr.msra.gmra.mxu1 %vm650_vm3, %v3242_v15 }
  0x6a   : > { %2668 = vmatpush3.bf16.msra.mxu1 %v1464_v33  ;;  %2637 = vmatprep.mubr.msk.bf16.mxu1 %vm650_vm3, %v3253_v50 }
  0x6b   : > { %2749 = vmatprep.subr.msk.bf16.mxu1 %vm675_vm0, %v2428_v35 }
  0x6d   : > { %2656 = vmatmul.mubr.msk.bf16.gmra.mxu0 %vm650_vm3, %v3012_v7 }
  0x6e   : > { %2659 = vmatprep.mubr.msk.bf16.mxu0 %vm650_vm3, %v3073_v9 }
  0x71   : > { %2638 = vmatmul.mubr.msk.bf16.gmra.mxu1 %vm650_vm3, %v3259_v3 }
  0x72   : > { %2641 = vmatprep.mubr.msk.bf16.mxu1 %vm650_vm3, %v2351_v27 }
  0x75   : > { %2660 = vmatmul.mubr.msk.bf16.gmra.mxu0 %vm650_vm3, %v3126_v2 }
  0x76   : > { %2663 = vmatprep.mubr.msk.bf16.mxu0 %vm650_vm3, %v3186_v0 }
  0x79   : > { %2642 = vmatmul.mubr.msk.bf16.gmra.mxu1 %vm650_vm3, %v2352_v37 }
  0x7a   : > { %2645 = vmatprep.mubr.msk.bf16.mxu1 %vm650_vm3, %v2353_v1 }
  0x7d   : > { %2664 = vmatmul.mubr.msk.bf16.gmra.mxu0 %vm650_vm3, %v3330_v10 }
  0x7e   : > { %2687 = vmatprep.mubr.msk.bf16.mxu0 %vm650_vm3, %v3242_v15 }
  0x81   : > { %2646 = vmatmul.mubr.msk.bf16.gmra.mxu1 %vm650_vm3, %v2388_v42 }
  0x82   : > { %2669 = vmatprep.mubr.msk.bf16.mxu1 %vm650_vm3, %v3198_v23  ;;  %v2419_v23 = vcombine.low %v3302_v25, %v3308_v31 }
  0x85   : > { %2688 = vmatmul.mubr.msk.bf16.vlgmr.msra.gmra.mxu0 %vm650_vm3, %v3253_v50 }
  0x86   : > { %2722 = vmatpush3.bf16.msra.mxu0 %v1870_v36  ;;  %2691 = vmatprep.mubr.msk.bf16.mxu0 %vm650_vm3, %v3259_v3 }
  0x89   : > { %2670 = vmatmul.mubr.msk.bf16.vlgmr.msra.gmra.mxu1 %vm650_vm3, %v3205_v21 }
  0x8a   : > { %2704 = vmatpush3.bf16.msra.mxu1 %v1738_v41  ;;  %2673 = vmatprep.mubr.msk.bf16.mxu1 %vm650_vm3, %v3255_v17 }
  0x8d   : > { %2692 = vmatmul.mubr.msk.bf16.gmra.mxu0 %vm650_vm3, %v2351_v27 }
  0x8e   : > { %2695 = vmatprep.mubr.msk.bf16.mxu0 %vm650_vm3, %v2352_v37 }
  0x91   : > { %2674 = vmatmul.mubr.msk.bf16.gmra.mxu1 %vm650_vm3, %v3267_v55 }
  0x92   : > { %2677 = vmatprep.mubr.msk.bf16.mxu1 %vm650_vm3, %v3293_v58 }
  0x95   : > { %2696 = vmatmul.mubr.msk.bf16.gmra.mxu0 %vm650_vm3, %v2353_v1 }
  0x96   : > { %2699 = vmatprep.mubr.msk.bf16.mxu0 %vm650_vm3, %v2388_v42 }
  0x99   : > { %2678 = vmatmul.mubr.msk.bf16.gmra.mxu1 %vm650_vm3, %v3298_v16 }
  0x9a   : > { %2681 = vmatprep.mubr.msk.bf16.mxu1 %vm650_vm3, %v2378_v4 }
  0x9d   : > { %2700 = vmatmul.mubr.msk.bf16.gmra.mxu0 %vm650_vm3, %v2419_v23 }
  0x9e   : > { %2723 = vmatprep.mubr.msk.bf16.mxu0 %vm650_vm3, %v3205_v21 }
  0xa1   : > { %2682 = vmatmul.mubr.msk.bf16.gmra.mxu1 %vm650_vm3, %v3328_v60 }
  0xa2   : > { %2705 = vmatprep.mubr.msk.bf16.mxu1 %vm650_vm3, %v3102_v43 }
  0xa5   : > { %2724 = vmatmul.mubr.msk.bf16.vlgmr.msra.gmra.mxu0 %vm650_vm3, %v3255_v17 }
  0xa6   : > { %2727 = vmatprep.mubr.msk.bf16.mxu0 %vm650_vm3, %v3267_v55 }
  0xa9   : > { %2706 = vmatmul.mubr.msk.bf16.vlgmr.msra.gmra.mxu1 %vm650_vm3, %v3152_v46 }
  0xaa   : > { %2709 = vmatprep.mubr.msk.bf16.mxu1 %vm650_vm3, %v3012_v7 }
  0xad   : > { %2728 = vmatmul.mubr.msk.bf16.gmra.mxu0 %vm650_vm3, %v3293_v58 }
  0xae   : > { %2731 = vmatprep.mubr.msk.bf16.mxu0 %vm650_vm3, %v3298_v16 }
  0xb1   : > { %2710 = vmatmul.mubr.msk.bf16.gmra.mxu1 %vm650_vm3, %v3073_v9 }
  0xb2   : > { %2713 = vmatprep.mubr.msk.bf16.mxu1 %vm650_vm3, %v3126_v2 }
  0xb5   : > { %2732 = vmatmul.mubr.msk.bf16.gmra.mxu0 %vm650_vm3, %v2378_v4 }
  0xb6   : > { %2735 = vmatprep.mubr.msk.bf16.mxu0 %vm650_vm3, %v3328_v60 }
  0xb9   : > { %2714 = vmatmul.mubr.msk.bf16.gmra.mxu1 %vm650_vm3, %v3186_v0 }
  0xba   : > { %2717 = vmatprep.mubr.msk.bf16.mxu1 %vm650_vm3, %v3330_v10 }
  0xbd   : > { %2736 = vmatmul.mubr.msk.bf16.gmra.mxu0 %vm650_vm3, %v2440_v45 }
  0xc1   : > { %2718 = vmatmul.mubr.msk.bf16.gmra.mxu1 %vm650_vm3, %v3365_v5 }
  0xec   : > { %v2581_v7 = vpop.f32.mrf.mxu0 }
  0xee   : > { %v713_v43 = vpop.f32.mrf.mxu0 }
  0xf0   : > { %v2582_v46 = vpop.f32.mrf.mxu0 }
  0xf1   : > { %v2589_v9 = vpop.f32.mrf.mxu1 }
  0xf2   : > { %v716_v15 = vpop.f32.mrf.mxu0 }
  0xf3   : > { %v745_v2 = vpop.f32.mrf.mxu1 }
  0xf5   : > { %v2590_v21 = vpop.f32.mrf.mxu1 }
  0xf7   : > { %v748_v49 = vpop.f32.mrf.mxu1 }
  0xfd   : > { %v2585_v0 = vpop.f32.mrf.mxu0 }
  0xff   : > { %v729_v50 = vpop.f32.mrf.mxu0 }
 0x101   : > { %v2593_v17 = vpop.f32.mrf.mxu1  ;;  %v2586_v3 = vpop.f32.mrf.mxu0 }
 0x103   : > { %v761_v54 = vpop.f32.mrf.mxu1  ;;  %v732_v55 = vpop.f32.mrf.mxu0 }
 0x105   : > { %v2594_v11 = vpop.f32.mrf.mxu1  ;;  %v2617_v58 = vpop.f32.mrf.mxu0 }
 0x107   : > { %v3477_v16 = vpop.f32.mrf.mxu1  ;;  %v1094_v18 = vpop.f32.mrf.mxu0 }
 0x109   : > { %v2599_v25 = vpop.f32.mrf.mxu1  ;;  %v2618_v31 = vpop.f32.mrf.mxu0 }
 0x10a   : > { %v886_v40 = vadd.f32 %v2599_v25, %v2581_v7 }
 0x10b   : > { %v877_v62 = vpop.f32.mrf.mxu1  ;;  %v1097_v48 = vpop.f32.mrf.mxu0 }
 0x10c   : > { %v3479_v47 = vadd.f32 %v2617_v58, %v886_v40  ;;  %v878_v19 = vadd.f32 %v877_v62, %v713_v43 }
 0x10d   : > { %v2600_v51 = vpop.f32.mrf.mxu1  ;;  %v2621_v63 = vpop.f32.mrf.mxu0 }
 0x10e   : > { %v3481_v8 = vadd.f32 %v1094_v18, %v878_v19  ;;  %v889_v13 = vadd.f32 %v2600_v51, %v2582_v46 }
 0x10f   : > { %v880_v56 = vpop.f32.mrf.mxu1  ;;  %v1110_v59 = vpop.f32.mrf.mxu0 }
 0x110   : > { %v3483_v61 = vadd.f32 %v2618_v31, %v889_v13  ;;  %v881_v60 = vadd.f32 %v880_v56, %v716_v15 }
 0x111   : > { %v2603_v34 = vpop.f32.mrf.mxu1  ;;  %v2622_v6 = vpop.f32.mrf.mxu0 }
 0x112   : > { %v3485_v10 = vadd.f32 %v1097_v48, %v881_v60  ;;  %v902_v12 = vadd.f32 %v2603_v34, %v2585_v0 }
 0x113   : > { %v893_v14 = vpop.f32.mrf.mxu1  ;;  %v1113_v20 = vpop.f32.mrf.mxu0 }
 0x114   : > { %v3487_v22 = vadd.f32 %v2621_v63, %v902_v12  ;;  %v894_v53 = vadd.f32 %v893_v14, %v729_v50 }
 0x115   : > { %v2604_v26 = vpop.f32.mrf.mxu1  ;;  %v2625_v27 = vpop.f32.mrf.mxu0 }
 0x116   : > { %v3489_v37 = vadd.f32 %v1110_v59, %v894_v53  ;;  %v905_v38 = vadd.f32 %v2604_v26, %v2586_v3 }
 0x117   : > { %v896_v39 = vpop.f32.mrf.mxu1  ;;  %v1126_v52 = vpop.f32.mrf.mxu0 }
 0x118   : > { %v3491_v57 = vadd.f32 %v2622_v6, %v905_v38  ;;  %v897_v32 = vadd.f32 %v896_v39, %v732_v55 }
 0x119   : > { %v2607_v44 = vpop.f32.mrf.mxu1  ;;  %v2626_v28 = vpop.f32.mrf.mxu0 }
 0x11a   : > { %v3493_v29 = vadd.f32 %v1113_v20, %v897_v32  ;;  %v918_v45 = vadd.f32 %v2607_v44, %v2589_v9 }
 0x11b   : > { %v909_v4 = vpop.f32.mrf.mxu1  ;;  %v1129_v5 = vpop.f32.mrf.mxu0 }
 0x11c   : > { %v3495_v1 = vadd.f32 %v2625_v27, %v918_v45  ;;  %v910_v30 = vadd.f32 %v909_v4, %v745_v2 }
 0x11d   : > { %v2608_v24 = vpop.f32.mrf.mxu1  ;;  %v2629_v33 = vpop.f32.mrf.mxu0 }
 0x11e   : > { %v3497_v35 = vadd.f32 %v1126_v52, %v910_v30  ;;  %v921_v42 = vadd.f32 %v2608_v24, %v2590_v21 }
 0x11f   : > { %v912_v36 = vpop.f32.mrf.mxu1  ;;  %v1142_v41 = vpop.f32.mrf.mxu0 }
 0x120   : > { %v3499_v23 = vadd.f32 %v2626_v28, %v921_v42  ;;  %v913_v7 = vadd.f32 %v912_v36, %v748_v49 }
 0x121   : > { %v2611_v43 = vpop.f32.mrf.mxu1  ;;  %v2630_v46 = vpop.f32.mrf.mxu0 }
 0x122   : > { %v3501_v15 = vadd.f32 %v1129_v5, %v913_v7  ;;  %v934_v9 = vadd.f32 %v2611_v43, %v2593_v17 }
 0x123   : > { %v925_v0 = vpop.f32.mrf.mxu1  ;;  %v1145_v50 = vpop.f32.mrf.mxu0 }
 0x124   : > { %v3503_v3 = vadd.f32 %v2629_v33, %v934_v9  ;;  %v926_v2 = vadd.f32 %v925_v0, %v761_v54 }
 0x125   : > { %v2612_v55 = vpop.f32.mrf.mxu1  ;;  %v3505_v58 = vpop.f32.mrf.mxu0 }
 0x126   : > { %v3507_v18 = vadd.f32 %v1142_v41, %v926_v2  ;;  %v937_v21 = vadd.f32 %v2612_v55, %v2594_v11 }
 0x127   : > { %v928_v25 = vpop.f32.mrf.mxu1  ;;  %v3509_v31 = vpop.f32.mrf.mxu0 }
 0x128   : > { %v3511_v49 = vadd.f32 %v2630_v46, %v937_v21  ;;  %v929_v40 = vadd.f32 %v928_v25, %v3477_v16 }
 0x129   : > { %v2635_v62 = vpop.f32.mrf.mxu1  ;;  %v3514_v17 = vpop.f32.mrf.mxu0 }
 0x12a   : > { %v3516_v48 = vadd.f32 %v1145_v50, %v929_v40 }
 0x12b   : > { %v1220_v19 = vpop.f32.mrf.mxu1  ;;  %v3518_v54 = vpop.f32.mrf.mxu0 }
 0x12d   : > { %v2636_v51 = vpop.f32.mrf.mxu1  ;;  %v3520_v63 = vpop.f32.mrf.mxu0 }
 0x12f   : > { %v1223_v13 = vpop.f32.mrf.mxu1  ;;  %v3522_v11 = vpop.f32.mrf.mxu0 }
 0x131   : > { %v2639_v56 = vpop.f32.mrf.mxu1  ;;  %v3524_v59 = vpop.f32.mrf.mxu0 }
 0x133   : > { %v1236_v60 = vpop.f32.mrf.mxu1  ;;  %v3526_v34 = vpop.f32.mrf.mxu0 }
 0x135   : > { %v2640_v16 = vpop.f32.mrf.mxu1  ;;  %v3528_v6 = vpop.f32.mrf.mxu0 }
 0x137   : > { %v1239_v12 = vpop.f32.mrf.mxu1  ;;  %v3530_v14 = vpop.f32.mrf.mxu0 }
 0x139   : > { %v2643_v20 = vpop.f32.mrf.mxu1  ;;  %v3532_v53 = vpop.f32.mrf.mxu0 }
 0x13b   : > { %v1252_v26 = vpop.f32.mrf.mxu1  ;;  %v3534_v27 = vpop.f32.mrf.mxu0 }
 0x13d   : > { %v2644_v38 = vpop.f32.mrf.mxu1  ;;  %v3536_v39 = vpop.f32.mrf.mxu0 }
 0x13e   : > { %3767 = vst [vmem:[#allocation2_spill] sm:$0xff] %v3536_v39 }
 0x13f   : > { %v1255_v52 = vpop.f32.mrf.mxu1  ;;  %v3538_v32 = vpop.f32.mrf.mxu0 }
 0x140   : > { %3768 = vst [vmem:[#allocation3_spill] sm:$0xff] %v3538_v32  ;;  %v1283_v32 = vadd.f32 %v1220_v19, %v3481_v8  ;;  %v1290_v8 = vadd.f32 %v2640_v16, %v3491_v57 }
 0x141   : > { %v2647_v44 = vpop.f32.mrf.mxu1  ;;  %v3540_v28 = vpop.f32.mrf.mxu0 }
 0x142   : > { %3769 = vst [vmem:[#allocation4_spill] sm:$0xff] %v3540_v28  ;;  %v1431_v19 = vadd.f32 %v3509_v31, %v1283_v32  ;;  %v1292_v31 = vadd.f32 %v1255_v52, %v3501_v15  ;;  %v1438_v16 = vadd.f32 %v3524_v59, %v1290_v8 }
 0x143   : > { %v1268_v45 = vpop.f32.mrf.mxu1  ;;  %v3542_v4 = vpop.f32.mrf.mxu0 }
 0x144   : > { %3770 = vst [vmem:[#allocation5_spill] sm:$0xff] %v3542_v4 }
 0x145   : > { %v2648_v5 = vpop.f32.mrf.mxu1  ;;  %v3544_v30 = vpop.f32.mrf.mxu0  ;;  %v3785_v52 = vld [vmem:[#allocation2_spill] sm:$0xff] }
 0x147   : > { %v1271_v24 = vpop.f32.mrf.mxu1  ;;  %v3546_v33 = vpop.f32.mrf.mxu0 }
 0x148   : > { %3771 = vst [vmem:[#allocation6_spill] sm:$0xff] %v3546_v33  ;;  %v1296_v15 = vadd.f32 %v1271_v24, %v3516_v48 }
 0x149   : > { %v2671_v42 = vpop.f32.mrf.mxu1  ;;  %v3548_v36 = vpop.f32.mrf.mxu0 }
 0x14a   : > { %3772 = vst [vmem:[#allocation7_spill] sm:$0xff] %v3548_v36 }
 0x14b   : > { %v1500_v41 = vpop.f32.mrf.mxu1  ;;  %v3550_v7 = vpop.f32.mrf.mxu0 }
 0x14c   : > { %3773 = vst [vmem:[#allocation8_spill] sm:$0xff] %v3550_v7 }
 0x14d   : > { %v2672_v43 = vpop.f32.mrf.mxu1  ;;  %v3552_v46 = vpop.f32.mrf.mxu0 }
 0x14e   : > { %3774 = vst [vmem:[#allocation9_spill] sm:$0xff] %v3552_v46 }
 0x14f   : > { %v1503_v9 = vpop.f32.mrf.mxu1  ;;  %v3554_v0 = vpop.f32.mrf.mxu0 }
 0x150   : > { %3775 = vst [vmem:[#allocation10_spill] sm:$0xff] %v3554_v0 }
 0x151   : > { %v2675_v50 = vpop.f32.mrf.mxu1  ;;  %v3556_v2 = vpop.f32.mrf.mxu0 }
 0x152   : > { %3776 = vst [vmem:[#allocation11_spill] sm:$0xff] %v3556_v2 }
 0x153   : > { %v1516_v55 = vpop.f32.mrf.mxu1  ;;  %v3558_v21 = vpop.f32.mrf.mxu0 }
 0x154   : > { %3777 = vst [vmem:[#allocation12_spill] sm:$0xff] %v3558_v21  ;;  %v1285_v21 = vadd.f32 %v2635_v62, %v3479_v47  ;;  %v1288_v62 = vadd.f32 %v1239_v12, %v3493_v29 }
 0x155   : > { %v2676_v25 = vpop.f32.mrf.mxu1  ;;  %v3560_v40 = vpop.f32.mrf.mxu0 }
 0x156   : > { %3778 = vst [vmem:[#allocation13_spill] sm:$0xff] %v3560_v40  ;;  %v1433_v47 = vadd.f32 %v3505_v58, %v1285_v21  ;;  %v1294_v58 = vadd.f32 %v2644_v38, %v3499_v23  ;;  %v1563_v23 = vadd.f32 %v1500_v41, %v1431_v19  ;;  %v3793_v19 = vld [vmem:[#allocation9_spill] sm:$0xff] }
 0x157   : > { %v3562_v4 = vpop.f32.mrf.mxu1  ;;  %v3564_v36 = vpop.f32.mrf.mxu0 }
 0x158   : > { %3779 = vst [vmem:[#allocation14_spill] sm:$0xff] %v3562_v4  ;;  %3780 = vst [vmem:[#allocation15_spill] sm:$0xff] %v3564_v36  ;;  %v1286_v36 = vadd.f32 %v2636_v51, %v3483_v61  ;;  %v1293_v61 = vadd.f32 %v2643_v20, %v3495_v1  ;;  %v1297_v1 = vadd.f32 %v2647_v44, %v3503_v3  ;;  %v3786_v44 = vld [vmem:[#allocation3_spill] sm:$0xff] }
 0x159   : > { %v2679_v7 = vpop.f32.mrf.mxu1  ;;  %v3566_v28 = vpop.f32.mrf.mxu0 }
 0x15a   : > { %3781 = vst [vmem:[#allocation16_spill] sm:$0xff] %v3566_v28  ;;  %v1284_v28 = vadd.f32 %v1223_v13, %v3485_v10  ;;  %v1291_v10 = vadd.f32 %v1252_v26, %v3497_v35  ;;  %v1441_v12 = vadd.f32 %v3528_v6, %v1293_v61  ;;  %v1442_v26 = vadd.f32 %v3532_v53, %v1294_v58 }
 0x15b   : > { %v3568_v46 = vpop.f32.mrf.mxu1  ;;  %v3570_v33 = vpop.f32.mrf.mxu0  ;;  %v1445_v6 = vadd.f32 %v3785_v52, %v1297_v1  ;;  %v1570_v53 = vadd.f32 %v2676_v25, %v1438_v16 }
 0x15c   : > { %3782 = vst [vmem:[#allocation17_spill] sm:$0xff] %v3568_v46  ;;  %3783 = vst [vmem:[#allocation18_spill] sm:$0xff] %v3570_v33  ;;  %v1289_v46 = vadd.f32 %v2639_v56, %v3487_v22  ;;  %v1287_v33 = vadd.f32 %v1236_v60, %v3489_v37  ;;  %v1434_v37 = vadd.f32 %v3514_v17, %v1286_v36 }
 0x15d   : > { %v3572_v0 = vpop.f32.mrf.mxu1  ;;  %v3574_v2 = vpop.f32.mrf.mxu0  ;;  %v1432_v13 = vadd.f32 %v3518_v54, %v1284_v28  ;;  %v1565_v56 = vadd.f32 %v2671_v42, %v1433_v47  ;;  %v1436_v17 = vadd.f32 %v3526_v34, %v1288_v62  ;;  %v1295_v54 = vadd.f32 %v1268_v45, %v3507_v18  ;;  %v3787_v45 = vld [vmem:[#allocation6_spill] sm:$0xff]  ;;  %v3789_v42 = vld [vmem:[#allocation5_spill] sm:$0xff]  ;;  %v3792_v47 = vld [vmem:[#allocation8_spill] sm:$0xff] }
 0x15e   : > { %3784 = vst [vmem:[#allocation19_spill] sm:$0xff] %v3572_v0  ;;  %v1437_v57 = vadd.f32 %v3520_v63, %v1289_v46  ;;  %v1435_v29 = vadd.f32 %v3522_v11, %v1287_v33  ;;  %v1439_v63 = vadd.f32 %v3530_v14, %v1291_v10  ;;  %v1298_v11 = vadd.f32 %v2648_v5, %v3511_v49  ;;  %v3631_v46 = vld [vmem:[%s3760_s4] ss:$0 sm:$0xff] }
 0x15f   : > { %v3578_v40 = vpop.f32.mrf.mxu1  ;;  %v3580_v4 = vpop.f32.mrf.mxu0  ;;  %v1691_v59 = vadd.f32 %v3544_v30, %v1565_v56  ;;  %v1566_v38 = vadd.f32 %v2672_v43, %v1434_v37  ;;  %v1564_v34 = vadd.f32 %v1503_v9, %v1432_v13  ;;  %v1440_v18 = vadd.f32 %v3534_v27, %v1292_v31  ;;  %v3788_v30 = vld [vmem:[#allocation4_spill] sm:$0xff]  ;;  %v3790_v41 = vld [vmem:[#allocation14_spill] sm:$0xff]  ;;  %v3797_v31 = vld [vmem:[#allocation11_spill] sm:$0xff] }
 0x160   : > { %v1569_v32 = vadd.f32 %v2675_v50, %v1437_v57  ;;  %v1567_v14 = vadd.f32 %v1516_v55, %v1435_v29  ;;  %v1443_v28 = vadd.f32 %v3786_v44, %v1295_v54  ;;  %v1689_v5 = vadd.f32 %v3787_v45, %v1563_v23  ;;  %v3791_v55 = vld [vmem:[#allocation7_spill] sm:$0xff]  ;;  %v3794_v10 = vld [vmem:[#allocation10_spill] sm:$0xff] }
 0x161   : > { %v3586_v39 = vpop.f32.mrf.mxu1  ;;  %v3588_v0 = vpop.f32.mrf.mxu0  ;;  %v1446_v33 = vadd.f32 %v3788_v30, %v1298_v11  ;;  %v1444_v36 = vadd.f32 %v3789_v42, %v1296_v15  ;;  %v1568_v27 = vadd.f32 %v3790_v41, %v1436_v17  ;;  %v1573_v43 = vadd.f32 %v2679_v7, %v1441_v12  ;;  %v3799_v12 = vld [vmem:[#allocation13_spill] sm:$0xff] }
 0x162   : > { %v1692_v21 = vadd.f32 %v3791_v55, %v1566_v38  ;;  %v1690_v8 = vadd.f32 %v3792_v47, %v1564_v34  ;;  %v1695_v61 = vadd.f32 %v3793_v19, %v1569_v32  ;;  %v1693_v7 = vadd.f32 %v3794_v10, %v1567_v14 }
 0x163   : > { %v3596_v51 = vpop.f32.mrf.mxu1  ;;  %v3598_v22 = vpop.f32.mrf.mxu0  ;;  %v3795_v37 = vld [vmem:[#allocation17_spill] sm:$0xff]  ;;  %v1696_v1 = vadd.f32 %v3797_v31, %v1570_v53  ;;  %v3648_v11 = vadd.f32 %v3799_v12, %v1573_v43  ;;  %v1572_v15 = vadd.f32 %v3578_v40, %v1440_v18 }
 0x164   : > { %v1571_v13 = vadd.f32 %v3795_v37, %v1439_v63  ;;  %v1575_v45 = vadd.f32 %v3596_v51, %v1443_v28 }
 0x165   : > { %v3607_v35 = vpop.f32.mrf.mxu1  ;;  %v2725_v60 = vpop.f32.mrf.mxu0  ;;  %v3796_v58 = vld [vmem:[#allocation19_spill] sm:$0xff] }
 0x166   : > { %v1574_v56 = vadd.f32 %v3796_v58, %v1442_v26  ;;  %v1578_v40 = vadd.f32 %v3607_v35, %v1446_v33 }
 0x167   : > { %v3616_v3 = vpop.f32.mrf.mxu1  ;;  %v1906_v20 = vpop.f32.mrf.mxu0 }
 0x168   : > { %v1576_v41 = vadd.f32 %v3616_v3, %v1444_v36  ;;  %v3678_v55 = vadd.f32 %v3588_v0, %v1578_v40 }
 0x169   : > { %v2707_v49 = vpop.f32.mrf.mxu1  ;;  %v2726_v48 = vpop.f32.mrf.mxu0 }
 0x16a   : > { %v1839_v24 = vadd.f32 %v2707_v49, %v1691_v59  ;;  %v1577_v59 = vadd.f32 %v3586_v39, %v1445_v6  ;;  %v3801_v49 = vld [vmem:[#allocation16_spill] sm:$0xff]  ;;  %v3682_v19 = vadd.f32 %v3598_v22, %v1576_v41 }
 0x16b   : > { %v1774_v9 = vpop.f32.mrf.mxu1  ;;  %v1909_v50 = vpop.f32.mrf.mxu0  ;;  %v3659_v44 = vadd.f32 %v3801_v49, %v1574_v56 }
 0x16c   : > { %v1971_v25 = vadd.f32 %v2725_v60, %v1839_v24  ;;  %v1837_v62 = vadd.f32 %v1774_v9, %v1689_v5  ;;  %v3798_v60 = vld [vmem:[#allocation12_spill] sm:$0xff]  ;;  %v3668_v42 = vadd.f32 %v3574_v2, %v1577_v59 }
 0x16d   : > { %v2708_v57 = vpop.f32.mrf.mxu1  ;;  %v2729_v29 = vpop.f32.mrf.mxu0  ;;  %v1694_v23 = vadd.f32 %v3798_v60, %v1568_v27 }
 0x16e   : > { %v1994_v16 = vadd.f32 %v3631_v46, %v1971_v25  ;;  %v1969_v17 = vadd.f32 %v1906_v20, %v1837_v62  ;;  %v1840_v54 = vadd.f32 %v2708_v57, %v1692_v21  ;;  %v3800_v20 = vld [vmem:[#allocation15_spill] sm:$0xff] }
 0x16f   : > { %v1777_v63 = vpop.f32.mrf.mxu1  ;;  %v1922_v38 = vpop.f32.mrf.mxu0  ;;  %v3656_v14 = vadd.f32 %v3800_v20, %v1571_v13 }
 0x170   : > { %v2010_v26 = vadd.f32 3.0, %v1994_v16  ;;  %v1992_v34 = vadd.f32 %v3631_v46, %v1969_v17  ;;  %v1972_v52 = vadd.f32 %v2726_v48, %v1840_v54  ;;  %v1838_v32 = vadd.f32 %v1777_v63, %v1690_v8  ;;  %v3802_v48 = vld [vmem:[#allocation18_spill] sm:$0xff] }
 0x171   : > { %v2711_v39 = vpop.f32.mrf.mxu1  ;;  %v2730_v18 = vpop.f32.mrf.mxu0  ;;  %v3665_v30 = vadd.f32 %v3802_v48, %v1572_v15 }
 0x172   : > { %v2026_v6 = vmax.f32 %v2010_v26, 0.0  ;;  %v2008_v5 = vadd.f32 3.0, %v1992_v34  ;;  %v1995_v53 = vadd.f32 %v3631_v46, %v1972_v52  ;;  %v1970_v24 = vadd.f32 %v1909_v50, %v1838_v32 }
 0x173   : > { %v1843_v51 = vadd.f32 %v2711_v39, %v1695_v61  ;;  %v1790_v35 = vpop.f32.mrf.mxu1  ;;  %v1925_v28 = vpop.f32.mrf.mxu0  ;;  %v3675_v50 = vadd.f32 %v3580_v4, %v1575_v45 }
 0x174   : > { %v2042_v33 = vmin.f32 %v2026_v6, 6.0  ;;  %v2024_v27 = vmax.f32 %v2008_v5, 0.0  ;;  %v2011_v43 = vadd.f32 3.0, %v1995_v53  ;;  %v1993_v9 = vadd.f32 %v3631_v46, %v1970_v24 }
 0x175   : > { %v1975_v2 = vadd.f32 %v2729_v29, %v1843_v51  ;;  %v1841_v21 = vadd.f32 %v1790_v35, %v1693_v7  ;;  %v2712_v3 = vpop.f32.mrf.mxu1  ;;  %v2733_v36 = vpop.f32.mrf.mxu0 }
 0x176   : > { %v2058_v47 = vmul.f32 %v2042_v33, %v1994_v16  ;;  %v2040_v8 = vmin.f32 %v2024_v27, 6.0  ;;  %v2027_v25 = vmax.f32 %v2011_v43, 0.0  ;;  %v2009_v62 = vadd.f32 3.0, %v1993_v9 }
 0x177   : > { %v1998_v61 = vadd.f32 %v3631_v46, %v1975_v2  ;;  %v1973_v10 = vadd.f32 %v1922_v38, %v1841_v21  ;;  %v1844_v4 = vadd.f32 %v2712_v3, %v1696_v1  ;;  %v1793_v37 = vpop.f32.mrf.mxu1  ;;  %v1938_v13 = vpop.f32.mrf.mxu0 }
 0x178   : > { %v2074_v0 = vmul.f32 0.16666667, %v2058_v47  ;;  %v2056_v58 = vmul.f32 %v2040_v8, %v1992_v34  ;;  %v2043_v56 = vmin.f32 %v2027_v25, 6.0  ;;  %v2025_v7 = vmax.f32 %v2009_v62, 0.0 }
 0x179   : > { %v2014_v57 = vadd.f32 3.0, %v1998_v61  ;;  %v1996_v22 = vadd.f32 %v3631_v46, %v1973_v10  ;;  %v1976_v29 = vadd.f32 %v2730_v18, %v1844_v4  ;;  %v1842_v31 = vadd.f32 %v1793_v37, %v1694_v23  ;;  %v2715_v16 = vpop.f32.mrf.mxu1  ;;  %v2734_v17 = vpop.f32.mrf.mxu0 }
 0x17a   : > { %v2482_v1 = vpack.c.bf16 %v2074_v0, %v2074_v0  ;;  %v2072_v54 = vmul.f32 0.16666667, %v2056_v58  ;;  %v2059_v60 = vmul.f32 %v2043_v56, %v1995_v53  ;;  %v2041_v12 = vmin.f32 %v2025_v7, 6.0 }
 0x17b   : > { %v2030_v15 = vmax.f32 %v2014_v57, 0.0  ;;  %v2012_v59 = vadd.f32 3.0, %v1996_v22  ;;  %v1999_v63 = vadd.f32 %v3631_v46, %v1976_v29  ;;  %v1974_v38 = vadd.f32 %v1925_v28, %v1842_v31  ;;  %v1806_v26 = vpop.f32.mrf.mxu1  ;;  %v1941_v20 = vpop.f32.mrf.mxu0 }
 0x17c   : > { %2155 = vst.msk [vmem:[%s3688_s14 + $0x8] sm:$0xf] %vm2152_vm8, %v2482_v1  ;;  %v2480_v34 = vpack.c.bf16 %v2072_v54, %v2072_v54  ;;  %v2075_v52 = vmul.f32 0.16666667, %v2059_v60  ;;  %v2057_v32 = vmul.f32 %v2041_v12, %v1993_v9  ;;  %v1847_v23 = vadd.f32 %v2715_v16, %v3648_v11 }
 0x17d   : > { %v2046_v49 = vmin.f32 %v2030_v15, 6.0  ;;  %v2028_v45 = vmax.f32 %v2012_v59, 0.0  ;;  %v2015_v40 = vadd.f32 3.0, %v1999_v63  ;;  %v1997_v39 = vadd.f32 %v3631_v46, %v1974_v38  ;;  %v2716_v18 = vpop.f32.mrf.mxu1  ;;  %v2737_v9 = vpop.f32.mrf.mxu0 }
 0x17e   : > { %2153 = vst.msk [vmem:[%s3688_s14] sm:$0xf] %vm2152_vm8, %v2480_v34  ;;  %v2483_v6 = vpack.c.bf16 %v2075_v52, %v2075_v52  ;;  %v2073_v5 = vmul.f32 0.16666667, %v2057_v32  ;;  %v1979_v53 = vadd.f32 %v2733_v36, %v1847_v23  ;;  %v1845_v24 = vadd.f32 %v1806_v26, %v3656_v14 }
 0x17f   : > { %v2062_v48 = vmul.f32 %v2046_v49, %v1998_v61  ;;  %v2044_v41 = vmin.f32 %v2028_v45, 6.0  ;;  %v2031_v51 = vmax.f32 %v2015_v40, 0.0  ;;  %v2013_v11 = vadd.f32 3.0, %v1997_v39  ;;  %v1809_v35 = vpop.f32.mrf.mxu1  ;;  %v1954_v7 = vpop.f32.mrf.mxu0 }
 0x180   : > { %2156 = vst.msk [vmem:[%s3688_s14 + $0xc] sm:$0xf] %vm2152_vm8, %v2483_v6  ;;  %v2481_v28 = vpack.c.bf16 %v2073_v5, %v2073_v5  ;;  %v2002_v33 = vadd.f32 %v3631_v46, %v1979_v53  ;;  %v1977_v27 = vadd.f32 %v1938_v13, %v1845_v24  ;;  %v1848_v43 = vadd.f32 %v2716_v18, %v3659_v44 }
 0x181   : > { %v2078_v2 = vmul.f32 0.16666667, %v2062_v48  ;;  %v2060_v21 = vmul.f32 %v2044_v41, %v1996_v22  ;;  %v2047_v3 = vmin.f32 %v2031_v51, 6.0  ;;  %v2029_v36 = vmax.f32 %v2013_v11, 0.0  ;;  %v2719_v14 = vpop.f32.mrf.mxu1 }
 0x182   : > { %2154 = vst.msk [vmem:[%s3688_s14 + $0x4] sm:$0xf] %vm2152_vm8, %v2481_v28  ;;  %v2018_v47 = vadd.f32 3.0, %v2002_v33  ;;  %v2000_v8 = vadd.f32 %v3631_v46, %v1977_v27  ;;  %v1980_v25 = vadd.f32 %v2734_v17, %v1848_v43  ;;  %v1846_v62 = vadd.f32 %v1809_v35, %v3665_v30 }
 0x183   : > { %v2486_v61 = vpack.c.bf16 %v2078_v2, %v2078_v2  ;;  %v2076_v10 = vmul.f32 0.16666667, %v2060_v21  ;;  %v2063_v4 = vmul.f32 %v2047_v3, %v1999_v63  ;;  %v2045_v37 = vmin.f32 %v2029_v36, 6.0  ;;  %v1822_v44 = vpop.f32.mrf.mxu1 }
 0x184   : > { %v2034_v13 = vmax.f32 %v2018_v47, 0.0  ;;  %v2016_v0 = vadd.f32 3.0, %v2000_v8  ;;  %v2003_v58 = vadd.f32 %v3631_v46, %v1980_v25  ;;  %v1978_v56 = vadd.f32 %v1941_v20, %v1846_v62 }
 0x185   : > { %2159 = vst.msk [vmem:[%s3688_s14 + $0x18] sm:$0xf] %vm2152_vm8, %v2486_v61  ;;  %v2484_v57 = vpack.c.bf16 %v2076_v10, %v2076_v10  ;;  %v2079_v22 = vmul.f32 0.16666667, %v2063_v4  ;;  %v2061_v29 = vmul.f32 %v2045_v37, %v1997_v39  ;;  %v1851_v31 = vadd.f32 %v2719_v14, %v3668_v42  ;;  %v2720_v30 = vpop.f32.mrf.mxu1  ;;  %v2738_v42 = vpop.f32.mrf.mxu0 }
 0x186   : > { %v2050_v16 = vmin.f32 %v2034_v13, 6.0  ;;  %v2032_v17 = vmax.f32 %v2016_v0, 0.0  ;;  %v2019_v1 = vadd.f32 3.0, %v2003_v58  ;;  %v2001_v54 = vadd.f32 %v3631_v46, %v1978_v56 }
 0x187   : > { %2157 = vst.msk [vmem:[%s3688_s14 + $0x10] sm:$0xf] %vm2152_vm8, %v2484_v57  ;;  %v2487_v60 = vpack.c.bf16 %v2079_v22, %v2079_v22  ;;  %v2077_v12 = vmul.f32 0.16666667, %v2061_v29  ;;  %v1983_v15 = vadd.f32 %v2737_v9, %v1851_v31  ;;  %v1849_v59 = vadd.f32 %v1822_v44, %v3675_v50  ;;  %v1825_v52 = vpop.f32.mrf.mxu1  ;;  %v1957_v11 = vpop.f32.mrf.mxu0 }
 0x188   : > { %v2066_v63 = vmul.f32 %v2050_v16, %v2002_v33  ;;  %v2048_v38 = vmin.f32 %v2032_v17, 6.0  ;;  %v2035_v26 = vmax.f32 %v2019_v1, 0.0  ;;  %v2017_v34 = vadd.f32 3.0, %v2001_v54 }
 0x189   : > { %2160 = vst.msk [vmem:[%s3688_s14 + $0x1c] sm:$0xf] %vm2152_vm8, %v2487_v60  ;;  %v2485_v32 = vpack.c.bf16 %v2077_v12, %v2077_v12  ;;  %v2006_v23 = vadd.f32 %v3631_v46, %v1983_v15  ;;  %v1981_v20 = vadd.f32 %v1954_v7, %v1849_v59  ;;  %v1852_v49 = vadd.f32 %v2720_v30, %v3678_v55 }
 0x18a   : > { %v2082_v45 = vmul.f32 0.16666667, %v2066_v63  ;;  %v2064_v40 = vmul.f32 %v2048_v38, %v2000_v8  ;;  %v2051_v39 = vmin.f32 %v2035_v26, 6.0  ;;  %v2033_v50 = vmax.f32 %v2017_v34, 0.0 }
 0x18b   : > { %2158 = vst.msk [vmem:[%s3688_s14 + $0x14] sm:$0xf] %vm2152_vm8, %v2485_v32  ;;  %v2022_v18 = vadd.f32 3.0, %v2006_v23  ;;  %v2004_v6 = vadd.f32 %v3631_v46, %v1981_v20  ;;  %v1984_v5 = vadd.f32 %v2738_v42, %v1852_v49  ;;  %v1850_v53 = vadd.f32 %v1825_v52, %v3682_v19 }
 0x18c   : > { %v2490_v24 = vpack.c.bf16 %v2082_v45, %v2082_v45  ;;  %v2080_v48 = vmul.f32 0.16666667, %v2064_v40  ;;  %v2067_v41 = vmul.f32 %v2051_v39, %v2003_v58  ;;  %v2049_v51 = vmin.f32 %v2033_v50, 6.0 }
 0x18d   : > { %v2038_v55 = vmax.f32 %v2022_v18, 0.0  ;;  %v2020_v35 = vadd.f32 3.0, %v2004_v6  ;;  %v2007_v28 = vadd.f32 %v3631_v46, %v1984_v5  ;;  %v1982_v33 = vadd.f32 %v1957_v11, %v1850_v53 }
 0x18e   : > { %2163 = vst.msk [vmem:[%s3688_s14 + $0x28] sm:$0xf] %vm2152_vm8, %v2490_v24  ;;  %v2488_v27 = vpack.c.bf16 %v2080_v48, %v2080_v48  ;;  %v2083_v43 = vmul.f32 0.16666667, %v2067_v41  ;;  %v2065_v9 = vmul.f32 %v2049_v51, %v2001_v54 }
 0x18f   : > { %v2054_v2 = vmin.f32 %v2038_v55, 6.0  ;;  %v2036_v21 = vmax.f32 %v2020_v35, 0.0  ;;  %v2023_v19 = vadd.f32 3.0, %v2007_v28  ;;  %v2005_v3 = vadd.f32 %v3631_v46, %v1982_v33 }
 0x190   : > { %2161 = vst.msk [vmem:[%s3688_s14 + $0x20] sm:$0xf] %vm2152_vm8, %v2488_v27  ;;  %v2491_v36 = vpack.c.bf16 %v2083_v43, %v2083_v43  ;;  %v2081_v14 = vmul.f32 0.16666667, %v2065_v9 }
 0x191   : > { %v2070_v47 = vmul.f32 %v2054_v2, %v2006_v23  ;;  %v2052_v8 = vmin.f32 %v2036_v21, 6.0  ;;  %v2039_v25 = vmax.f32 %v2023_v19, 0.0  ;;  %v2021_v62 = vadd.f32 3.0, %v2005_v3 }
 0x192   : > { %2164 = vst.msk [vmem:[%s3688_s14 + $0x2c] sm:$0xf] %vm2152_vm8, %v2491_v36  ;;  %v2489_v61 = vpack.c.bf16 %v2081_v14, %v2081_v14 }
 0x193   : > { %v2086_v10 = vmul.f32 0.16666667, %v2070_v47  ;;  %v2068_v4 = vmul.f32 %v2052_v8, %v2004_v6  ;;  %v2055_v37 = vmin.f32 %v2039_v25, 6.0  ;;  %v2037_v44 = vmax.f32 %v2021_v62, 0.0 }
 0x194   : > { %2162 = vst.msk [vmem:[%s3688_s14 + $0x24] sm:$0xf] %vm2152_vm8, %v2489_v61 }
 0x195   : > { %v2494_v46 = vpack.c.bf16 %v2086_v10, %v2086_v10  ;;  %v2084_v13 = vmul.f32 0.16666667, %v2068_v4  ;;  %v2071_v0 = vmul.f32 %v2055_v37, %v2007_v28  ;;  %v2053_v58 = vmin.f32 %v2037_v44, 6.0 }
 0x197   : > { %2167 = vst.msk [vmem:[%s3688_s14 + $0x38] sm:$0xf] %vm2152_vm8, %v2494_v46  ;;  %v2492_v56 = vpack.c.bf16 %v2084_v13, %v2084_v13  ;;  %v2087_v7 = vmul.f32 0.16666667, %v2071_v0  ;;  %v2069_v57 = vmul.f32 %v2053_v58, %v2005_v3 }
 0x199   : > { %2165 = vst.msk [vmem:[%s3688_s14 + $0x30] sm:$0xf] %vm2152_vm8, %v2492_v56  ;;  %v2495_v22 = vpack.c.bf16 %v2087_v7, %v2087_v7  ;;  %v2085_v29 = vmul.f32 0.16666667, %v2069_v57 }
 0x19b   : > { %2168 = vst.msk [vmem:[%s3688_s14 + $0x3c] sm:$0xf] %vm2152_vm8, %v2495_v22  ;;  %v2493_v31 = vpack.c.bf16 %v2085_v29, %v2085_v29 }
 0x19d   : > { %2166 = vst.msk [vmem:[%s3688_s14 + $0x34] sm:$0xf] %vm2152_vm8, %v2493_v31 }
 0x19e PF: > { %s15_s22 = sadd.s32 1, %s2843_s22   ;;  %s3803_s18 = smov %s2835_s20 }
 0x19f   : > { %p12_p10 = scmp.ge.s32.totalorder %s15_s22, 6   ;;  %s3804_s19 = smov %s2839_s21 }
 0x1a0   : > { %s3805_s20 = smov %s3808_s23  ;;  %s3806_s21 = smov %s3812_s24 }
 0x1a1   :  { %14 = sbr.rel (!%p12_p10) target bundleno = 3 (0x3), region = 84 }

// kernel: context_module.5
= control target key start
LH: loop header
LB: loop body
LE: loop exit
PB: predicated region body
PF: predicated region fallthrough
CT: control target
= control target key end

     0   :  { %s2779_s18 = smov 0   ;;  %s2781_s19 = smov 0   ;;  %s3663_s0 = inlined_call_operand.vmem [shape: bf16[2,18,18,4], index: 0, kind: input, shape index: {}, may-alias: {0,1,2}]   ;;  %s3664_s1 = inlined_call_operand.vmem [shape: bf16[2,18,18,4], index: 1, kind: input, shape index: {}, may-alias: {0,1,2}]   ;;  %s3665_s2 = inlined_call_operand.vmem [shape: bf16[2,18,18,4], index: 2, kind: input, shape index: {}, may-alias: {0,1,2}]   ;;  %s3666_s3 = inlined_call_operand.vmem [shape: bf16[9,4,2], index: 3, kind: input, shape index: {}]   ;;  %s3667_s4 = inlined_call_operand.vmem [shape: f32[1,2], index: 4, kind: input, shape index: {}]   ;;  %s3668_s5 = inlined_call_operand.vmem [shape: f32[2,16,16,2], index: 5, kind: output, shape index: {}]  }
   0x1   :  { %s2783_s20 = smov 0   ;;  %s2785_s21 = smov 0  }
   0x2   :  { %s2787_s22 = smov 0  }
   0x3 LB: > { %s24_s23 = sadd.s32 1, %s2739_s20  ;;  %s27_s24 = sadd.s32 1, %s2743_s21  ;;  %s2747_s22 = sphi %s2787_s22, %s15_s22   ;;  %s2743_s21 = sphi %s2785_s21, %s3713_s21   ;;  %s2739_s20 = sphi %s2783_s20, %s3712_s20   ;;  %s2735_s19 = sphi %s2781_s19, %s3711_s19   ;;  %s2731_s18 = sphi %s2779_s18, %s3710_s18  }
   0x4   : > { %p25_p0 = scmp.ge.s32.totalorder %s24_s23, 2  ;;  %p2254_p1 = scmp.ge.s32.totalorder %s2747_s22, 1 }
   0x5   : > { %p271_p2 = scmp.lt.s32.totalorder %s2747_s22, 5 }
   0x6   : > { %s3715_s23 = smov (%p25_p0, %s24_s23), 0  ;;  %s3717_s24 = smov (!%p25_p0, %s27_s24), %s2743_s21 }
   0x7   : > { %p272_p3 = pnand %p2254_p1, %p271_p2  ;;  %p29_p4 = scmp.ge.s32.totalorder %s3717_s24, 2 }
   0x9   : > { %s3719_s24 = smov (%p29_p4, %s3717_s24), 0  ;;  %275 = sbr.rel (%p272_p3) target bundleno = 410 (0x19a), region = 40 }
   0xe   : > { %v2265_v0 = vld [vmem:[%s3666_s3 + $0x2] sm:$0x3]  ;;  %vm675_vm0 = vcmask 1041408   ;;  %s2812_s27 = sshll.u32 %s2731_s18, 3  ;;  %p343_p5 = scmp.lt.s32.totalorder %s2735_s19, 1  ;;  %vm650_vm3 = vcmask 31744  }
   0xf   : > { %2646 = vmatprep.subr.msk.bf16.mxu1 %vm675_vm0, %v2265_v0  ;;  %2645 = vmatprep.subr.msk.bf16.mxu0 %vm675_vm0, %v2265_v0  ;;  %v677_v1 = vsel %vm675_vm0, %v2265_v0, 0  ;;  %p345_p6 = scmp.lt.s32.totalorder %s2812_s27, 17  ;;  %v428_v2 = vld [vmem:[%s3666_s3] sm:$0x3]  ;;  %v2306_v3 = vld [vmem:[%s3666_s3 + $0x4] sm:$0x3] }
  0x10   : > { %2644 = vmatpush3.bf16.msra.mxu1 %v677_v1  ;;  %2482 = vmatpush3.bf16.msra.mxu0 %v677_v1  ;;  %s3721_s19 = smov (!%p343_p5, %s2735_s19), 1  ;;  %vm429_vm1 = vsmask.f32 3328  ;;  %vm430_vm2 = vsmask.f32 7440  ;;  %v2862_v15 = vsel %vm675_vm0, %v428_v2, 0 }
  0x11   : > { %s346_s7 = scalar_select %p345_p6, %s2812_s27, 17  ;;  %2647 = vmatprep.subr.msk.bf16.mxu1 %vm675_vm0, %v428_v2  ;;  %2648 = vmatprep.subr.msk.bf16.mxu0 %vm675_vm0, %v2306_v3  ;;  %vm2877_vm4 = vmor %vm429_vm1, %vm430_vm2  ;;  %v2882_v34 = vsel %vm675_vm0, %v2306_v3, 0  ;;  %vm948_vm5 = vcmask 1042432   ;;  %vm949_vm6 = vcmask 1046532   ;;  %vm2088_vm8 = vcmask 15360  }
  0x12   : > { %s2830_s8 = smul.u32 54, %s3721_s19  ;;  %s2969_s17 = sadd.s32 8, %s2812_s27  ;;  %vm3041_vm7 = vmor %vm948_vm5, %vm949_vm6 }
  0x13   : > { %s2655_s9 = smul.u32 3, %s346_s7  ;;  %p362_p7 = scmp.lt.s32.totalorder %s2969_s17, 17 }
  0x14   : > { %s373_s26 = sadd.s32 1, %s2969_s17  ;;  %p389_p9 = scmp.lt.s32.totalorder %s2812_s27, 15 }
  0x15   : > { %s349_s10 = sadd.s32 %s2830_s8, %s2655_s9  ;;  %p3034_p8 = scmp.lt.s32.totalorder %s373_s26, 17 }
  0x16   : > { %s2256_s11 = sshll.u32 %s349_s10, 2  ;;  %s3725_s27 = smov (!%p389_p9, %s2812_s27), 15 }
  0x17   : > { %s2836_s14 = scalar_lea.vmem %s3663_s0, %s2256_s11  ;;  %s3723_s26 = smov (!%p3034_p8, %s373_s26), 17 }
  0x18   : > { %v2839_v4 = vld [vmem:[%s2836_s14] sm:$0xf]  ;;  %v2842_v5 = vld [vmem:[%s2836_s14 + $0x4] sm:$0xf]  ;;  %v2845_v6 = vld [vmem:[%s2836_s14 + $0x8] sm:$0x1] }
  0x19   : > { %v433_v7 = vshrl.u32 %v2839_v4, 16  ;;  %v436_v8 = vshll.u32 %v2839_v4, 16  ;;  %v442_v9 = vshll.u32 %v2842_v5, 16  ;;  %v446_v10 = vshrl.u32 %v2842_v5, 16  ;;  %v2852_v11 = vld [vmem:[%s2836_s14 + $0x30] sm:$0xf] }
  0x1a   : > { %v452_v12 = vshll.u32 %v2845_v6, 16  ;;  %v2856_v13 = vld [vmem:[%s2836_s14 + $0x34] sm:$0xf]  ;;  %v2859_v14 = vld [vmem:[%s2836_s14 + $0x38] sm:$0x1]  ;;  %v529_v21 = vshrl.u32 %v2852_v11, 16 }
  0x1b   : > { %v435_v16 = vrot.slane %v433_v7, 4  ;;  %v438_v17 = vrot.slane %v436_v8, 5  ;;  %v444_v18 = vrot.slane %v442_v9, 5  ;;  %v448_v19 = vrot.slane %v446_v10, 4  ;;  %v2870_v28 = vld [vmem:[%s2836_s14 + $0xc] sm:$0xf] }
  0x1c   : > { %v454_v20 = vrot.slane %v452_v12, 5  ;;  %v532_v22 = vshll.u32 %v2852_v11, 16  ;;  %v538_v23 = vshll.u32 %v2856_v13, 16  ;;  %v542_v26 = vshrl.u32 %v2856_v13, 16  ;;  %v2873_v29 = vld [vmem:[%s2836_s14 + $0x10] sm:$0xf] }
  0x1d   : > { %v439_v24 = vor.u32 %v438_v17, %v435_v16  ;;  %v449_v25 = vor.u32 %v448_v19, %v444_v18  ;;  %v548_v27 = vshll.u32 %v2859_v14, 16  ;;  %v531_v31 = vrot.slane %v529_v21, 4  ;;  %v2885_v40 = vld [vmem:[%s2836_s14 + $0x14] sm:$0x1]  ;;  %v2896_v52 = vld [vmem:[%s2836_s14 + $0x3c] sm:$0xf] }
  0x1e   : > { %v534_v32 = vrot.slane %v532_v22, 5  ;;  %v540_v33 = vrot.slane %v538_v23, 5  ;;  %v544_v37 = vrot.slane %v542_v26, 4  ;;  %v457_v41 = vshrl.u32 %v2870_v28, 16  ;;  %v2900_v57 = vld [vmem:[%s2836_s14 + $0x40] sm:$0xf] }
  0x1f   : > { %v440_v35 = vrot.slane %v439_v24, 4  ;;  %v450_v36 = vrot.slane %v449_v25, 4  ;;  %v550_v38 = vrot.slane %v548_v27, 5  ;;  %v460_v42 = vshll.u32 %v2870_v28, 16  ;;  %v2908_v62 = vld [vmem:[%s2836_s14 + $0x44] sm:$0x1] }
  0x20   : > { %v535_v39 = vor.u32 %v534_v32, %v531_v31  ;;  %v466_v43 = vshll.u32 %v2873_v29, 16  ;;  %v545_v46 = vor.u32 %v544_v37, %v540_v33  ;;  %v470_v47 = vshrl.u32 %v2873_v29, 16  ;;  %v2914_v3 = vld [vmem:[%s2836_s14 + $0x18] sm:$0xf]  ;;  %v2923_v19 = vld [vmem:[%s2836_s14 + $0x1c] sm:$0xf] }
  0x21   : > { %v445_v44 = vsel %vm2877_vm4, %v440_v35, %v444_v18  ;;  %v455_v45 = vsel %vm2877_vm4, %v450_v36, %v454_v20  ;;  %v459_v50 = vrot.slane %v457_v41, 4  ;;  %v462_v51 = vrot.slane %v460_v42, 5  ;;  %v2930_v23 = vld [vmem:[%s2836_s14 + $0x20] sm:$0x1]  ;;  %v2937_v32 = vld [vmem:[%s2836_s14 + $0x48] sm:$0xf] }
  0x22   : > { %v2266_v48 = vcombine.low %v445_v44, %v455_v45  ;;  %v536_v49 = vrot.slane %v535_v39, 4  ;;  %v546_v53 = vrot.slane %v545_v46, 4  ;;  %v468_v54 = vrot.slane %v466_v43, 5  ;;  %v2950_v44 = vld [vmem:[%s2836_s14 + $0x4c] sm:$0xf]  ;;  %s3026_s28 = scalar_select %p362_p7, %s2969_s17, 17 }
  0x23   : > { %v472_v55 = vrot.slane %v470_v47, 4  ;;  %v476_v56 = vshll.u32 %v2885_v40, 16  ;;  %v956_v58 = vrot.slane %v2845_v6, 5  ;;  %v463_v60 = vor.u32 %v462_v51, %v459_v50  ;;  %s2658_s7 = smul.u32 3, %s3723_s26  ;;  %s2262_s10 = sshll.u32 %s3725_s27, 1 }
  0x24   : > { %2483 = vmatprep.mubr.msk.bf16.mxu0 %vm650_vm3, %v2266_v48  ;;  %v541_v59 = vsel %vm2877_vm4, %v536_v49, %v540_v33  ;;  %v960_v61 = vrot.slane %v2873_v29, 5  ;;  %v551_v63 = vsel %vm2877_vm4, %v546_v53, %v550_v38  ;;  %v553_v2 = vshrl.u32 %v2896_v52, 16  ;;  %v2945_v38 = vld [vmem:[%s3666_s3 + $0x8] sm:$0x3]  ;;  %s2657_s30 = smul.u32 3, %s3026_s28  ;;  %s2263_s11 = sshll.u32 %s3721_s19, 5 }
  0x25   : > { %v473_v0 = vor.u32 %v472_v55, %v468_v54  ;;  %v478_v1 = vrot.slane %v476_v56, 5  ;;  %v2916_v7 = vcombine.low %v541_v59, %v551_v63  ;;  %v464_v8 = vrot.slane %v463_v60, 4  ;;  %v2964_v63 = vld [vmem:[%s2836_s14 + $0x24] sm:$0xf]  ;;  %s3119_s13 = sadd.s32 %s2658_s7, %s2830_s8  ;;  %s3570_s19 = sadd.s32 %s2263_s11, %s2262_s10 }
  0x26   : > { %v556_v9 = vshll.u32 %v2896_v52, 16  ;;  %v562_v10 = vshll.u32 %v2900_v57, 16  ;;  %v555_v16 = vrot.slane %v553_v2, 4  ;;  %v566_v17 = vshrl.u32 %v2900_v57, 16  ;;  %s366_s6 = sadd.s32 %s2657_s30, %s2830_s8  ;;  %s2260_s8 = sshll.u32 %s3119_s13, 2 }
  0x27   : > { %v474_v12 = vrot.slane %v473_v0, 4  ;;  %v572_v18 = vshll.u32 %v2908_v62, 16  ;;  %2491 = vmatprep.mubr.msk.bf16.mxu1 %vm650_vm3, %v2916_v7  ;;  %v469_v20 = vsel %vm2877_vm4, %v464_v8, %v468_v54  ;;  %v481_v24 = vshrl.u32 %v2914_v3, 16  ;;  %v2958_v54 = vld [vmem:[%s2836_s14 + $0x50] sm:$0x1]  ;;  %s2258_s9 = sshll.u32 %s366_s6, 2  ;;  %s382_s26 = scalar_lea.vmem %s3665_s2, %s2260_s8 }
  0x28   : > { %v558_v21 = vrot.slane %v556_v9, 5  ;;  %v564_v22 = vrot.slane %v562_v10, 5  ;;  %v568_v26 = vrot.slane %v566_v17, 4  ;;  %v484_v31 = vshll.u32 %v2914_v3, 16  ;;  %v2975_v8 = vld [vmem:[%s2836_s14 + $0x28] sm:$0xf]  ;;  %s368_s12 = scalar_lea.vmem %s3664_s1, %s2258_s9 }
  0x29   : > { %v479_v25 = vsel %vm2877_vm4, %v474_v12, %v478_v1  ;;  %v574_v27 = vrot.slane %v572_v18, 5  ;;  %v483_v36 = vrot.slane %v481_v24, 4  ;;  %v490_v37 = vshll.u32 %v2923_v19, 16  ;;  %v2983_v17 = vld [vmem:[%s3666_s3 + $0x6] sm:$0x3]  ;;  %s2264_s27 = sshll.u32 %s3570_s19, 3 }
  0x2a   : > { %v2939_v33 = vcombine.low %v469_v20, %v479_v25  ;;  %v559_v35 = vor.u32 %v558_v21, %v555_v16  ;;  %v569_v39 = vor.u32 %v568_v26, %v564_v22  ;;  %v486_v41 = vrot.slane %v484_v31, 5 }
  0x2b   : > { %v494_v42 = vshrl.u32 %v2923_v19, 16  ;;  %v500_v43 = vshll.u32 %v2930_v23, 16  ;;  %v492_v46 = vrot.slane %v490_v37, 5  ;;  %v577_v47 = vshrl.u32 %v2937_v32, 16 }
  0x2c   : > { %2484 = vmatmul.mubr.msk.bf16.vlgmr.msra.gmra.mxu0 %vm650_vm3, %v2939_v33  ;;  %v560_v45 = vrot.slane %v559_v35, 4  ;;  %v580_v48 = vshll.u32 %v2937_v32, 16  ;;  %v570_v49 = vrot.slane %v569_v39, 4  ;;  %v487_v50 = vor.u32 %v486_v41, %v483_v36  ;;  %v2997_v35 = vld [vmem:[%s2836_s14 + $0x54] sm:$0xf] }
  0x2d   : > { %2518 = vmatpush3.bf16.msra.mxu0 %v2882_v34  ;;  %v496_v51 = vrot.slane %v494_v42, 4  ;;  %v502_v53 = vrot.slane %v500_v43, 5  ;;  %v579_v56 = vrot.slane %v577_v47, 4  ;;  %v586_v60 = vshll.u32 %v2950_v44, 16  ;;  %v3004_v42 = vld [vmem:[%s2836_s14 + $0x58] sm:$0xf] }
  0x2e   : > { %v565_v55 = vsel %vm2877_vm4, %v560_v45, %v564_v22  ;;  %v582_v59 = vrot.slane %v580_v48, 5  ;;  %2650 = vmatprep.subr.msk.bf16.mxu0 %vm675_vm0, %v2945_v38  ;;  %v575_v34 = vsel %vm2877_vm4, %v570_v49, %v574_v27  ;;  %v488_v0 = vrot.slane %v487_v50, 4  ;;  %v2988_v22 = vld [vmem:[%s2836_s14 + $0x2c] sm:$0x1] }
  0x2f   : > { %v497_v1 = vor.u32 %v496_v51, %v492_v46  ;;  %v590_v2 = vshrl.u32 %v2950_v44, 16  ;;  %v2977_v9 = vcombine.low %v565_v55, %v575_v34  ;;  %v588_v12 = vrot.slane %v586_v60, 5 }
  0x30   : > { %v583_v10 = vor.u32 %v582_v59, %v579_v56  ;;  %v596_v16 = vshll.u32 %v2958_v54, 16  ;;  %v493_v18 = vsel %vm2877_vm4, %v488_v0, %v492_v46  ;;  %v505_v24 = vshrl.u32 %v2964_v63, 16 }
  0x31   : > { %v498_v20 = vrot.slane %v497_v1, 4  ;;  %v592_v21 = vrot.slane %v590_v2, 4  ;;  %2492 = vmatmul.mubr.msk.bf16.vlgmr.msra.gmra.mxu1 %vm650_vm3, %v2977_v9  ;;  %v508_v27 = vshll.u32 %v2964_v63, 16  ;;  %v514_v31 = vshll.u32 %v2975_v8, 16 }
  0x32   : > { %v584_v25 = vrot.slane %v583_v10, 4  ;;  %v598_v26 = vrot.slane %v596_v16, 5  ;;  %2500 = vmatpush3.bf16.msra.mxu1 %v2862_v15  ;;  %v507_v39 = vrot.slane %v505_v24, 4  ;;  %v518_v41 = vshrl.u32 %v2975_v8, 16  ;;  %v2375_v24 = vld [vmem:[%s3666_s3 + $0x10] sm:$0x3] }
  0x33   : > { %v503_v36 = vsel %vm2877_vm4, %v498_v20, %v502_v53  ;;  %v593_v37 = vor.u32 %v592_v21, %v588_v12  ;;  %v510_v46 = vrot.slane %v508_v27, 5  ;;  %v516_v47 = vrot.slane %v514_v31, 5  ;;  %2649 = vmatprep.subr.msk.bf16.mxu1 %vm675_vm0, %v2983_v17  ;;  %v3018_v53 = vld [vmem:[%s2836_s14 + $0x5c] sm:$0x1]  ;;  %s3594_s14 = scalar_lea.vmem %s3668_s5, %s2264_s27 }
  0x34   : > { %v3006_v43 = vcombine.low %v493_v18, %v503_v36  ;;  %v589_v45 = vsel %vm2877_vm4, %v584_v25, %v588_v12  ;;  %v520_v48 = vrot.slane %v518_v41, 4  ;;  %v524_v49 = vshll.u32 %v2988_v22, 16 }
  0x35   : > { %v594_v15 = vrot.slane %v593_v37, 4  ;;  %v601_v50 = vshrl.u32 %v2997_v35, 16  ;;  %v511_v51 = vor.u32 %v510_v46, %v507_v39  ;;  %v604_v55 = vshll.u32 %v2997_v35, 16 }
  0x36   : > { %2487 = vmatprep.mubr.msk.bf16.mxu0 %vm650_vm3, %v3006_v43  ;;  %v610_v56 = vshll.u32 %v3004_v42, 16  ;;  %v614_v59 = vshrl.u32 %v3004_v42, 16  ;;  %v521_v34 = vor.u32 %v520_v48, %v516_v47  ;;  %v526_v0 = vrot.slane %v524_v49, 5 }
  0x37   : > { %v599_v60 = vsel %vm2877_vm4, %v594_v15, %v598_v26  ;;  %v603_v1 = vrot.slane %v601_v50, 4  ;;  %v512_v10 = vrot.slane %v511_v51, 4  ;;  %v606_v12 = vrot.slane %v604_v55, 5 }
  0x38   : > { %v3030_v2 = vcombine.low %v589_v45, %v599_v60  ;;  %v612_v16 = vrot.slane %v610_v56, 5  ;;  %v522_v18 = vrot.slane %v521_v34, 4  ;;  %v616_v20 = vrot.slane %v614_v59, 4 }
  0x39   : > { %v620_v21 = vshll.u32 %v3018_v53, 16  ;;  %v2298_v25 = vrot.slane %v2839_v4, 9  ;;  %v963_v26 = vrot.slane %v2885_v40, 5  ;;  %v517_v27 = vsel %vm2877_vm4, %v512_v10, %v516_v47 }
  0x3a   : > { %2495 = vmatprep.mubr.msk.bf16.mxu1 %vm650_vm3, %v3030_v2  ;;  %v607_v31 = vor.u32 %v606_v12, %v603_v1  ;;  %v953_v36 = vrot.slane %v2842_v5, 5  ;;  %v527_v37 = vsel %vm2877_vm4, %v522_v18, %v526_v0  ;;  %v617_v39 = vor.u32 %v616_v20, %v612_v16 }
  0x3b   : > { %v622_v41 = vrot.slane %v620_v21, 5  ;;  %v2299_v45 = vrot.slane %v2870_v28, 9  ;;  %v3056_v46 = vcombine.low %v517_v27, %v527_v37  ;;  %v2282_v49 = vcombine.low %v2839_v4, %v2842_v5 }
  0x3c   : > { %v608_v40 = vrot.slane %v607_v31, 4  ;;  %v954_v15 = vsel %vm3041_vm7, %v2298_v25, %v953_v36  ;;  %v955_v48 = vrot.slane %v953_v36, 4  ;;  %v618_v47 = vrot.slane %v617_v39, 4 }
  0x3d   : > { %v961_v50 = vsel %vm3041_vm7, %v2299_v45, %v960_v61  ;;  %v962_v51 = vrot.slane %v960_v61, 4  ;;  %2488 = vmatmul.mubr.msk.bf16.gmra.mxu0 %vm650_vm3, %v3056_v46  ;;  %v2300_v5 = vrot.slane %v2914_v3, 9  ;;  %v967_v56 = vrot.slane %v2923_v19, 5 }
  0x3e   : > { %v613_v55 = vsel %vm2877_vm4, %v608_v40, %v612_v16  ;;  %v957_v4 = vsel %vm3041_vm7, %v955_v48, %v956_v58  ;;  %v623_v59 = vsel %vm2877_vm4, %v618_v47, %v622_v41  ;;  %v970_v34 = vrot.slane %v2930_v23, 5  ;;  %v3133_v41 = vld [vmem:[%s3666_s3 + $0xc] sm:$0x3] }
  0x3f   : > { %v2307_v61 = vcombine.low %v954_v15, %v957_v4  ;;  %v964_v60 = vsel %vm3041_vm7, %v962_v51, %v963_v26  ;;  %v3090_v0 = vcombine.low %v613_v55, %v623_v59  ;;  %v968_v6 = vsel %vm3041_vm7, %v2300_v5, %v967_v56  ;;  %v424_v51 = vld [vmem:[%s368_s12 + $0x8] sm:$0x1] }
  0x40   : > { %v969_v58 = vrot.slane %v967_v56, 4  ;;  %v984_v1 = vrot.slane %v2859_v14, 5  ;;  %v2301_v10 = vrot.slane %v2964_v63, 9  ;;  %v974_v12 = vrot.slane %v2975_v8, 5 }
  0x41   : > { %2519 = vmatprep.mubr.msk.bf16.mxu0 %vm650_vm3, %v2307_v61  ;;  %v977_v16 = vrot.slane %v2988_v22, 5  ;;  %2496 = vmatmul.mubr.msk.bf16.gmra.mxu1 %vm650_vm3, %v3090_v0  ;;  %v3102_v23 = vcombine.low %v961_v50, %v964_v60  ;;  %v2302_v14 = vrot.slane %v2852_v11, 9  ;;  %v981_v20 = vrot.slane %v2856_v13, 5 }
  0x42   : > { %v971_v18 = vsel %vm3041_vm7, %v969_v58, %v970_v34  ;;  %2501 = vmatprep.mubr.msk.bf16.mxu1 %vm650_vm3, %v2282_v49  ;;  %v976_v25 = vrot.slane %v974_v12, 4  ;;  %v1332_v22 = vsel %vm675_vm0, %v2945_v38, 0  ;;  %v2303_v27 = vrot.slane %v2896_v52, 9  ;;  %v3152_v49 = vld [vmem:[%s368_s12] sm:$0xf] }
  0x43   : > { %v3109_v21 = vcombine.low %v968_v6, %v971_v18  ;;  %v983_v26 = vrot.slane %v981_v20, 4  ;;  %v988_v31 = vrot.slane %v2900_v57, 5  ;;  %v3123_v36 = vcombine.low %v2870_v28, %v2873_v29 }
  0x44   : > { %v975_v37 = vsel %vm3041_vm7, %v2301_v10, %v974_v12  ;;  %v978_v38 = vsel %vm3041_vm7, %v976_v25, %v977_v16  ;;  %v991_v39 = vrot.slane %v2908_v62, 5  ;;  %v982_v28 = vsel %vm3041_vm7, %v2302_v14, %v981_v20  ;;  %v3206_v25 = vld [vmem:[%s382_s26] sm:$0xf] }
  0x45   : > { %2520 = vmatmul.mubr.msk.bf16.vlgmr.msra.gmra.mxu0 %vm650_vm3, %v3102_v23  ;;  %v985_v29 = vsel %vm3041_vm7, %v983_v26, %v984_v1  ;;  %v990_v45 = vrot.slane %v988_v31, 4  ;;  %v2304_v40 = vrot.slane %v2937_v32, 9  ;;  %v1184_v62 = vsel %vm675_vm0, %v2983_v17, 0 }
  0x46   : > { %2554 = vmatpush3.bf16.msra.mxu0 %v1332_v22  ;;  %v3146_v15 = vcombine.low %v2914_v3, %v2923_v19  ;;  %2523 = vmatprep.mubr.msk.bf16.mxu0 %vm650_vm3, %v3109_v21  ;;  %v995_v48 = vrot.slane %v2950_v44, 5  ;;  %v998_v47 = vrot.slane %v2958_v54, 5  ;;  %v3157_v50 = vcombine.low %v2964_v63, %v2975_v8  ;;  %v3169_v54 = vld [vmem:[%s368_s12 + $0x4] sm:$0xf] }
  0x47   : > { %v3159_v17 = vcombine.low %v975_v37, %v978_v38  ;;  %v3163_v3 = vcombine.low %v2852_v11, %v2856_v13  ;;  %v989_v19 = vsel %vm3041_vm7, %v2303_v27, %v988_v31  ;;  %2652 = vmatprep.subr.msk.bf16.mxu0 %vm675_vm0, %v3133_v41  ;;  %v3171_v55 = vcombine.low %v982_v28, %v985_v29  ;;  %v3179_v11 = vld [vmem:[%s3666_s3 + $0xa] sm:$0x3]  ;;  %v3212_v31 = vld [vmem:[%s382_s26 + $0x4] sm:$0xf]  ;;  %v427_v29 = vld [vmem:[%s382_s26 + $0x8] sm:$0x1] }
  0x48   : > { %v992_v63 = vsel %vm3041_vm7, %v990_v45, %v991_v39  ;;  %v997_v8 = vrot.slane %v995_v48, 4  ;;  %v1002_v4 = vrot.slane %v3004_v42, 5  ;;  %v996_v13 = vsel %vm3041_vm7, %v2304_v40, %v995_v48 }
  0x49   : > { %2502 = vmatmul.mubr.msk.bf16.vlgmr.msra.gmra.mxu1 %vm650_vm3, %v3123_v36  ;;  %v2305_v5 = vrot.slane %v2997_v35, 9  ;;  %v1300_v56 = vshrl.u32 %v3152_v49, 16  ;;  %v1303_v59 = vshll.u32 %v3152_v49, 16  ;;  %v1313_v60 = vshrl.u32 %v3169_v54, 16 }
  0x4a   : > { %2536 = vmatpush3.bf16.msra.mxu1 %v1184_v62  ;;  %2505 = vmatprep.mubr.msk.bf16.mxu1 %vm650_vm3, %v3146_v15  ;;  %v999_v61 = vsel %vm3041_vm7, %v997_v8, %v998_v47  ;;  %v1309_v34 = vshll.u32 %v3169_v54, 16  ;;  %v1319_v6 = vshll.u32 %v424_v51, 16  ;;  %v3197_v58 = vcombine.low %v989_v19, %v992_v63 }
  0x4b   : > { %v1005_v1 = vrot.slane %v3018_v53, 5  ;;  %2651 = vmatprep.subr.msk.bf16.mxu1 %vm675_vm0, %v3179_v11  ;;  %v1302_v10 = vrot.slane %v1300_v56, 4  ;;  %v1305_v12 = vrot.slane %v1303_v59, 5  ;;  %v3202_v16 = vcombine.low %v996_v13, %v999_v61 }
  0x4c   : > { %v1004_v18 = vrot.slane %v1002_v4, 4  ;;  %v1311_v14 = vrot.slane %v1309_v34, 5  ;;  %v1315_v20 = vrot.slane %v1313_v60, 4  ;;  %v2343_v53 = vrot.slane %v3152_v49, 9 }
  0x4d   : > { %2524 = vmatmul.mubr.msk.bf16.gmra.mxu0 %vm650_vm3, %v3159_v17  ;;  %v1306_v22 = vor.u32 %v1305_v12, %v1302_v10  ;;  %v1450_v26 = vrot.slane %v3169_v54, 5  ;;  %v1453_v27 = vrot.slane %v424_v51, 5  ;;  %v1321_v38 = vrot.slane %v1319_v6, 5 }
  0x4e   : > { %2527 = vmatprep.mubr.msk.bf16.mxu0 %vm650_vm3, %v3171_v55  ;;  %v1316_v37 = vor.u32 %v1315_v20, %v1311_v14  ;;  %v1706_v39 = vshrl.u32 %v3206_v25, 16  ;;  %v1709_v28 = vshll.u32 %v3206_v25, 16  ;;  %v1719_v48 = vshrl.u32 %v3212_v31, 16 }
  0x4f   : > { %v1307_v45 = vrot.slane %v1306_v22, 4  ;;  %v1451_v40 = vsel %vm3041_vm7, %v2343_v53, %v1450_v26  ;;  %v1452_v62 = vrot.slane %v1450_v26, 4  ;;  %v1715_v63 = vshll.u32 %v3212_v31, 16 }
  0x50   : > { %v1317_v47 = vrot.slane %v1316_v37, 4  ;;  %v1708_v19 = vrot.slane %v1706_v39, 4  ;;  %v1711_v51 = vrot.slane %v1709_v28, 5  ;;  %v1721_v56 = vrot.slane %v1719_v48, 4 }
  0x51   : > { %2506 = vmatmul.mubr.msk.bf16.gmra.mxu1 %vm650_vm3, %v3157_v50  ;;  %v1312_v8 = vsel %vm2877_vm4, %v1307_v45, %v1311_v14  ;;  %v1454_v13 = vsel %vm3041_vm7, %v1452_v62, %v1453_v27  ;;  %v1725_v59 = vshll.u32 %v427_v29, 16  ;;  %v1717_v6 = vrot.slane %v1715_v63, 5 }
  0x52   : > { %2509 = vmatprep.mubr.msk.bf16.mxu1 %vm650_vm3, %v3163_v3  ;;  %v1322_v61 = vsel %vm2877_vm4, %v1317_v47, %v1321_v38  ;;  %v3232_v60 = vcombine.low %v1451_v40, %v1454_v13  ;;  %v1712_v34 = vor.u32 %v1711_v51, %v1708_v19  ;;  %v2374_v12 = vrot.slane %v3206_v25, 9 }
  0x53   : > { %v3234_v10 = vcombine.low %v1312_v8, %v1322_v61  ;;  %v1856_v14 = vrot.slane %v3212_v31, 5  ;;  %v1722_v22 = vor.u32 %v1721_v56, %v1717_v6  ;;  %v1727_v53 = vrot.slane %v1725_v59, 5 }
  0x54   : > { %v1713_v20 = vrot.slane %v1712_v34, 4  ;;  %v1859_v26 = vrot.slane %v427_v29, 5  ;;  %v2287_v27 = vcombine.low %v2896_v52, %v2900_v57  ;;  %v2288_v37 = vcombine.low %v2937_v32, %v2950_v44 }
  0x55   : > { %2528 = vmatmul.mubr.msk.bf16.gmra.mxu0 %vm650_vm3, %v3197_v58  ;;  %v3246_v38 = vsel %vm3041_vm7, %v2374_v12, %v1856_v14  ;;  %v1858_v39 = vrot.slane %v1856_v14, 4  ;;  %v1003_v52 = vsel %vm3041_vm7, %v2305_v5, %v1002_v4  ;;  %v1006_v57 = vsel %vm3041_vm7, %v1004_v18, %v1005_v1 }
  0x56   : > { %2531 = vmatprep.mubr.msk.bf16.mxu0 %vm650_vm3, %v3202_v16  ;;  %v1718_v32 = vsel %vm2877_vm4, %v1713_v20, %v1717_v6  ;;  %v1723_v44 = vrot.slane %v1722_v22, 4  ;;  %v2314_v4 = vcombine.low %v1003_v52, %v1006_v57  ;;  %v2289_v1 = vcombine.low %v2997_v35, %v3004_v42  ;;  %v2364_v35 = vld [vmem:[%s3666_s3 + $0xe] sm:$0x3] }
  0x57   : > { %v3262_v28 = vsel %vm3041_vm7, %v1858_v39, %v1859_v26  ;;  %v1590_v30 = vsel %vm675_vm0, %v3133_v41, 0  ;;  %v2324_v42 = vcombine.low %v3152_v49, %v3169_v54  ;;  %v1738_v41 = vsel %vm675_vm0, %v2364_v35, 0 }
  0x58   : > { %v1728_v29 = vsel %vm2877_vm4, %v1723_v44, %v1727_v53  ;;  %v2376_v45 = vcombine.low %v3246_v38, %v3262_v28 }
  0x59   : > { %2510 = vmatmul.mubr.msk.bf16.gmra.mxu1 %vm650_vm3, %v2287_v27  ;;  %v3269_v5 = vcombine.low %v1718_v32, %v1728_v29 }
  0x5a   : > { %2513 = vmatprep.mubr.msk.bf16.mxu1 %vm650_vm3, %v2288_v37 }
  0x5d   : > { %2532 = vmatmul.mubr.msk.bf16.gmra.mxu0 %vm650_vm3, %v2314_v4 }
  0x5e   : > { %2555 = vmatprep.mubr.msk.bf16.mxu0 %vm650_vm3, %v2939_v33  ;;  %v1464_v33 = vsel %vm675_vm0, %v3179_v11, 0 }
  0x61   : > { %2514 = vmatmul.mubr.msk.bf16.gmra.mxu1 %vm650_vm3, %v2289_v1 }
  0x62   : > { %2537 = vmatprep.mubr.msk.bf16.mxu1 %vm650_vm3, %v3123_v36  ;;  %v1870_v36 = vsel %vm675_vm0, %v2375_v24, 0 }
  0x65   : > { %2556 = vmatmul.mubr.msk.bf16.vlgmr.msra.gmra.mxu0 %vm650_vm3, %v3006_v43 }
  0x66   : > { %2590 = vmatpush3.bf16.msra.mxu0 %v1590_v30  ;;  %2559 = vmatprep.mubr.msk.bf16.mxu0 %vm650_vm3, %v3056_v46 }
  0x67   : > { %2654 = vmatprep.subr.msk.bf16.mxu0 %vm675_vm0, %v2375_v24 }
  0x69   : > { %2538 = vmatmul.mubr.msk.bf16.vlgmr.msra.gmra.mxu1 %vm650_vm3, %v3146_v15 }
  0x6a   : > { %2572 = vmatpush3.bf16.msra.mxu1 %v1464_v33  ;;  %2541 = vmatprep.mubr.msk.bf16.mxu1 %vm650_vm3, %v3157_v50 }
  0x6b   : > { %2653 = vmatprep.subr.msk.bf16.mxu1 %vm675_vm0, %v2364_v35 }
  0x6d   : > { %2560 = vmatmul.mubr.msk.bf16.gmra.mxu0 %vm650_vm3, %v2916_v7 }
  0x6e   : > { %2563 = vmatprep.mubr.msk.bf16.mxu0 %vm650_vm3, %v2977_v9 }
  0x71   : > { %2542 = vmatmul.mubr.msk.bf16.gmra.mxu1 %vm650_vm3, %v3163_v3 }
  0x72   : > { %2545 = vmatprep.mubr.msk.bf16.mxu1 %vm650_vm3, %v2287_v27 }
  0x75   : > { %2564 = vmatmul.mubr.msk.bf16.gmra.mxu0 %vm650_vm3, %v3030_v2 }
  0x76   : > { %2567 = vmatprep.mubr.msk.bf16.mxu0 %vm650_vm3, %v3090_v0 }
  0x79   : > { %2546 = vmatmul.mubr.msk.bf16.gmra.mxu1 %vm650_vm3, %v2288_v37 }
  0x7a   : > { %2549 = vmatprep.mubr.msk.bf16.mxu1 %vm650_vm3, %v2289_v1 }
  0x7d   : > { %2568 = vmatmul.mubr.msk.bf16.gmra.mxu0 %vm650_vm3, %v3234_v10 }
  0x7e   : > { %2591 = vmatprep.mubr.msk.bf16.mxu0 %vm650_vm3, %v3146_v15 }
  0x81   : > { %2550 = vmatmul.mubr.msk.bf16.gmra.mxu1 %vm650_vm3, %v2324_v42 }
  0x82   : > { %2573 = vmatprep.mubr.msk.bf16.mxu1 %vm650_vm3, %v3102_v23  ;;  %v2355_v23 = vcombine.low %v3206_v25, %v3212_v31 }
  0x85   : > { %2592 = vmatmul.mubr.msk.bf16.vlgmr.msra.gmra.mxu0 %vm650_vm3, %v3157_v50 }
  0x86   : > { %2626 = vmatpush3.bf16.msra.mxu0 %v1870_v36  ;;  %2595 = vmatprep.mubr.msk.bf16.mxu0 %vm650_vm3, %v3163_v3 }
  0x89   : > { %2574 = vmatmul.mubr.msk.bf16.vlgmr.msra.gmra.mxu1 %vm650_vm3, %v3109_v21 }
  0x8a   : > { %2608 = vmatpush3.bf16.msra.mxu1 %v1738_v41  ;;  %2577 = vmatprep.mubr.msk.bf16.mxu1 %vm650_vm3, %v3159_v17 }
  0x8d   : > { %2596 = vmatmul.mubr.msk.bf16.gmra.mxu0 %vm650_vm3, %v2287_v27 }
  0x8e   : > { %2599 = vmatprep.mubr.msk.bf16.mxu0 %vm650_vm3, %v2288_v37 }
  0x91   : > { %2578 = vmatmul.mubr.msk.bf16.gmra.mxu1 %vm650_vm3, %v3171_v55 }
  0x92   : > { %2581 = vmatprep.mubr.msk.bf16.mxu1 %vm650_vm3, %v3197_v58 }
  0x95   : > { %2600 = vmatmul.mubr.msk.bf16.gmra.mxu0 %vm650_vm3, %v2289_v1 }
  0x96   : > { %2603 = vmatprep.mubr.msk.bf16.mxu0 %vm650_vm3, %v2324_v42 }
  0x99   : > { %2582 = vmatmul.mubr.msk.bf16.gmra.mxu1 %vm650_vm3, %v3202_v16 }
  0x9a   : > { %2585 = vmatprep.mubr.msk.bf16.mxu1 %vm650_vm3, %v2314_v4 }
  0x9d   : > { %2604 = vmatmul.mubr.msk.bf16.gmra.mxu0 %vm650_vm3, %v2355_v23 }
  0x9e   : > { %2627 = vmatprep.mubr.msk.bf16.mxu0 %vm650_vm3, %v3109_v21 }
  0xa1   : > { %2586 = vmatmul.mubr.msk.bf16.gmra.mxu1 %vm650_vm3, %v3232_v60 }
  0xa2   : > { %2609 = vmatprep.mubr.msk.bf16.mxu1 %vm650_vm3, %v3006_v43 }
  0xa5   : > { %2628 = vmatmul.mubr.msk.bf16.vlgmr.msra.gmra.mxu0 %vm650_vm3, %v3159_v17 }
  0xa6   : > { %2631 = vmatprep.mubr.msk.bf16.mxu0 %vm650_vm3, %v3171_v55 }
  0xa9   : > { %2610 = vmatmul.mubr.msk.bf16.vlgmr.msra.gmra.mxu1 %vm650_vm3, %v3056_v46 }
  0xaa   : > { %2613 = vmatprep.mubr.msk.bf16.mxu1 %vm650_vm3, %v2916_v7 }
  0xad   : > { %2632 = vmatmul.mubr.msk.bf16.gmra.mxu0 %vm650_vm3, %v3197_v58 }
  0xae   : > { %2635 = vmatprep.mubr.msk.bf16.mxu0 %vm650_vm3, %v3202_v16 }
  0xb1   : > { %2614 = vmatmul.mubr.msk.bf16.gmra.mxu1 %vm650_vm3, %v2977_v9 }
  0xb2   : > { %2617 = vmatprep.mubr.msk.bf16.mxu1 %vm650_vm3, %v3030_v2 }
  0xb5   : > { %2636 = vmatmul.mubr.msk.bf16.gmra.mxu0 %vm650_vm3, %v2314_v4 }
  0xb6   : > { %2639 = vmatprep.mubr.msk.bf16.mxu0 %vm650_vm3, %v3232_v60 }
  0xb9   : > { %2618 = vmatmul.mubr.msk.bf16.gmra.mxu1 %vm650_vm3, %v3090_v0 }
  0xba   : > { %2621 = vmatprep.mubr.msk.bf16.mxu1 %vm650_vm3, %v3234_v10 }
  0xbd   : > { %2640 = vmatmul.mubr.msk.bf16.gmra.mxu0 %vm650_vm3, %v2376_v45 }
  0xc1   : > { %2622 = vmatmul.mubr.msk.bf16.gmra.mxu1 %vm650_vm3, %v3269_v5 }
  0xec   : > { %v2485_v7 = vpop.f32.mrf.mxu0 }
  0xee   : > { %v713_v43 = vpop.f32.mrf.mxu0 }
  0xf0   : > { %v2486_v46 = vpop.f32.mrf.mxu0 }
  0xf1   : > { %v2493_v9 = vpop.f32.mrf.mxu1 }
  0xf2   : > { %v716_v15 = vpop.f32.mrf.mxu0 }
  0xf3   : > { %v745_v2 = vpop.f32.mrf.mxu1 }
  0xf5   : > { %v2494_v21 = vpop.f32.mrf.mxu1 }
  0xf7   : > { %v748_v49 = vpop.f32.mrf.mxu1 }
  0xfd   : > { %v2489_v0 = vpop.f32.mrf.mxu0 }
  0xff   : > { %v729_v50 = vpop.f32.mrf.mxu0 }
 0x101   : > { %v2497_v17 = vpop.f32.mrf.mxu1  ;;  %v2490_v3 = vpop.f32.mrf.mxu0 }
 0x103   : > { %v761_v54 = vpop.f32.mrf.mxu1  ;;  %v732_v55 = vpop.f32.mrf.mxu0 }
 0x105   : > { %v2498_v11 = vpop.f32.mrf.mxu1  ;;  %v2521_v58 = vpop.f32.mrf.mxu0 }
 0x107   : > { %v3381_v16 = vpop.f32.mrf.mxu1  ;;  %v1094_v18 = vpop.f32.mrf.mxu0 }
 0x109   : > { %v2503_v25 = vpop.f32.mrf.mxu1  ;;  %v2522_v31 = vpop.f32.mrf.mxu0 }
 0x10a   : > { %v886_v40 = vadd.f32 %v2503_v25, %v2485_v7 }
 0x10b   : > { %v877_v62 = vpop.f32.mrf.mxu1  ;;  %v1097_v48 = vpop.f32.mrf.mxu0 }
 0x10c   : > { %v3383_v47 = vadd.f32 %v2521_v58, %v886_v40  ;;  %v878_v19 = vadd.f32 %v877_v62, %v713_v43 }
 0x10d   : > { %v2504_v51 = vpop.f32.mrf.mxu1  ;;  %v2525_v63 = vpop.f32.mrf.mxu0 }
 0x10e   : > { %v3385_v8 = vadd.f32 %v1094_v18, %v878_v19  ;;  %v889_v13 = vadd.f32 %v2504_v51, %v2486_v46 }
 0x10f   : > { %v880_v56 = vpop.f32.mrf.mxu1  ;;  %v1110_v59 = vpop.f32.mrf.mxu0 }
 0x110   : > { %v3387_v61 = vadd.f32 %v2522_v31, %v889_v13  ;;  %v881_v60 = vadd.f32 %v880_v56, %v716_v15 }
 0x111   : > { %v2507_v34 = vpop.f32.mrf.mxu1  ;;  %v2526_v6 = vpop.f32.mrf.mxu0 }
 0x112   : > { %v3389_v10 = vadd.f32 %v1097_v48, %v881_v60  ;;  %v902_v12 = vadd.f32 %v2507_v34, %v2489_v0 }
 0x113   : > { %v893_v14 = vpop.f32.mrf.mxu1  ;;  %v1113_v20 = vpop.f32.mrf.mxu0 }
 0x114   : > { %v3391_v22 = vadd.f32 %v2525_v63, %v902_v12  ;;  %v894_v53 = vadd.f32 %v893_v14, %v729_v50 }
 0x115   : > { %v2508_v26 = vpop.f32.mrf.mxu1  ;;  %v2529_v27 = vpop.f32.mrf.mxu0 }
 0x116   : > { %v3393_v37 = vadd.f32 %v1110_v59, %v894_v53  ;;  %v905_v38 = vadd.f32 %v2508_v26, %v2490_v3 }
 0x117   : > { %v896_v39 = vpop.f32.mrf.mxu1  ;;  %v1126_v52 = vpop.f32.mrf.mxu0 }
 0x118   : > { %v3395_v57 = vadd.f32 %v2526_v6, %v905_v38  ;;  %v897_v32 = vadd.f32 %v896_v39, %v732_v55 }
 0x119   : > { %v2511_v44 = vpop.f32.mrf.mxu1  ;;  %v2530_v28 = vpop.f32.mrf.mxu0 }
 0x11a   : > { %v3397_v29 = vadd.f32 %v1113_v20, %v897_v32  ;;  %v918_v45 = vadd.f32 %v2511_v44, %v2493_v9 }
 0x11b   : > { %v909_v4 = vpop.f32.mrf.mxu1  ;;  %v1129_v5 = vpop.f32.mrf.mxu0 }
 0x11c   : > { %v3399_v1 = vadd.f32 %v2529_v27, %v918_v45  ;;  %v910_v30 = vadd.f32 %v909_v4, %v745_v2 }
 0x11d   : > { %v2512_v24 = vpop.f32.mrf.mxu1  ;;  %v2533_v33 = vpop.f32.mrf.mxu0 }
 0x11e   : > { %v3401_v35 = vadd.f32 %v1126_v52, %v910_v30  ;;  %v921_v42 = vadd.f32 %v2512_v24, %v2494_v21 }
 0x11f   : > { %v912_v36 = vpop.f32.mrf.mxu1  ;;  %v1142_v41 = vpop.f32.mrf.mxu0 }
 0x120   : > { %v3403_v23 = vadd.f32 %v2530_v28, %v921_v42  ;;  %v913_v7 = vadd.f32 %v912_v36, %v748_v49 }
 0x121   : > { %v2515_v43 = vpop.f32.mrf.mxu1  ;;  %v2534_v46 = vpop.f32.mrf.mxu0 }
 0x122   : > { %v3405_v15 = vadd.f32 %v1129_v5, %v913_v7  ;;  %v934_v9 = vadd.f32 %v2515_v43, %v2497_v17 }
 0x123   : > { %v925_v0 = vpop.f32.mrf.mxu1  ;;  %v1145_v50 = vpop.f32.mrf.mxu0 }
 0x124   : > { %v3407_v3 = vadd.f32 %v2533_v33, %v934_v9  ;;  %v926_v2 = vadd.f32 %v925_v0, %v761_v54 }
 0x125   : > { %v2516_v55 = vpop.f32.mrf.mxu1  ;;  %v3409_v58 = vpop.f32.mrf.mxu0 }
 0x126   : > { %v3411_v18 = vadd.f32 %v1142_v41, %v926_v2  ;;  %v937_v21 = vadd.f32 %v2516_v55, %v2498_v11 }
 0x127   : > { %v928_v25 = vpop.f32.mrf.mxu1  ;;  %v3413_v31 = vpop.f32.mrf.mxu0 }
 0x128   : > { %v3415_v49 = vadd.f32 %v2534_v46, %v937_v21  ;;  %v929_v40 = vadd.f32 %v928_v25, %v3381_v16 }
 0x129   : > { %v2539_v62 = vpop.f32.mrf.mxu1  ;;  %v3418_v17 = vpop.f32.mrf.mxu0 }
 0x12a   : > { %v3420_v48 = vadd.f32 %v1145_v50, %v929_v40 }
 0x12b   : > { %v1220_v19 = vpop.f32.mrf.mxu1  ;;  %v3422_v54 = vpop.f32.mrf.mxu0 }
 0x12d   : > { %v2540_v51 = vpop.f32.mrf.mxu1  ;;  %v3424_v63 = vpop.f32.mrf.mxu0 }
 0x12f   : > { %v1223_v13 = vpop.f32.mrf.mxu1  ;;  %v3426_v11 = vpop.f32.mrf.mxu0 }
 0x131   : > { %v2543_v56 = vpop.f32.mrf.mxu1  ;;  %v3428_v59 = vpop.f32.mrf.mxu0 }
 0x133   : > { %v1236_v60 = vpop.f32.mrf.mxu1  ;;  %v3430_v34 = vpop.f32.mrf.mxu0 }
 0x135   : > { %v2544_v16 = vpop.f32.mrf.mxu1  ;;  %v3432_v6 = vpop.f32.mrf.mxu0 }
 0x137   : > { %v1239_v12 = vpop.f32.mrf.mxu1  ;;  %v3434_v14 = vpop.f32.mrf.mxu0 }
 0x139   : > { %v2547_v20 = vpop.f32.mrf.mxu1  ;;  %v3436_v53 = vpop.f32.mrf.mxu0 }
 0x13b   : > { %v1252_v26 = vpop.f32.mrf.mxu1  ;;  %v3438_v27 = vpop.f32.mrf.mxu0 }
 0x13d   : > { %v2548_v38 = vpop.f32.mrf.mxu1  ;;  %v3440_v39 = vpop.f32.mrf.mxu0 }
 0x13f   : > { %v1255_v52 = vpop.f32.mrf.mxu1  ;;  %v3442_v32 = vpop.f32.mrf.mxu0 }
 0x140   : > { %3674 = vst [vmem:[#allocation2_spill] sm:$0xff] %v3442_v32 }
 0x141   : > { %v2551_v44 = vpop.f32.mrf.mxu1  ;;  %v3444_v28 = vpop.f32.mrf.mxu0 }
 0x142   : > { %3675 = vst [vmem:[#allocation3_spill] sm:$0xff] %v3444_v28 }
 0x143   : > { %v1268_v45 = vpop.f32.mrf.mxu1  ;;  %v3446_v4 = vpop.f32.mrf.mxu0 }
 0x144   : > { %3676 = vst [vmem:[#allocation4_spill] sm:$0xff] %v3446_v4 }
 0x145   : > { %v2552_v5 = vpop.f32.mrf.mxu1  ;;  %v3448_v30 = vpop.f32.mrf.mxu0 }
 0x147   : > { %v1271_v24 = vpop.f32.mrf.mxu1  ;;  %v3450_v33 = vpop.f32.mrf.mxu0 }
 0x148   : > { %3677 = vst [vmem:[#allocation5_spill] sm:$0xff] %v3450_v33 }
 0x149   : > { %v2575_v42 = vpop.f32.mrf.mxu1  ;;  %v3452_v36 = vpop.f32.mrf.mxu0 }
 0x14a   : > { %3678 = vst [vmem:[#allocation6_spill] sm:$0xff] %v3452_v36 }
 0x14b   : > { %v1500_v41 = vpop.f32.mrf.mxu1  ;;  %v3454_v7 = vpop.f32.mrf.mxu0 }
 0x14c   : > { %3679 = vst [vmem:[#allocation7_spill] sm:$0xff] %v3454_v7 }
 0x14d   : > { %v2576_v43 = vpop.f32.mrf.mxu1  ;;  %v3456_v46 = vpop.f32.mrf.mxu0 }
 0x14e   : > { %3680 = vst [vmem:[#allocation8_spill] sm:$0xff] %v3456_v46 }
 0x14f   : > { %v1503_v9 = vpop.f32.mrf.mxu1  ;;  %v3458_v0 = vpop.f32.mrf.mxu0 }
 0x150   : > { %3681 = vst [vmem:[#allocation9_spill] sm:$0xff] %v3458_v0 }
 0x151   : > { %v2579_v50 = vpop.f32.mrf.mxu1  ;;  %v3460_v2 = vpop.f32.mrf.mxu0 }
 0x152   : > { %3682 = vst [vmem:[#allocation10_spill] sm:$0xff] %v3460_v2 }
 0x153   : > { %v1516_v55 = vpop.f32.mrf.mxu1  ;;  %v3462_v21 = vpop.f32.mrf.mxu0 }
 0x154   : > { %3683 = vst [vmem:[#allocation11_spill] sm:$0xff] %v3462_v21  ;;  %v1285_v21 = vadd.f32 %v2539_v62, %v3383_v47  ;;  %v1288_v62 = vadd.f32 %v1239_v12, %v3397_v29 }
 0x155   : > { %v2580_v25 = vpop.f32.mrf.mxu1  ;;  %v3464_v40 = vpop.f32.mrf.mxu0 }
 0x156   : > { %3684 = vst [vmem:[#allocation12_spill] sm:$0xff] %v3464_v40  ;;  %v1283_v40 = vadd.f32 %v1220_v19, %v3385_v8  ;;  %v1433_v47 = vadd.f32 %v3409_v58, %v1285_v21  ;;  %v1290_v8 = vadd.f32 %v2544_v16, %v3395_v57  ;;  %v1294_v58 = vadd.f32 %v2548_v38, %v3403_v23 }
 0x157   : > { %v3466_v4 = vpop.f32.mrf.mxu1  ;;  %v3468_v36 = vpop.f32.mrf.mxu0 }
 0x158   : > { %3685 = vst [vmem:[#allocation13_spill] sm:$0xff] %v3466_v4  ;;  %3686 = vst [vmem:[#allocation14_spill] sm:$0xff] %v3468_v36  ;;  %v1286_v36 = vadd.f32 %v2540_v51, %v3387_v61  ;;  %v1431_v19 = vadd.f32 %v3413_v31, %v1283_v40  ;;  %v1293_v61 = vadd.f32 %v2547_v20, %v3399_v1 }
 0x159   : > { %v3470_v7 = vpop.f32.mrf.mxu1  ;;  %v3472_v28 = vpop.f32.mrf.mxu0  ;;  %v1565_v57 = vadd.f32 %v2575_v42, %v1433_v47  ;;  %v1292_v1 = vadd.f32 %v1255_v52, %v3405_v15  ;;  %v1438_v16 = vadd.f32 %v3428_v59, %v1290_v8  ;;  %v1296_v15 = vadd.f32 %v1271_v24, %v3420_v48  ;;  %v3692_v48 = vld [vmem:[#allocation2_spill] sm:$0xff] }
 0x15a   : > { %3687 = vst [vmem:[#allocation15_spill] sm:$0xff] %v3470_v7  ;;  %3688 = vst [vmem:[#allocation16_spill] sm:$0xff] %v3472_v28  ;;  %v1284_v28 = vadd.f32 %v1223_v13, %v3389_v10  ;;  %v1291_v10 = vadd.f32 %v1252_v26, %v3401_v35  ;;  %v1297_v35 = vadd.f32 %v2551_v44, %v3407_v3 }
 0x15b   : > { %v3474_v46 = vpop.f32.mrf.mxu1  ;;  %v3476_v0 = vpop.f32.mrf.mxu0  ;;  %v1563_v12 = vadd.f32 %v1500_v41, %v1431_v19  ;;  %v1441_v23 = vadd.f32 %v3432_v6, %v1293_v61  ;;  %v1442_v59 = vadd.f32 %v3436_v53, %v1294_v58  ;;  %v1440_v38 = vadd.f32 %v3438_v27, %v1292_v1  ;;  %v3694_v53 = vld [vmem:[#allocation3_spill] sm:$0xff]  ;;  %v3701_v61 = vld [vmem:[#allocation9_spill] sm:$0xff]  ;;  %v3704_v1 = vld [vmem:[#allocation10_spill] sm:$0xff] }
 0x15c   : > { %3689 = vst [vmem:[#allocation17_spill] sm:$0xff] %v3474_v46  ;;  %3690 = vst [vmem:[#allocation18_spill] sm:$0xff] %v3476_v0  ;;  %v1289_v46 = vadd.f32 %v2543_v56, %v3391_v22  ;;  %v1287_v0 = vadd.f32 %v1236_v60, %v3393_v37  ;;  %v1434_v37 = vadd.f32 %v3418_v17, %v1286_v36  ;;  %v3695_v36 = vld [vmem:[#allocation4_spill] sm:$0xff] }
 0x15d   : > { %v3478_v33 = vpop.f32.mrf.mxu1  ;;  %v3480_v2 = vpop.f32.mrf.mxu0  ;;  %v1432_v13 = vadd.f32 %v3422_v54, %v1284_v28  ;;  %v1436_v17 = vadd.f32 %v3430_v34, %v1288_v62  ;;  %v1295_v54 = vadd.f32 %v1268_v45, %v3411_v18  ;;  %v1691_v34 = vadd.f32 %v3448_v30, %v1565_v57  ;;  %v3693_v45 = vld [vmem:[#allocation5_spill] sm:$0xff]  ;;  %v3700_v62 = vld [vmem:[#allocation8_spill] sm:$0xff] }
 0x15e   : > { %3691 = vst [vmem:[#allocation19_spill] sm:$0xff] %v3478_v33  ;;  %v1437_v29 = vadd.f32 %v3424_v63, %v1289_v46  ;;  %v1435_v31 = vadd.f32 %v3426_v11, %v1287_v0  ;;  %v1439_v63 = vadd.f32 %v3434_v14, %v1291_v10  ;;  %v1298_v11 = vadd.f32 %v2552_v5, %v3415_v49 }
 0x15f   : > { %v3484_v32 = vpop.f32.mrf.mxu1  ;;  %v3486_v4 = vpop.f32.mrf.mxu0  ;;  %v1566_v18 = vadd.f32 %v2576_v43, %v1434_v37  ;;  %v1564_v26 = vadd.f32 %v1503_v9, %v1432_v13  ;;  %v1445_v6 = vadd.f32 %v3440_v39, %v1297_v35  ;;  %v1443_v28 = vadd.f32 %v3692_v48, %v1295_v54  ;;  %v3696_v27 = vld [vmem:[#allocation13_spill] sm:$0xff]  ;;  %v3543_v9 = vld [vmem:[%s3667_s4] ss:$0 sm:$0xff] }
 0x160   : > { %v1569_v14 = vadd.f32 %v2579_v50, %v1437_v29  ;;  %v1567_v52 = vadd.f32 %v1516_v55, %v1435_v31  ;;  %v1689_v5 = vadd.f32 %v3693_v45, %v1563_v12  ;;  %v1570_v24 = vadd.f32 %v2580_v25, %v1438_v16  ;;  %v3698_v55 = vld [vmem:[#allocation6_spill] sm:$0xff]  ;;  %v3699_v25 = vld [vmem:[#allocation7_spill] sm:$0xff] }
 0x161   : > { %v3492_v7 = vpop.f32.mrf.mxu1  ;;  %v3494_v33 = vpop.f32.mrf.mxu0  ;;  %v1446_v30 = vadd.f32 %v3694_v53, %v1298_v11  ;;  %v1444_v41 = vadd.f32 %v3695_v36, %v1296_v15  ;;  %v1568_v43 = vadd.f32 %v3696_v27, %v1436_v17  ;;  %v3697_v39 = vld [vmem:[#allocation15_spill] sm:$0xff]  ;;  %v1692_v21 = vadd.f32 %v3698_v55, %v1566_v18  ;;  %v3708_v48 = vld [vmem:[#allocation16_spill] sm:$0xff] }
 0x162   : > { %v1573_v46 = vadd.f32 %v3697_v39, %v1441_v23  ;;  %v1690_v40 = vadd.f32 %v3699_v25, %v1564_v26  ;;  %v1695_v19 = vadd.f32 %v3700_v62, %v1569_v14  ;;  %v1693_v10 = vadd.f32 %v3701_v61, %v1567_v52  ;;  %v3706_v23 = vld [vmem:[#allocation12_spill] sm:$0xff] }
 0x163   : > { %v3502_v51 = vpop.f32.mrf.mxu1  ;;  %v3504_v22 = vpop.f32.mrf.mxu0  ;;  %v3702_v37 = vld [vmem:[#allocation17_spill] sm:$0xff]  ;;  %v1696_v35 = vadd.f32 %v3704_v1, %v1570_v24  ;;  %v1572_v15 = vadd.f32 %v3484_v32, %v1440_v38  ;;  %v3709_v53 = vld [vmem:[#allocation18_spill] sm:$0xff] }
 0x164   : > { %v1571_v13 = vadd.f32 %v3702_v37, %v1439_v63  ;;  %v3557_v11 = vadd.f32 %v3706_v23, %v1573_v46  ;;  %v1577_v63 = vadd.f32 %v3492_v7, %v1445_v6 }
 0x165   : > { %v3513_v56 = vpop.f32.mrf.mxu1  ;;  %v2629_v60 = vpop.f32.mrf.mxu0  ;;  %v3703_v58 = vld [vmem:[#allocation19_spill] sm:$0xff]  ;;  %v3574_v36 = vadd.f32 %v3709_v53, %v1572_v15 }
 0x166   : > { %v1574_v57 = vadd.f32 %v3703_v58, %v1442_v59  ;;  %v1578_v32 = vadd.f32 %v3513_v56, %v1446_v30  ;;  %v3577_v27 = vadd.f32 %v3480_v2, %v1577_v63 }
 0x167   : > { %v3523_v3 = vpop.f32.mrf.mxu1  ;;  %v1906_v20 = vpop.f32.mrf.mxu0 }
 0x168   : > { %v3566_v45 = vadd.f32 %v3708_v48, %v1574_v57 }
 0x169   : > { %v2611_v49 = vpop.f32.mrf.mxu1  ;;  %v2630_v44 = vpop.f32.mrf.mxu0 }
 0x16a   : > { %v1839_v42 = vadd.f32 %v2611_v49, %v1691_v34  ;;  %v3707_v49 = vld [vmem:[#allocation14_spill] sm:$0xff] }
 0x16b   : > { %v1774_v0 = vpop.f32.mrf.mxu1  ;;  %v1909_v50 = vpop.f32.mrf.mxu0 }
 0x16c   : > { %v1971_v47 = vadd.f32 %v2629_v60, %v1839_v42  ;;  %v1837_v8 = vadd.f32 %v1774_v0, %v1689_v5  ;;  %v3705_v60 = vld [vmem:[#allocation11_spill] sm:$0xff]  ;;  %v1575_v5 = vadd.f32 %v3502_v51, %v1443_v28  ;;  %v1576_v51 = vadd.f32 %v3523_v3, %v1444_v41 }
 0x16d   : > { %v2612_v29 = vpop.f32.mrf.mxu1  ;;  %v2633_v31 = vpop.f32.mrf.mxu0  ;;  %v1694_v12 = vadd.f32 %v3705_v60, %v1568_v43 }
 0x16e   : > { %v1994_v16 = vadd.f32 %v3543_v9, %v1971_v47  ;;  %v1969_v17 = vadd.f32 %v1906_v20, %v1837_v8  ;;  %v1840_v54 = vadd.f32 %v2612_v29, %v1692_v21  ;;  %v3563_v20 = vadd.f32 %v3707_v49, %v1571_v13 }
 0x16f   : > { %v1777_v59 = vpop.f32.mrf.mxu1  ;;  %v1922_v34 = vpop.f32.mrf.mxu0  ;;  %v3583_v55 = vadd.f32 %v3486_v4, %v1575_v5  ;;  %v3589_v62 = vadd.f32 %v3504_v22, %v1576_v51 }
 0x170   : > { %v2010_v18 = vadd.f32 3.0, %v1994_v16  ;;  %v1992_v26 = vadd.f32 %v3543_v9, %v1969_v17  ;;  %v1972_v14 = vadd.f32 %v2630_v44, %v1840_v54  ;;  %v1838_v52 = vadd.f32 %v1777_v59, %v1690_v40 }
 0x171   : > { %v2615_v7 = vpop.f32.mrf.mxu1  ;;  %v2634_v38 = vpop.f32.mrf.mxu0 }
 0x172   : > { %v2026_v6 = vmax.f32 %v2010_v18, 0.0  ;;  %v2008_v24 = vadd.f32 3.0, %v1992_v26  ;;  %v1995_v44 = vadd.f32 %v3543_v9, %v1972_v14  ;;  %v1970_v42 = vadd.f32 %v1909_v50, %v1838_v52 }
 0x173   : > { %v1843_v28 = vadd.f32 %v2615_v7, %v1695_v19  ;;  %v1790_v56 = vpop.f32.mrf.mxu1  ;;  %v1925_v30 = vpop.f32.mrf.mxu0  ;;  %v3586_v50 = vadd.f32 %v3494_v33, %v1578_v32 }
 0x174   : > { %v2042_v43 = vmin.f32 %v2026_v6, 6.0  ;;  %v2024_v39 = vmax.f32 %v2008_v24, 0.0  ;;  %v2011_v46 = vadd.f32 3.0, %v1995_v44  ;;  %v1993_v0 = vadd.f32 %v3543_v9, %v1970_v42 }
 0x175   : > { %v1975_v21 = vadd.f32 %v2633_v31, %v1843_v28  ;;  %v1841_v2 = vadd.f32 %v1790_v56, %v1693_v10  ;;  %v2616_v25 = vpop.f32.mrf.mxu1  ;;  %v2637_v40 = vpop.f32.mrf.mxu0 }
 0x176   : > { %v2058_v3 = vmul.f32 %v2042_v43, %v1994_v16  ;;  %v2040_v41 = vmin.f32 %v2024_v39, 6.0  ;;  %v2027_v47 = vmax.f32 %v2011_v46, 0.0  ;;  %v2009_v8 = vadd.f32 3.0, %v1993_v0 }
 0x177   : > { %v1998_v4 = vadd.f32 %v3543_v9, %v1975_v21  ;;  %v1973_v33 = vadd.f32 %v1922_v34, %v1841_v2  ;;  %v1844_v19 = vadd.f32 %v2616_v25, %v1696_v35  ;;  %v1793_v61 = vpop.f32.mrf.mxu1  ;;  %v1938_v10 = vpop.f32.mrf.mxu0 }
 0x178   : > { %v2074_v37 = vmul.f32 0.16666667, %v2058_v3  ;;  %v2056_v13 = vmul.f32 %v2040_v41, %v1992_v26  ;;  %v2043_v58 = vmin.f32 %v2027_v47, 6.0  ;;  %v2025_v57 = vmax.f32 %v2009_v8, 0.0 }
 0x179   : > { %v2014_v29 = vadd.f32 3.0, %v1998_v4  ;;  %v1996_v22 = vadd.f32 %v3543_v9, %v1973_v33  ;;  %v1976_v31 = vadd.f32 %v2634_v38, %v1844_v19  ;;  %v1842_v1 = vadd.f32 %v1793_v61, %v1694_v12  ;;  %v2619_v16 = vpop.f32.mrf.mxu1  ;;  %v2638_v17 = vpop.f32.mrf.mxu0 }
 0x17a   : > { %2091 = vst.msk [vmem:[%s3594_s14 + $0x10] sm:$0xff] %vm2088_vm8, %v2074_v37  ;;  %v2072_v54 = vmul.f32 0.16666667, %v2056_v13  ;;  %v2059_v60 = vmul.f32 %v2043_v58, %v1995_v44  ;;  %v2041_v23 = vmin.f32 %v2025_v57, 6.0  ;;  %v1847_v35 = vadd.f32 %v2619_v16, %v3557_v11 }
 0x17b   : > { %v2030_v15 = vmax.f32 %v2014_v29, 0.0  ;;  %v2012_v63 = vadd.f32 3.0, %v1996_v22  ;;  %v1999_v59 = vadd.f32 %v3543_v9, %v1976_v31  ;;  %v1974_v34 = vadd.f32 %v1925_v30, %v1842_v1  ;;  %v1806_v18 = vpop.f32.mrf.mxu1  ;;  %v1941_v26 = vpop.f32.mrf.mxu0 }
 0x17c   : > { %2089 = vst.msk [vmem:[%s3594_s14] sm:$0xff] %vm2088_vm8, %v2072_v54  ;;  %v2075_v12 = vmul.f32 0.16666667, %v2059_v60  ;;  %v2057_v14 = vmul.f32 %v2041_v23, %v1993_v0  ;;  %v1979_v52 = vadd.f32 %v2637_v40, %v1847_v35  ;;  %v1845_v49 = vadd.f32 %v1806_v18, %v3563_v20 }
 0x17d   : > { %v2046_v48 = vmin.f32 %v2030_v15, 6.0  ;;  %v2028_v5 = vmax.f32 %v2012_v63, 0.0  ;;  %v2015_v32 = vadd.f32 3.0, %v1999_v59  ;;  %v1997_v11 = vadd.f32 %v3543_v9, %v1974_v34  ;;  %v2620_v7 = vpop.f32.mrf.mxu1  ;;  %v2641_v42 = vpop.f32.mrf.mxu0 }
 0x17e   : > { %2092 = vst.msk [vmem:[%s3594_s14 + $0x18] sm:$0xff] %vm2088_vm8, %v2075_v12  ;;  %v2073_v38 = vmul.f32 0.16666667, %v2057_v14  ;;  %v2002_v6 = vadd.f32 %v3543_v9, %v1979_v52  ;;  %v1977_v24 = vadd.f32 %v1938_v10, %v1845_v49  ;;  %v1848_v44 = vadd.f32 %v2620_v7, %v3566_v45 }
 0x17f   : > { %v2062_v53 = vmul.f32 %v2046_v48, %v1998_v4  ;;  %v2044_v51 = vmin.f32 %v2028_v5, 6.0  ;;  %v2031_v28 = vmax.f32 %v2015_v32, 0.0  ;;  %v2013_v20 = vadd.f32 3.0, %v1997_v11  ;;  %v1809_v56 = vpop.f32.mrf.mxu1  ;;  %v1954_v8 = vpop.f32.mrf.mxu0 }
 0x180   : > { %2090 = vst.msk [vmem:[%s3594_s14 + $0x8] sm:$0xff] %vm2088_vm8, %v2073_v38  ;;  %v2018_v30 = vadd.f32 3.0, %v2002_v6  ;;  %v2000_v43 = vadd.f32 %v3543_v9, %v1977_v24  ;;  %v1980_v39 = vadd.f32 %v2638_v17, %v1848_v44  ;;  %v1846_v46 = vadd.f32 %v1809_v56, %v3574_v36 }
 0x181   : > { %v2078_v0 = vmul.f32 0.16666667, %v2062_v53  ;;  %v2060_v21 = vmul.f32 %v2044_v51, %v1996_v22  ;;  %v2047_v2 = vmin.f32 %v2031_v28, 6.0  ;;  %v2029_v25 = vmax.f32 %v2013_v20, 0.0  ;;  %v2623_v45 = vpop.f32.mrf.mxu1  ;;  %v2642_v60 = vpop.f32.mrf.mxu0 }
 0x182   : > { %v2034_v40 = vmax.f32 %v2018_v30, 0.0  ;;  %v2016_v3 = vadd.f32 3.0, %v2000_v43  ;;  %v2003_v41 = vadd.f32 %v3543_v9, %v1980_v39  ;;  %v1978_v47 = vadd.f32 %v1941_v26, %v1846_v46 }
 0x183   : > { %2095 = vst.msk [vmem:[%s3594_s14 + $0x30] sm:$0xff] %vm2088_vm8, %v2078_v0  ;;  %v2076_v4 = vmul.f32 0.16666667, %v2060_v21  ;;  %v2063_v33 = vmul.f32 %v2047_v2, %v1999_v59  ;;  %v2045_v19 = vmin.f32 %v2029_v25, 6.0  ;;  %v1851_v61 = vadd.f32 %v2623_v45, %v3577_v27  ;;  %v1822_v36 = vpop.f32.mrf.mxu1  ;;  %v1957_v32 = vpop.f32.mrf.mxu0 }
 0x184   : > { %v2050_v10 = vmin.f32 %v2034_v40, 6.0  ;;  %v2032_v37 = vmax.f32 %v2016_v3, 0.0  ;;  %v2019_v13 = vadd.f32 3.0, %v2003_v41  ;;  %v2001_v58 = vadd.f32 %v3543_v9, %v1978_v47 }
 0x185   : > { %2093 = vst.msk [vmem:[%s3594_s14 + $0x20] sm:$0xff] %vm2088_vm8, %v2076_v4  ;;  %v2079_v57 = vmul.f32 0.16666667, %v2063_v33  ;;  %v2061_v29 = vmul.f32 %v2045_v19, %v1997_v11  ;;  %v1983_v22 = vadd.f32 %v2641_v42, %v1851_v61  ;;  %v1849_v31 = vadd.f32 %v1822_v36, %v3583_v55  ;;  %v2624_v1 = vpop.f32.mrf.mxu1 }
 0x186   : > { %v2066_v16 = vmul.f32 %v2050_v10, %v2002_v6  ;;  %v2048_v17 = vmin.f32 %v2032_v37, 6.0  ;;  %v2035_v54 = vmax.f32 %v2019_v13, 0.0  ;;  %v2017_v27 = vadd.f32 3.0, %v2001_v58 }
 0x187   : > { %2096 = vst.msk [vmem:[%s3594_s14 + $0x38] sm:$0xff] %vm2088_vm8, %v2079_v57  ;;  %v2077_v23 = vmul.f32 0.16666667, %v2061_v29  ;;  %v2006_v35 = vadd.f32 %v3543_v9, %v1983_v22  ;;  %v1981_v15 = vadd.f32 %v1954_v8, %v1849_v31  ;;  %v1852_v63 = vadd.f32 %v2624_v1, %v3586_v50  ;;  %v1825_v59 = vpop.f32.mrf.mxu1 }
 0x188   : > { %v2082_v34 = vmul.f32 0.16666667, %v2066_v16  ;;  %v2064_v18 = vmul.f32 %v2048_v17, %v2000_v43  ;;  %v2051_v55 = vmin.f32 %v2035_v54, 6.0  ;;  %v2033_v26 = vmax.f32 %v2017_v27, 0.0 }
 0x189   : > { %2094 = vst.msk [vmem:[%s3594_s14 + $0x28] sm:$0xff] %vm2088_vm8, %v2077_v23  ;;  %v2022_v12 = vadd.f32 3.0, %v2006_v35  ;;  %v2004_v14 = vadd.f32 %v3543_v9, %v1981_v15  ;;  %v1984_v52 = vadd.f32 %v2642_v60, %v1852_v63  ;;  %v1850_v49 = vadd.f32 %v1825_v59, %v3589_v62 }
 0x18a   : > { %2099 = vst.msk [vmem:[%s3594_s14 + $0x50] sm:$0xff] %vm2088_vm8, %v2082_v34  ;;  %v2080_v48 = vmul.f32 0.16666667, %v2064_v18  ;;  %v2067_v5 = vmul.f32 %v2051_v55, %v2003_v41  ;;  %v2049_v50 = vmin.f32 %v2033_v26, 6.0 }
 0x18b   : > { %v2038_v11 = vmax.f32 %v2022_v12, 0.0  ;;  %v2020_v7 = vadd.f32 3.0, %v2004_v14  ;;  %v2007_v38 = vadd.f32 %v3543_v9, %v1984_v52  ;;  %v1982_v6 = vadd.f32 %v1957_v32, %v1850_v49 }
 0x18c   : > { %2097 = vst.msk [vmem:[%s3594_s14 + $0x40] sm:$0xff] %vm2088_vm8, %v2080_v48  ;;  %v2083_v24 = vmul.f32 0.16666667, %v2067_v5  ;;  %v2065_v44 = vmul.f32 %v2049_v50, %v2001_v58 }
 0x18d   : > { %v2054_v42 = vmin.f32 %v2038_v11, 6.0  ;;  %v2036_v62 = vmax.f32 %v2020_v7, 0.0  ;;  %v2023_v53 = vadd.f32 3.0, %v2007_v38  ;;  %v2005_v51 = vadd.f32 %v3543_v9, %v1982_v6 }
 0x18e   : > { %2100 = vst.msk [vmem:[%s3594_s14 + $0x58] sm:$0xff] %vm2088_vm8, %v2083_v24  ;;  %v2081_v28 = vmul.f32 0.16666667, %v2065_v44 }
 0x18f   : > { %v2070_v20 = vmul.f32 %v2054_v42, %v2006_v35  ;;  %v2052_v56 = vmin.f32 %v2036_v62, 6.0  ;;  %v2039_v30 = vmax.f32 %v2023_v53, 0.0  ;;  %v2021_v43 = vadd.f32 3.0, %v2005_v51 }
 0x190   : > { %2098 = vst.msk [vmem:[%s3594_s14 + $0x48] sm:$0xff] %vm2088_vm8, %v2081_v28 }
 0x191   : > { %v2086_v39 = vmul.f32 0.16666667, %v2070_v20  ;;  %v2068_v46 = vmul.f32 %v2052_v56, %v2004_v14  ;;  %v2055_v0 = vmin.f32 %v2039_v30, 6.0  ;;  %v2037_v21 = vmax.f32 %v2021_v43, 0.0 }
 0x193   : > { %2103 = vst.msk [vmem:[%s3594_s14 + $0x70] sm:$0xff] %vm2088_vm8, %v2086_v39  ;;  %v2084_v2 = vmul.f32 0.16666667, %v2068_v46  ;;  %v2071_v9 = vmul.f32 %v2055_v0, %v2007_v38  ;;  %v2053_v25 = vmin.f32 %v2037_v21, 6.0 }
 0x195   : > { %2101 = vst.msk [vmem:[%s3594_s14 + $0x60] sm:$0xff] %vm2088_vm8, %v2084_v2  ;;  %v2087_v45 = vmul.f32 0.16666667, %v2071_v9  ;;  %v2069_v40 = vmul.f32 %v2053_v25, %v2005_v51 }
 0x197   : > { %2104 = vst.msk [vmem:[%s3594_s14 + $0x78] sm:$0xff] %vm2088_vm8, %v2087_v45  ;;  %v2085_v3 = vmul.f32 0.16666667, %v2069_v40 }
 0x199   : > { %2102 = vst.msk [vmem:[%s3594_s14 + $0x68] sm:$0xff] %vm2088_vm8, %v2085_v3 }
 0x19a PF: > { %s15_s22 = sadd.s32 1, %s2747_s22   ;;  %s3710_s18 = smov %s2739_s20 }
 0x19b   : > { %p12_p10 = scmp.ge.s32.totalorder %s15_s22, 6   ;;  %s3711_s19 = smov %s2743_s21 }
 0x19c   : > { %s3712_s20 = smov %s3715_s23  ;;  %s3713_s21 = smov %s3719_s24 }
 0x19d   :  { %14 = sbr.rel (!%p12_p10) target bundleno = 3 (0x3), region = 84 }

</bundles_post_ra>
